<compile_context>
chip_gen: v7x
topology: tpu7x:2x2x1
jax: 0.10.0
libtpu: 0.0.40
codegen_flags: <defaults>
</compile_context>

<pallas_src>
import jax
import jax.numpy as jnp
from jax.experimental import pallas as pl
from jax.experimental.pallas import tpu as pltpu

EPS = 1e-5
LANE = 128
TM_MAX = 512
VMEM_LIMIT = 32 * 1024 * 1024


def _round_up(x, m):
    return ((x + m - 1) // m) * m


def _choose_m_tile(m, tm_max=TM_MAX):
    m8 = _round_up(m, 8)
    if m8 <= tm_max:
        return m8, m8
    return tm_max, _round_up(m, tm_max)


# ----------------------------- Pallas kernels ------------------------------ #

def _conv_pool_kernel(x_ref, w_ref, b_ref, o_ref, acc_ref):
    # grid = (M_tiles, 4): axis 0 tiles the pooled output rows ("parallel"),
    # axis 1 walks the 4 taps of each 2x2 pooling window ("arbitrary").
    # out = relu(max_p(x_p @ W) + bias), BN scale already folded into W.
    p = pl.program_id(1)
    y = jnp.dot(x_ref[...], w_ref[...], preferred_element_type=jnp.float32)

    @pl.when(p == 0)
    def _():
        acc_ref[...] = y

    @pl.when(p > 0)
    def _():
        acc_ref[...] = jnp.maximum(acc_ref[...], y)

    @pl.when(p == pl.num_programs(1) - 1)
    def _():
        o_ref[...] = jnp.maximum(acc_ref[...] + b_ref[...], 0.0).astype(o_ref.dtype)


def conv_pool_matmul(x4, wmat, bias):
    # x4: (4, M, K) im2col rows for the 4 pool-window taps.
    # wmat: (K, N) with BN scale folded in; bias: (N,). N is a multiple of 128.
    _, M, K = x4.shape
    N = wmat.shape[1]
    tm, m_pad = _choose_m_tile(M)
    if m_pad != M:
        x4 = jnp.pad(x4, ((0, 0), (0, m_pad - M), (0, 0)))
    out = pl.pallas_call(
        _conv_pool_kernel,
        out_shape=jax.ShapeDtypeStruct((m_pad, N), jnp.float32),
        grid_spec=pltpu.PrefetchScalarGridSpec(
            num_scalar_prefetch=0,
            grid=(m_pad // tm, 4),
            in_specs=[
                pl.BlockSpec((pl.Squeezed(), tm, K), lambda m, p: (p, m, 0)),
                pl.BlockSpec((K, N), lambda m, p: (0, 0)),
                pl.BlockSpec((1, N), lambda m, p: (0, 0)),
            ],
            out_specs=pl.BlockSpec((tm, N), lambda m, p: (m, 0)),
            scratch_shapes=[pltpu.VMEM((tm, N), jnp.float32)],
        ),
        compiler_params=pltpu.CompilerParams(
            dimension_semantics=("parallel", "arbitrary"),
            vmem_limit_bytes=VMEM_LIMIT,
        ),
    )(x4, wmat, bias.reshape(1, N))
    return out[:M]


def _fc_head_kernel(x_ref, w1_ref, b1_ref, w2_ref, b2_ref, o_ref):
    # Fused Linear -> (folded) BN -> ReLU -> Linear; hidden never hits HBM.
    h = jnp.dot(x_ref[...], w1_ref[...], preferred_element_type=jnp.float32) + b1_ref[...]
    h = jnp.maximum(h, 0.0)
    y = jnp.dot(h, w2_ref[...], preferred_element_type=jnp.float32) + b2_ref[...]
    o_ref[...] = y.astype(o_ref.dtype)


def fc_head(x, w1, b1, w2, b2):
    M, K = x.shape
    H = w1.shape[1]
    N = w2.shape[1]
    tm, m_pad = _choose_m_tile(M)
    if m_pad != M:
        x = jnp.pad(x, ((0, m_pad - M), (0, 0)))
    out = pl.pallas_call(
        _fc_head_kernel,
        out_shape=jax.ShapeDtypeStruct((m_pad, N), jnp.float32),
        grid_spec=pltpu.PrefetchScalarGridSpec(
            num_scalar_prefetch=0,
            grid=(m_pad // tm,),
            in_specs=[
                pl.BlockSpec((tm, K), lambda m: (m, 0)),
                pl.BlockSpec((K, H), lambda m: (0, 0)),
                pl.BlockSpec((1, H), lambda m: (0, 0)),
                pl.BlockSpec((H, N), lambda m: (0, 0)),
                pl.BlockSpec((1, N), lambda m: (0, 0)),
            ],
            out_specs=pl.BlockSpec((tm, N), lambda m: (m, 0)),
        ),
        compiler_params=pltpu.CompilerParams(
            dimension_semantics=("parallel",),
            vmem_limit_bytes=VMEM_LIMIT,
        ),
    )(x, w1, b1.reshape(1, H), w2, b2.reshape(1, N))
    return out[:M]


# ------------------------------ JAX glue ----------------------------------- #

def _patches(x):
    # (B, H, W, C) -> (B, H-2, W-2, 9*C); element order = (kh, kw, cin).
    B, H, W, C = x.shape
    Ho, Wo = H - 2, W - 2
    cols = [x[:, kh:kh + Ho, kw:kw + Wo, :] for kh in range(3) for kw in range(3)]
    return jnp.concatenate(cols, axis=-1)


def conv_block(x, wmat, bias):
    # 3x3 valid conv -> folded BN -> ReLU -> 2x2/2 maxpool, all in one pallas_call.
    # Only conv positions that survive floor-pooling are computed (matches PyTorch,
    # which discards the trailing row/col).
    B, H, W, _ = x.shape
    Ho, Wo = H - 2, W - 2
    Hp, Wp = Ho // 2, Wo // 2
    p = _patches(x)                                               # (B, Ho, Wo, K)
    K = p.shape[-1]
    x4 = jnp.stack(
        [p[:, dr:dr + 2 * Hp:2, dc:dc + 2 * Wp:2, :]
         for dr in range(2) for dc in range(2)],
        axis=0,
    ).reshape(4, B * Hp * Wp, K)                                  # (4, M, K)
    y = conv_pool_matmul(x4, wmat, bias)                          # (M, Npad)
    return y.reshape(B, Hp, Wp, wmat.shape[1])


def _pad_axis(a, axis, target):
    pad = target - a.shape[axis]
    if pad <= 0:
        return a
    widths = [(0, 0)] * a.ndim
    widths[axis] = (0, pad)
    return jnp.pad(a, widths)


def _fold_bn(gamma, beta, mean, var, lin_bias):
    s = gamma / jnp.sqrt(var + EPS)
    b = beta + s * (lin_bias - mean)
    return s, b


def _prep_conv(w, b, gamma, beta, mean, var, cin_pad, cout_pad):
    # torch conv weight (Cout, Cin, 3, 3) -> (9*cin_pad, cout_pad) matmul matrix,
    # K order (kh, kw, cin).  BN scale folded into the columns; zero rows/cols
    # for the carried channel padding (padded channels are exactly zero).
    s, bias = _fold_bn(gamma, beta, mean, var, b)
    w = w * s[:, None, None, None]
    w = _pad_axis(w, 1, cin_pad)
    cout = w.shape[0]
    wmat = jnp.transpose(w, (2, 3, 1, 0)).reshape(9 * cin_pad, cout)
    return _pad_axis(wmat, 1, cout_pad), _pad_axis(bias, 0, cout_pad)


def init_params(seed=0):
    key = jax.random.PRNGKey(seed)

    def nrm(k, shape, std=0.05):
        return std * jax.random.normal(k, shape, dtype=jnp.float32)

    def bn(k, c):
        ks = jax.random.split(k, 4)
        return (1.0 + nrm(ks[0], (c,)), nrm(ks[1], (c,)),
                nrm(ks[2], (c,)), 1.0 + jnp.abs(nrm(ks[3], (c,))))

    k1, k2, k3, k4, k5 = jax.random.split(key, 5)

    # Conv2d(1, 72) + BN2d(72): output channels padded 72 -> 128.
    ks = jax.random.split(k1, 3)
    c1 = _prep_conv(nrm(ks[0], (72, 1, 3, 3)), nrm(ks[1], (72,)),
                    *bn(ks[2], 72), cin_pad=1, cout_pad=128)

    # Conv2d(72, 256) + BN2d(256): input channels carried padded to 128.
    ks = jax.random.split(k2, 3)
    c2 = _prep_conv(nrm(ks[0], (256, 72, 3, 3)), nrm(ks[1], (256,)),
                    *bn(ks[2], 256), cin_pad=128, cout_pad=256)

    # Conv2d(256, 128) + BN2d(128).
    ks = jax.random.split(k3, 3)
    c3 = _prep_conv(nrm(ks[0], (128, 256, 3, 3)), nrm(ks[1], (128,)),
                    *bn(ks[2], 128), cin_pad=256, cout_pad=128)

    # Linear(128, 84) + BN1d(84) (folded, output padded to 128).
    ks = jax.random.split(k4, 3)
    w1 = nrm(ks[0], (84, 128))
    b1 = nrm(ks[1], (84,))
    s1, bb1 = _fold_bn(*bn(ks[2], 84), b1)
    w1m = _pad_axis(jnp.transpose(w1) * s1[None, :], 1, 128)       # (128, 128)
    bb1 = _pad_axis(bb1, 0, 128)

    # Linear(84, 10): input padded 84 -> 128 (zero rows), output 10 -> 128.
    ks = jax.random.split(k5, 2)
    w2 = nrm(ks[0], (10, 84))
    b2 = nrm(ks[1], (10,))
    w2m = _pad_axis(_pad_axis(jnp.transpose(w2), 0, 128), 1, 128)  # (128, 128)
    bb2 = _pad_axis(b2, 0, 128)

    return {"c1": c1, "c2": c2, "c3": c3, "fc": (w1m, bb1, w2m, bb2)}


def zynet_forward(x_nchw, params):
    # x: (B, 1, 28, 28) NCHW, as PyTorch would receive it.
    x = jnp.transpose(x_nchw, (0, 2, 3, 1)).astype(jnp.float32)    # NHWC
    x = conv_block(x, *params["c1"])    # (B, 13, 13, 128)  (72 real + 56 zero ch)
    x = conv_block(x, *params["c2"])    # (B, 5, 5, 256)
    x = conv_block(x, *params["c3"])    # (B, 1, 1, 128)
    B = x.shape[0]
    x = x.reshape(B, 128)               # Flatten (1x1 spatial == NCHW flatten)
    logits = fc_head(x, *params["fc"])  # (B, 128), cols 10.. are padding
    return logits[:, :10]


if __name__ == "__main__":
    params = init_params(0)
    x = jax.random.normal(jax.random.PRNGKey(0), (2, 1, 28, 28), dtype=jnp.float32)

    out = jax.jit(lambda v: zynet_forward(v, params))(x)
    out = jax.block_until_ready(out)

    assert out.shape == (2, 10), out.shape
    assert bool(jnp.all(jnp.isfinite(out)))
    print("KERNEL_OK")
</pallas_src>

<mosaic_0001>
module attributes {stable_mosaic.version = 11 : i64} {
  func.func @_conv_pool_kernel(%arg0: i32, %arg1: i32, %arg2: memref<1x344x9xf32, #tpu.memory_space<vmem>>, %arg3: memref<9x128xf32, #tpu.memory_space<vmem>>, %arg4: memref<1x128xf32, #tpu.memory_space<vmem>>, %arg5: memref<344x128xf32, #tpu.memory_space<vmem>>, %arg6: memref<344x128xf32, #tpu.memory_space<vmem>>) attributes {dimension_semantics = [#tpu.dimension_semantics<parallel>, #tpu.dimension_semantics<arbitrary>], iteration_bounds = array<i64: 1, 4>, scalar_prefetch = 0 : i64, scratch_operands = 1 : i64, tpu.core_type = #tpu.core_type<tc>, window_params = [{transform_indices = @transform_0, window_bounds = array<i64: 1, 344, 9>}, {pipeline_mode = #tpu.pipeline_mode<synchronous>, transform_indices = @transform_1, window_bounds = array<i64: 9, 128>}, {pipeline_mode = #tpu.pipeline_mode<synchronous>, transform_indices = @transform_2, window_bounds = array<i64: 1, 128>}, {transform_indices = @transform_3, window_bounds = array<i64: 344, 128>}]} {
    %c0 = arith.constant 0 : index
    %c0_0 = arith.constant 0 : index
    %c0_1 = arith.constant 0 : index
    %0 = vector.load %arg2[%c0, %c0_0, %c0_1] : memref<1x344x9xf32, #tpu.memory_space<vmem>>, vector<1x344x9xf32>
    %1 = vector.shape_cast %0 : vector<1x344x9xf32> to vector<344x9xf32>
    %c0_2 = arith.constant 0 : index
    %c0_3 = arith.constant 0 : index
    %2 = vector.load %arg3[%c0_2, %c0_3] : memref<9x128xf32, #tpu.memory_space<vmem>>, vector<9x128xf32>
    %cst = arith.constant dense<0.000000e+00> : vector<344x128xf32>
    %3 = tpu.matmul %1, %2, %cst {dimension_numbers = #tpu.dot_dimension_numbers<[1], [0], [0], [1], [0, 0, 1, 1], [], []>} : vector<344x9xf32>, vector<9x128xf32>, vector<344x128xf32> -> vector<344x128xf32>
    %c0_i32 = arith.constant 0 : i32
    %4 = arith.cmpi eq, %arg1, %c0_i32 : i32
    %5 = arith.extui %4 : i1 to i32
    %c0_i32_4 = arith.constant 0 : i32
    %6 = arith.cmpi ne, %5, %c0_i32_4 : i32
    scf.if %6 {
      %c0_8 = arith.constant 0 : index
      %c0_9 = arith.constant 0 : index
      %13 = vector.load %arg6[%c0_8, %c0_9] : memref<344x128xf32, #tpu.memory_space<vmem>>, vector<344x128xf32>
      tpu.vector_store %arg6[%c0_8, %c0_9], %3 {strides = array<i32>} : memref<344x128xf32, #tpu.memory_space<vmem>>, vector<344x128xf32>,
    } else {
    }
    %c0_i32_5 = arith.constant 0 : i32
    %7 = arith.cmpi sgt, %arg1, %c0_i32_5 : i32
    %8 = arith.extui %7 : i1 to i32
    %c0_i32_6 = arith.constant 0 : i32
    %9 = arith.cmpi ne, %8, %c0_i32_6 : i32
    scf.if %9 {
      %c0_8 = arith.constant 0 : index
      %c0_9 = arith.constant 0 : index
      %13 = vector.load %arg6[%c0_8, %c0_9] : memref<344x128xf32, #tpu.memory_space<vmem>>, vector<344x128xf32>
      %14 = arith.maximumf %13, %3 : vector<344x128xf32>
      %c0_10 = arith.constant 0 : index
      %c0_11 = arith.constant 0 : index
      %15 = vector.load %arg6[%c0_10, %c0_11] : memref<344x128xf32, #tpu.memory_space<vmem>>, vector<344x128xf32>
      tpu.vector_store %arg6[%c0_10, %c0_11], %14 {strides = array<i32>} : memref<344x128xf32, #tpu.memory_space<vmem>>, vector<344x128xf32>,
    } else {
    }
    %c3_i32 = arith.constant 3 : i32
    %10 = arith.cmpi eq, %arg1, %c3_i32 : i32
    %11 = arith.extui %10 : i1 to i32
    %c0_i32_7 = arith.constant 0 : i32
    %12 = arith.cmpi ne, %11, %c0_i32_7 : i32
    scf.if %12 {
      %c0_8 = arith.constant 0 : index
      %c0_9 = arith.constant 0 : index
      %13 = vector.load %arg6[%c0_8, %c0_9] : memref<344x128xf32, #tpu.memory_space<vmem>>, vector<344x128xf32>
      %c0_10 = arith.constant 0 : index
      %c0_11 = arith.constant 0 : index
      %14 = vector.load %arg4[%c0_10, %c0_11] : memref<1x128xf32, #tpu.memory_space<vmem>>, vector<1x128xf32>
      %15 = vector.broadcast %14 : vector<1x128xf32> to vector<344x128xf32>
      %16 = arith.addf %13, %15 : vector<344x128xf32>
      %cst_12 = arith.constant 0.000000e+00 : f32
      %17 = vector.broadcast %cst_12 : f32 to vector<344x128xf32>
      %18 = arith.maximumf %16, %17 : vector<344x128xf32>
      %c0_13 = arith.constant 0 : index
      %c0_14 = arith.constant 0 : index
      %19 = vector.load %arg5[%c0_13, %c0_14] : memref<344x128xf32, #tpu.memory_space<vmem>>, vector<344x128xf32>
      tpu.vector_store %arg5[%c0_13, %c0_14], %18 {strides = array<i32>} : memref<344x128xf32, #tpu.memory_space<vmem>>, vector<344x128xf32>,
    } else {
    }
    return
  }
  func.func @transform_0(%arg0: i32, %arg1: i32) -> (i32, i32, i32) {
    %c0_i32 = arith.constant 0 : i32
    %c0_i32_0 = arith.constant 0 : i32
    return %arg1, %arg0, %c0_i32 : i32, i32, i32
  }
  func.func @transform_1(%arg0: i32, %arg1: i32) -> (i32, i32) {
    %c0_i32 = arith.constant 0 : i32
    %c0_i32_0 = arith.constant 0 : i32
    %c0_i32_1 = arith.constant 0 : i32
    return %c0_i32, %c0_i32_0 : i32, i32
  }
  func.func @transform_2(%arg0: i32, %arg1: i32) -> (i32, i32) {
    %c0_i32 = arith.constant 0 : i32
    %c0_i32_0 = arith.constant 0 : i32
    %c0_i32_1 = arith.constant 0 : i32
    return %c0_i32, %c0_i32_0 : i32, i32
  }
  func.func @transform_3(%arg0: i32, %arg1: i32) -> (i32, i32) {
    %c0_i32 = arith.constant 0 : i32
    %c0_i32_0 = arith.constant 0 : i32
    return %arg0, %c0_i32 : i32, i32
  }
}

module attributes {stable_mosaic.version = 11 : i64} {
  func.func @_conv_pool_kernel(%arg0: i32, %arg1: i32, %arg2: memref<1x56x1152xf32, #tpu.memory_space<vmem>>, %arg3: memref<1152x256xf32, #tpu.memory_space<vmem>>, %arg4: memref<1x256xf32, #tpu.memory_space<vmem>>, %arg5: memref<56x256xf32, #tpu.memory_space<vmem>>, %arg6: memref<56x256xf32, #tpu.memory_space<vmem>>) attributes {dimension_semantics = [#tpu.dimension_semantics<parallel>, #tpu.dimension_semantics<arbitrary>], iteration_bounds = array<i64: 1, 4>, scalar_prefetch = 0 : i64, scratch_operands = 1 : i64, tpu.core_type = #tpu.core_type<tc>, window_params = [{transform_indices = @transform_0, window_bounds = array<i64: 1, 56, 1152>}, {pipeline_mode = #tpu.pipeline_mode<synchronous>, transform_indices = @transform_1, window_bounds = array<i64: 1152, 256>}, {pipeline_mode = #tpu.pipeline_mode<synchronous>, transform_indices = @transform_2, window_bounds = array<i64: 1, 256>}, {transform_indices = @transform_3, window_bounds = array<i64: 56, 256>}]} {
    %c0 = arith.constant 0 : index
    %c0_0 = arith.constant 0 : index
    %c0_1 = arith.constant 0 : index
    %0 = vector.load %arg2[%c0, %c0_0, %c0_1] : memref<1x56x1152xf32, #tpu.memory_space<vmem>>, vector<1x56x1152xf32>
    %1 = vector.shape_cast %0 : vector<1x56x1152xf32> to vector<56x1152xf32>
    %c0_2 = arith.constant 0 : index
    %c0_3 = arith.constant 0 : index
    %2 = vector.load %arg3[%c0_2, %c0_3] : memref<1152x256xf32, #tpu.memory_space<vmem>>, vector<1152x256xf32>
    %cst = arith.constant dense<0.000000e+00> : vector<56x256xf32>
    %3 = tpu.matmul %1, %2, %cst {dimension_numbers = #tpu.dot_dimension_numbers<[1], [0], [0], [1], [0, 0, 1, 1], [], []>} : vector<56x1152xf32>, vector<1152x256xf32>, vector<56x256xf32> -> vector<56x256xf32>
    %c0_i32 = arith.constant 0 : i32
    %4 = arith.cmpi eq, %arg1, %c0_i32 : i32
    %5 = arith.extui %4 : i1 to i32
    %c0_i32_4 = arith.constant 0 : i32
    %6 = arith.cmpi ne, %5, %c0_i32_4 : i32
    scf.if %6 {
      %c0_8 = arith.constant 0 : index
      %c0_9 = arith.constant 0 : index
      %13 = vector.load %arg6[%c0_8, %c0_9] : memref<56x256xf32, #tpu.memory_space<vmem>>, vector<56x256xf32>
      tpu.vector_store %arg6[%c0_8, %c0_9], %3 {strides = array<i32>} : memref<56x256xf32, #tpu.memory_space<vmem>>, vector<56x256xf32>,
    } else {
    }
    %c0_i32_5 = arith.constant 0 : i32
    %7 = arith.cmpi sgt, %arg1, %c0_i32_5 : i32
    %8 = arith.extui %7 : i1 to i32
    %c0_i32_6 = arith.constant 0 : i32
    %9 = arith.cmpi ne, %8, %c0_i32_6 : i32
    scf.if %9 {
      %c0_8 = arith.constant 0 : index
      %c0_9 = arith.constant 0 : index
      %13 = vector.load %arg6[%c0_8, %c0_9] : memref<56x256xf32, #tpu.memory_space<vmem>>, vector<56x256xf32>
      %14 = arith.maximumf %13, %3 : vector<56x256xf32>
      %c0_10 = arith.constant 0 : index
      %c0_11 = arith.constant 0 : index
      %15 = vector.load %arg6[%c0_10, %c0_11] : memref<56x256xf32, #tpu.memory_space<vmem>>, vector<56x256xf32>
      tpu.vector_store %arg6[%c0_10, %c0_11], %14 {strides = array<i32>} : memref<56x256xf32, #tpu.memory_space<vmem>>, vector<56x256xf32>,
    } else {
    }
    %c3_i32 = arith.constant 3 : i32
    %10 = arith.cmpi eq, %arg1, %c3_i32 : i32
    %11 = arith.extui %10 : i1 to i32
    %c0_i32_7 = arith.constant 0 : i32
    %12 = arith.cmpi ne, %11, %c0_i32_7 : i32
    scf.if %12 {
      %c0_8 = arith.constant 0 : index
      %c0_9 = arith.constant 0 : index
      %13 = vector.load %arg6[%c0_8, %c0_9] : memref<56x256xf32, #tpu.memory_space<vmem>>, vector<56x256xf32>
      %c0_10 = arith.constant 0 : index
      %c0_11 = arith.constant 0 : index
      %14 = vector.load %arg4[%c0_10, %c0_11] : memref<1x256xf32, #tpu.memory_space<vmem>>, vector<1x256xf32>
      %15 = vector.broadcast %14 : vector<1x256xf32> to vector<56x256xf32>
      %16 = arith.addf %13, %15 : vector<56x256xf32>
      %cst_12 = arith.constant 0.000000e+00 : f32
      %17 = vector.broadcast %cst_12 : f32 to vector<56x256xf32>
      %18 = arith.maximumf %16, %17 : vector<56x256xf32>
      %c0_13 = arith.constant 0 : index
      %c0_14 = arith.constant 0 : index
      %19 = vector.load %arg5[%c0_13, %c0_14] : memref<56x256xf32, #tpu.memory_space<vmem>>, vector<56x256xf32>
      tpu.vector_store %arg5[%c0_13, %c0_14], %18 {strides = array<i32>} : memref<56x256xf32, #tpu.memory_space<vmem>>, vector<56x256xf32>,
    } else {
    }
    return
  }
  func.func @transform_0(%arg0: i32, %arg1: i32) -> (i32, i32, i32) {
    %c0_i32 = arith.constant 0 : i32
    %c0_i32_0 = arith.constant 0 : i32
    return %arg1, %arg0, %c0_i32 : i32, i32, i32
  }
  func.func @transform_1(%arg0: i32, %arg1: i32) -> (i32, i32) {
    %c0_i32 = arith.constant 0 : i32
    %c0_i32_0 = arith.constant 0 : i32
    %c0_i32_1 = arith.constant 0 : i32
    return %c0_i32, %c0_i32_0 : i32, i32
  }
  func.func @transform_2(%arg0: i32, %arg1: i32) -> (i32, i32) {
    %c0_i32 = arith.constant 0 : i32
    %c0_i32_0 = arith.constant 0 : i32
    %c0_i32_1 = arith.constant 0 : i32
    return %c0_i32, %c0_i32_0 : i32, i32
  }
  func.func @transform_3(%arg0: i32, %arg1: i32) -> (i32, i32) {
    %c0_i32 = arith.constant 0 : i32
    %c0_i32_0 = arith.constant 0 : i32
    return %arg0, %c0_i32 : i32, i32
  }
}

module attributes {stable_mosaic.version = 11 : i64} {
  func.func @_conv_pool_kernel(%arg0: i32, %arg1: i32, %arg2: memref<1x8x2304xf32, #tpu.memory_space<vmem>>, %arg3: memref<2304x128xf32, #tpu.memory_space<vmem>>, %arg4: memref<1x128xf32, #tpu.memory_space<vmem>>, %arg5: memref<8x128xf32, #tpu.memory_space<vmem>>, %arg6: memref<8x128xf32, #tpu.memory_space<vmem>>) attributes {dimension_semantics = [#tpu.dimension_semantics<parallel>, #tpu.dimension_semantics<arbitrary>], iteration_bounds = array<i64: 1, 4>, scalar_prefetch = 0 : i64, scratch_operands = 1 : i64, tpu.core_type = #tpu.core_type<tc>, window_params = [{transform_indices = @transform_0, window_bounds = array<i64: 1, 8, 2304>}, {pipeline_mode = #tpu.pipeline_mode<synchronous>, transform_indices = @transform_1, window_bounds = array<i64: 2304, 128>}, {pipeline_mode = #tpu.pipeline_mode<synchronous>, transform_indices = @transform_2, window_bounds = array<i64: 1, 128>}, {transform_indices = @transform_3, window_bounds = array<i64: 8, 128>}]} {
    %c0 = arith.constant 0 : index
    %c0_0 = arith.constant 0 : index
    %c0_1 = arith.constant 0 : index
    %0 = vector.load %arg2[%c0, %c0_0, %c0_1] : memref<1x8x2304xf32, #tpu.memory_space<vmem>>, vector<1x8x2304xf32>
    %1 = vector.shape_cast %0 : vector<1x8x2304xf32> to vector<8x2304xf32>
    %c0_2 = arith.constant 0 : index
    %c0_3 = arith.constant 0 : index
    %2 = vector.load %arg3[%c0_2, %c0_3] : memref<2304x128xf32, #tpu.memory_space<vmem>>, vector<2304x128xf32>
    %cst = arith.constant dense<0.000000e+00> : vector<8x128xf32>
    %3 = tpu.matmul %1, %2, %cst {dimension_numbers = #tpu.dot_dimension_numbers<[1], [0], [0], [1], [0, 0, 1, 1], [], []>} : vector<8x2304xf32>, vector<2304x128xf32>, vector<8x128xf32> -> vector<8x128xf32>
    %c0_i32 = arith.constant 0 : i32
    %4 = arith.cmpi eq, %arg1, %c0_i32 : i32
    %5 = arith.extui %4 : i1 to i32
    %c0_i32_4 = arith.constant 0 : i32
    %6 = arith.cmpi ne, %5, %c0_i32_4 : i32
    scf.if %6 {
      %c0_8 = arith.constant 0 : index
      %c0_9 = arith.constant 0 : index
      %13 = vector.load %arg6[%c0_8, %c0_9] : memref<8x128xf32, #tpu.memory_space<vmem>>, vector<8x128xf32>
      tpu.vector_store %arg6[%c0_8, %c0_9], %3 {strides = array<i32>} : memref<8x128xf32, #tpu.memory_space<vmem>>, vector<8x128xf32>,
    } else {
    }
    %c0_i32_5 = arith.constant 0 : i32
    %7 = arith.cmpi sgt, %arg1, %c0_i32_5 : i32
    %8 = arith.extui %7 : i1 to i32
    %c0_i32_6 = arith.constant 0 : i32
    %9 = arith.cmpi ne, %8, %c0_i32_6 : i32
    scf.if %9 {
      %c0_8 = arith.constant 0 : index
      %c0_9 = arith.constant 0 : index
      %13 = vector.load %arg6[%c0_8, %c0_9] : memref<8x128xf32, #tpu.memory_space<vmem>>, vector<8x128xf32>
      %14 = arith.maximumf %13, %3 : vector<8x128xf32>
      %c0_10 = arith.constant 0 : index
      %c0_11 = arith.constant 0 : index
      %15 = vector.load %arg6[%c0_10, %c0_11] : memref<8x128xf32, #tpu.memory_space<vmem>>, vector<8x128xf32>
      tpu.vector_store %arg6[%c0_10, %c0_11], %14 {strides = array<i32>} : memref<8x128xf32, #tpu.memory_space<vmem>>, vector<8x128xf32>,
    } else {
    }
    %c3_i32 = arith.constant 3 : i32
    %10 = arith.cmpi eq, %arg1, %c3_i32 : i32
    %11 = arith.extui %10 : i1 to i32
    %c0_i32_7 = arith.constant 0 : i32
    %12 = arith.cmpi ne, %11, %c0_i32_7 : i32
    scf.if %12 {
      %c0_8 = arith.constant 0 : index
      %c0_9 = arith.constant 0 : index
      %13 = vector.load %arg6[%c0_8, %c0_9] : memref<8x128xf32, #tpu.memory_space<vmem>>, vector<8x128xf32>
      %c0_10 = arith.constant 0 : index
      %c0_11 = arith.constant 0 : index
      %14 = vector.load %arg4[%c0_10, %c0_11] : memref<1x128xf32, #tpu.memory_space<vmem>>, vector<1x128xf32>
      %15 = vector.broadcast %14 : vector<1x128xf32> to vector<8x128xf32>
      %16 = arith.addf %13, %15 : vector<8x128xf32>
      %cst_12 = arith.constant 0.000000e+00 : f32
      %17 = vector.broadcast %cst_12 : f32 to vector<8x128xf32>
      %18 = arith.maximumf %16, %17 : vector<8x128xf32>
      %c0_13 = arith.constant 0 : index
      %c0_14 = arith.constant 0 : index
      %19 = vector.load %arg5[%c0_13, %c0_14] : memref<8x128xf32, #tpu.memory_space<vmem>>, vector<8x128xf32>
      tpu.vector_store %arg5[%c0_13, %c0_14], %18 {strides = array<i32>} : memref<8x128xf32, #tpu.memory_space<vmem>>, vector<8x128xf32>,
    } else {
    }
    return
  }
  func.func @transform_0(%arg0: i32, %arg1: i32) -> (i32, i32, i32) {
    %c0_i32 = arith.constant 0 : i32
    %c0_i32_0 = arith.constant 0 : i32
    return %arg1, %arg0, %c0_i32 : i32, i32, i32
  }
  func.func @transform_1(%arg0: i32, %arg1: i32) -> (i32, i32) {
    %c0_i32 = arith.constant 0 : i32
    %c0_i32_0 = arith.constant 0 : i32
    %c0_i32_1 = arith.constant 0 : i32
    return %c0_i32, %c0_i32_0 : i32, i32
  }
  func.func @transform_2(%arg0: i32, %arg1: i32) -> (i32, i32) {
    %c0_i32 = arith.constant 0 : i32
    %c0_i32_0 = arith.constant 0 : i32
    %c0_i32_1 = arith.constant 0 : i32
    return %c0_i32, %c0_i32_0 : i32, i32
  }
  func.func @transform_3(%arg0: i32, %arg1: i32) -> (i32, i32) {
    %c0_i32 = arith.constant 0 : i32
    %c0_i32_0 = arith.constant 0 : i32
    return %arg0, %c0_i32 : i32, i32
  }
}

module attributes {stable_mosaic.version = 11 : i64} {
  func.func @_fc_head_kernel(%arg0: i32, %arg1: memref<8x128xf32, #tpu.memory_space<vmem>>, %arg2: memref<128x128xf32, #tpu.memory_space<vmem>>, %arg3: memref<1x128xf32, #tpu.memory_space<vmem>>, %arg4: memref<128x128xf32, #tpu.memory_space<vmem>>, %arg5: memref<1x128xf32, #tpu.memory_space<vmem>>, %arg6: memref<8x128xf32, #tpu.memory_space<vmem>>) attributes {dimension_semantics = [#tpu.dimension_semantics<parallel>], iteration_bounds = array<i64: 1>, scalar_prefetch = 0 : i64, scratch_operands = 0 : i64, tpu.core_type = #tpu.core_type<tc>, window_params = [{transform_indices = @transform_0, window_bounds = array<i64: 8, 128>}, {pipeline_mode = #tpu.pipeline_mode<synchronous>, transform_indices = @transform_1, window_bounds = array<i64: 128, 128>}, {pipeline_mode = #tpu.pipeline_mode<synchronous>, transform_indices = @transform_2, window_bounds = array<i64: 1, 128>}, {pipeline_mode = #tpu.pipeline_mode<synchronous>, transform_indices = @transform_3, window_bounds = array<i64: 128, 128>}, {pipeline_mode = #tpu.pipeline_mode<synchronous>, transform_indices = @transform_4, window_bounds = array<i64: 1, 128>}, {transform_indices = @transform_5, window_bounds = array<i64: 8, 128>}]} {
    %c0 = arith.constant 0 : index
    %c0_0 = arith.constant 0 : index
    %0 = vector.load %arg1[%c0, %c0_0] : memref<8x128xf32, #tpu.memory_space<vmem>>, vector<8x128xf32>
    %c0_1 = arith.constant 0 : index
    %c0_2 = arith.constant 0 : index
    %1 = vector.load %arg2[%c0_1, %c0_2] : memref<128x128xf32, #tpu.memory_space<vmem>>, vector<128x128xf32>
    %cst = arith.constant dense<0.000000e+00> : vector<8x128xf32>
    %2 = tpu.matmul %0, %1, %cst {dimension_numbers = #tpu.dot_dimension_numbers<[1], [0], [0], [1], [0, 0, 1, 1], [], []>} : vector<8x128xf32>, vector<128x128xf32>, vector<8x128xf32> -> vector<8x128xf32>
    %c0_3 = arith.constant 0 : index
    %c0_4 = arith.constant 0 : index
    %3 = vector.load %arg3[%c0_3, %c0_4] : memref<1x128xf32, #tpu.memory_space<vmem>>, vector<1x128xf32>
    %4 = vector.broadcast %3 : vector<1x128xf32> to vector<8x128xf32>
    %5 = arith.addf %2, %4 : vector<8x128xf32>
    %cst_5 = arith.constant 0.000000e+00 : f32
    %6 = vector.broadcast %cst_5 : f32 to vector<8x128xf32>
    %7 = arith.maximumf %5, %6 : vector<8x128xf32>
    %c0_6 = arith.constant 0 : index
    %c0_7 = arith.constant 0 : index
    %8 = vector.load %arg4[%c0_6, %c0_7] : memref<128x128xf32, #tpu.memory_space<vmem>>, vector<128x128xf32>
    %cst_8 = arith.constant dense<0.000000e+00> : vector<8x128xf32>
    %9 = tpu.matmul %7, %8, %cst_8 {dimension_numbers = #tpu.dot_dimension_numbers<[1], [0], [0], [1], [0, 0, 1, 1], [], []>} : vector<8x128xf32>, vector<128x128xf32>, vector<8x128xf32> -> vector<8x128xf32>
    %c0_9 = arith.constant 0 : index
    %c0_10 = arith.constant 0 : index
    %10 = vector.load %arg5[%c0_9, %c0_10] : memref<1x128xf32, #tpu.memory_space<vmem>>, vector<1x128xf32>
    %11 = vector.broadcast %10 : vector<1x128xf32> to vector<8x128xf32>
    %12 = arith.addf %9, %11 : vector<8x128xf32>
    %c0_11 = arith.constant 0 : index
    %c0_12 = arith.constant 0 : index
    %13 = vector.load %arg6[%c0_11, %c0_12] : memref<8x128xf32, #tpu.memory_space<vmem>>, vector<8x128xf32>
    tpu.vector_store %arg6[%c0_11, %c0_12], %12 {strides = array<i32>} : memref<8x128xf32, #tpu.memory_space<vmem>>, vector<8x128xf32>,
    return
  }
  func.func @transform_0(%arg0: i32) -> (i32, i32) {
    %c0_i32 = arith.constant 0 : i32
    %c0_i32_0 = arith.constant 0 : i32
    return %arg0, %c0_i32 : i32, i32
  }
  func.func @transform_1(%arg0: i32) -> (i32, i32) {
    %c0_i32 = arith.constant 0 : i32
    %c0_i32_0 = arith.constant 0 : i32
    %c0_i32_1 = arith.constant 0 : i32
    return %c0_i32, %c0_i32_0 : i32, i32
  }
  func.func @transform_2(%arg0: i32) -> (i32, i32) {
    %c0_i32 = arith.constant 0 : i32
    %c0_i32_0 = arith.constant 0 : i32
    %c0_i32_1 = arith.constant 0 : i32
    return %c0_i32, %c0_i32_0 : i32, i32
  }
  func.func @transform_3(%arg0: i32) -> (i32, i32) {
    %c0_i32 = arith.constant 0 : i32
    %c0_i32_0 = arith.constant 0 : i32
    %c0_i32_1 = arith.constant 0 : i32
    return %c0_i32, %c0_i32_0 : i32, i32
  }
  func.func @transform_4(%arg0: i32) -> (i32, i32) {
    %c0_i32 = arith.constant 0 : i32
    %c0_i32_0 = arith.constant 0 : i32
    %c0_i32_1 = arith.constant 0 : i32
    return %c0_i32, %c0_i32_0 : i32, i32
  }
  func.func @transform_5(%arg0: i32) -> (i32, i32) {
    %c0_i32 = arith.constant 0 : i32
    %c0_i32_0 = arith.constant 0 : i32
    return %arg0, %c0_i32 : i32, i32
  }
}

</mosaic_0001>

<bundles_post_ra>
// kernel: _lambda_.4
= control target key start
LH: loop header
LB: loop body
LE: loop exit
PB: predicated region body
PF: predicated region fallthrough
CT: control target
= control target key end

     0   :  { %s1408_s12 = smov 0   ;;  %s1410_s13 = smov 0   ;;  %s1974_s0 = inlined_call_operand.vmem [shape: f32[4,344,9], index: 0, kind: input, shape index: {}]   ;;  %s1975_s1 = inlined_call_operand.vmem [shape: f32[9,128], index: 1, kind: input, shape index: {}]   ;;  %s1976_s2 = inlined_call_operand.vmem [shape: f32[1,128], index: 2, kind: input, shape index: {}]   ;;  %s1977_s3 = inlined_call_operand.vmem [shape: f32[344,128], index: 3, kind: output, shape index: {}]  }
   0x1   :  { %s1412_s14 = smov 0  }
   0x2 LB: > { %s22_s15 = sadd.s32 1, %s1378_s13  ;;  %p1093_p0 = scmp.ge.s32.totalorder %s1382_s14, 1  ;;  %s1382_s14 = sphi %s1412_s14, %s13_s14   ;;  %s1378_s13 = sphi %s1410_s13, %s1979_s13   ;;  %s1374_s12 = sphi %s1408_s12, %s1978_s12  }
   0x3   : > { %p23_p1 = scmp.ge.s32.totalorder %s22_s15, 4  ;;  %p156_p2 = scmp.lt.s32.totalorder %s1382_s14, 5 }
   0x5   : > { %s1981_s15 = smov (%p23_p1, %s22_s15), 0  ;;  %p157_p3 = pnand %p1093_p0, %p156_p2 }
   0x6   : > { %v243_v0 = vld [vmem:[%s1975_s1] sm:$0xff] (!%p157_p3)  ;;  %v244_v1 = vld [vmem:[%s1975_s1 + $0x8] sm:$0x1] (!%p157_p3)  ;;  %vm375_vm0 = vcmask (!%p157_p3), 1040384   ;;  %v1384_v2 = vmov (!%p157_p3), 0.0|0.0   ;;  %vm1385_vm1 = vmmov (!%p157_p3), 1  }
   0x7   : > { %160 = sbr.rel (%p157_p3) target bundleno = 371 (0x173), region = 32  ;;  %1325 = vmatprep.subr.bf16.mxu0 (!%p157_p3), %v1384_v2  ;;  %v1326_v3 = vpack.c.bf16 (!%p157_p3), %v244_v1, %v243_v0  ;;  %vm1327_vm2 = vmpackc.low (!%p157_p3), %vm375_vm0, %vm1385_vm1  ;;  %1329 = vmatprep.subr.bf16.mxu1 (!%p157_p3), %v1384_v2  ;;  %p185_p4 = scmp.lt.s32.totalorder (!%p157_p3), %s1374_s12, 3  ;;  %vm1386_vm3 = vmmov (!%p157_p3), 0   ;;  %v1387_v4 = vmov (!%p157_p3), 0.0   ;;  %vm245_vm4 = vcmask (!%p157_p3), 72704  }
   0x8   : > { %1196 = vmatprep.mubr.msk.f32.mxu0 (!%p157_p3), %vm1386_vm3, %v1387_v4  ;;  %1262 = vmatprep.mubr.msk.f32.mxu1 (!%p157_p3), %vm1386_vm3, %v1387_v4  ;;  %p1139_p5 = scmp.ne.s32.totalorder (!%p157_p3), %s1374_s12, 0 }
   0x9   : > { %1328 = vmatpush3.bf16.msk.msra.mxu0 (!%p157_p3), %vm1327_vm2, %v1326_v3  ;;  %1330 = vmatpush3.bf16.msk.msra.mxu1 (!%p157_p3), %vm1327_vm2, %v1326_v3 }
   0xe   : > { %s186_s20 = scalar_select %p185_p4, %s1374_s12, 3 }
  0x10   : > { %s1331_s21 = smul.u32 344, %s186_s20 }
  0x12   : > { %s1443_s24 = scalar_lea.vmem %s1974_s0, %s1331_s21 }
  0x13   : > { %v200_v5 = vld [vmem:[%s1443_s24] sm:$0xff]  ;;  %v222_v6 = vld [vmem:[%s1443_s24 + $0xb0] sm:$0xff]  ;;  %v201_v7 = vld [vmem:[%s1443_s24 + $0x8] sm:$0xff] }
  0x14   : > { %1197 = vmatmul.mubr.msk.f32.vlgmr.msra.gmra.mrb[0].mxu0 %vm245_vm4, %v200_v5  ;;  %1263 = vmatmul.mubr.msk.f32.vlgmr.msra.gmra.mrb[0].mxu1 %vm245_vm4, %v222_v6  ;;  %v223_v8 = vld [vmem:[%s1443_s24 + $0xb8] sm:$0xff]  ;;  %v202_v9 = vld [vmem:[%s1443_s24 + $0x10] sm:$0xff]  ;;  %v224_v10 = vld [vmem:[%s1443_s24 + $0xc0] sm:$0xff] }
  0x15   : > { %1199 = vmatprep.mubr.msk.f32.mxu0 %vm1386_vm3, %v1387_v4  ;;  %1265 = vmatprep.mubr.msk.f32.mxu1 %vm1386_vm3, %v1387_v4  ;;  %v203_v11 = vld [vmem:[%s1443_s24 + $0x18] sm:$0xff]  ;;  %v225_v12 = vld [vmem:[%s1443_s24 + $0xc8] sm:$0xff]  ;;  %v204_v13 = vld [vmem:[%s1443_s24 + $0x20] sm:$0xff] }
  0x16   : > { %v226_v14 = vld [vmem:[%s1443_s24 + $0xd0] sm:$0xff]  ;;  %v205_v15 = vld [vmem:[%s1443_s24 + $0x28] sm:$0xff]  ;;  %v227_v16 = vld [vmem:[%s1443_s24 + $0xd8] sm:$0xff] }
  0x17   : > { %v206_v17 = vld [vmem:[%s1443_s24 + $0x30] sm:$0xff]  ;;  %v228_v18 = vld [vmem:[%s1443_s24 + $0xe0] sm:$0xff]  ;;  %v207_v19 = vld [vmem:[%s1443_s24 + $0x38] sm:$0xff] }
  0x18   : > { %1200 = vmatmul.mubr.msk.f32.gmra.mrb[2].mxu0 %vm245_vm4, %v201_v7  ;;  %1266 = vmatmul.mubr.msk.f32.gmra.mrb[2].mxu1 %vm245_vm4, %v223_v8  ;;  %v229_v20 = vld [vmem:[%s1443_s24 + $0xe8] sm:$0xff]  ;;  %v208_v21 = vld [vmem:[%s1443_s24 + $0x40] sm:$0xff]  ;;  %v230_v22 = vld [vmem:[%s1443_s24 + $0xf0] sm:$0xff] }
  0x19   : > { %1202 = vmatprep.mubr.msk.f32.mxu0 %vm1386_vm3, %v1387_v4  ;;  %1268 = vmatprep.mubr.msk.f32.mxu1 %vm1386_vm3, %v1387_v4  ;;  %v209_v23 = vld [vmem:[%s1443_s24 + $0x48] sm:$0xff]  ;;  %v231_v24 = vld [vmem:[%s1443_s24 + $0xf8] sm:$0xff]  ;;  %v210_v25 = vld [vmem:[%s1443_s24 + $0x50] sm:$0xff] }
  0x1a   : > { %v232_v26 = vld [vmem:[%s1443_s24 + $0x100] sm:$0xff]  ;;  %v211_v27 = vld [vmem:[%s1443_s24 + $0x58] sm:$0xff]  ;;  %v233_v28 = vld [vmem:[%s1443_s24 + $0x108] sm:$0xff] }
  0x1b   : > { %v212_v29 = vld [vmem:[%s1443_s24 + $0x60] sm:$0xff]  ;;  %v234_v30 = vld [vmem:[%s1443_s24 + $0x110] sm:$0xff]  ;;  %v213_v31 = vld [vmem:[%s1443_s24 + $0x68] sm:$0xff] }
  0x1c   : > { %1203 = vmatmul.mubr.msk.f32.gmra.mrb[4].mxu0 %vm245_vm4, %v202_v9  ;;  %1269 = vmatmul.mubr.msk.f32.gmra.mrb[4].mxu1 %vm245_vm4, %v224_v10  ;;  %v235_v32 = vld [vmem:[%s1443_s24 + $0x118] sm:$0xff]  ;;  %v214_v33 = vld [vmem:[%s1443_s24 + $0x70] sm:$0xff]  ;;  %v236_v34 = vld [vmem:[%s1443_s24 + $0x120] sm:$0xff] }
  0x1d   : > { %1205 = vmatprep.mubr.msk.f32.mxu0 %vm1386_vm3, %v1387_v4  ;;  %1271 = vmatprep.mubr.msk.f32.mxu1 %vm1386_vm3, %v1387_v4  ;;  %v215_v35 = vld [vmem:[%s1443_s24 + $0x78] sm:$0xff]  ;;  %v237_v36 = vld [vmem:[%s1443_s24 + $0x128] sm:$0xff]  ;;  %v216_v37 = vld [vmem:[%s1443_s24 + $0x80] sm:$0xff] }
  0x1e   : > { %v238_v38 = vld [vmem:[%s1443_s24 + $0x130] sm:$0xff]  ;;  %v217_v39 = vld [vmem:[%s1443_s24 + $0x88] sm:$0xff]  ;;  %v239_v40 = vld [vmem:[%s1443_s24 + $0x138] sm:$0xff] }
  0x1f   : > { %v218_v41 = vld [vmem:[%s1443_s24 + $0x90] sm:$0xff]  ;;  %v240_v42 = vld [vmem:[%s1443_s24 + $0x140] sm:$0xff]  ;;  %v219_v43 = vld [vmem:[%s1443_s24 + $0x98] sm:$0xff] }
  0x20   : > { %1206 = vmatmul.mubr.msk.f32.gmra.mrb[6].mxu0 %vm245_vm4, %v203_v11  ;;  %1272 = vmatmul.mubr.msk.f32.gmra.mrb[6].mxu1 %vm245_vm4, %v225_v12  ;;  %v241_v44 = vld [vmem:[%s1443_s24 + $0x148] sm:$0xff]  ;;  %v220_v45 = vld [vmem:[%s1443_s24 + $0xa0] sm:$0xff]  ;;  %v242_v46 = vld [vmem:[%s1443_s24 + $0x150] sm:$0xff] }
  0x21   : > { %1208 = vmatprep.mubr.msk.f32.mxu0 %vm1386_vm3, %v1387_v4  ;;  %1274 = vmatprep.mubr.msk.f32.mxu1 %vm1386_vm3, %v1387_v4  ;;  %v221_v47 = vld [vmem:[%s1443_s24 + $0xa8] sm:$0xff] }
  0x24   : > { %1209 = vmatmul.mubr.msk.f32.gmra.mrb[8].mxu0 %vm245_vm4, %v204_v13  ;;  %1275 = vmatmul.mubr.msk.f32.gmra.mrb[8].mxu1 %vm245_vm4, %v226_v14 }
  0x25   : > { %1211 = vmatprep.mubr.msk.f32.mxu0 %vm1386_vm3, %v1387_v4  ;;  %1277 = vmatprep.mubr.msk.f32.mxu1 %vm1386_vm3, %v1387_v4 }
  0x28   : > { %1212 = vmatmul.mubr.msk.f32.gmra.mrb[10].mxu0 %vm245_vm4, %v205_v15  ;;  %1278 = vmatmul.mubr.msk.f32.gmra.mrb[10].mxu1 %vm245_vm4, %v227_v16 }
  0x29   : > { %1214 = vmatprep.mubr.msk.f32.mxu0 %vm1386_vm3, %v1387_v4  ;;  %1280 = vmatprep.mubr.msk.f32.mxu1 %vm1386_vm3, %v1387_v4 }
  0x2c   : > { %1215 = vmatmul.mubr.msk.f32.gmra.mrb[12].mxu0 %vm245_vm4, %v206_v17  ;;  %1281 = vmatmul.mubr.msk.f32.gmra.mrb[12].mxu1 %vm245_vm4, %v228_v18 }
  0x2d   : > { %1217 = vmatprep.mubr.msk.f32.mxu0 %vm1386_vm3, %v1387_v4  ;;  %1283 = vmatprep.mubr.msk.f32.mxu1 %vm1386_vm3, %v1387_v4 }
  0x30   : > { %1218 = vmatmul.mubr.msk.f32.gmra.mrb[14].mxu0 %vm245_vm4, %v207_v19  ;;  %1284 = vmatmul.mubr.msk.f32.gmra.mrb[14].mxu1 %vm245_vm4, %v229_v20 }
  0x31   : > { %1220 = vmatprep.mubr.msk.f32.mxu0 %vm1386_vm3, %v1387_v4  ;;  %1286 = vmatprep.mubr.msk.f32.mxu1 %vm1386_vm3, %v1387_v4 }
  0x34   : > { %1221 = vmatmul.mubr.msk.f32.gmra.mrb[16].mxu0 %vm245_vm4, %v208_v21  ;;  %1287 = vmatmul.mubr.msk.f32.gmra.mrb[16].mxu1 %vm245_vm4, %v230_v22 }
  0x35   : > { %1223 = vmatprep.mubr.msk.f32.mxu0 %vm1386_vm3, %v1387_v4  ;;  %1289 = vmatprep.mubr.msk.f32.mxu1 %vm1386_vm3, %v1387_v4 }
  0x38   : > { %1224 = vmatmul.mubr.msk.f32.gmra.mrb[18].mxu0 %vm245_vm4, %v209_v23  ;;  %1290 = vmatmul.mubr.msk.f32.gmra.mrb[18].mxu1 %vm245_vm4, %v231_v24 }
  0x39   : > { %1226 = vmatprep.mubr.msk.f32.mxu0 %vm1386_vm3, %v1387_v4  ;;  %1292 = vmatprep.mubr.msk.f32.mxu1 %vm1386_vm3, %v1387_v4 }
  0x3c   : > { %1227 = vmatmul.mubr.msk.f32.gmra.mrb[20].mxu0 %vm245_vm4, %v210_v25  ;;  %1293 = vmatmul.mubr.msk.f32.gmra.mrb[20].mxu1 %vm245_vm4, %v232_v26 }
  0x3d   : > { %1229 = vmatprep.mubr.msk.f32.mxu0 %vm1386_vm3, %v1387_v4  ;;  %1295 = vmatprep.mubr.msk.f32.mxu1 %vm1386_vm3, %v1387_v4 }
  0x40   : > { %1230 = vmatmul.mubr.msk.f32.gmra.mrb[22].mxu0 %vm245_vm4, %v211_v27  ;;  %1296 = vmatmul.mubr.msk.f32.gmra.mrb[22].mxu1 %vm245_vm4, %v233_v28 }
  0x41   : > { %1232 = vmatprep.mubr.msk.f32.mxu0 %vm1386_vm3, %v1387_v4  ;;  %1298 = vmatprep.mubr.msk.f32.mxu1 %vm1386_vm3, %v1387_v4 }
  0x44   : > { %1233 = vmatmul.mubr.msk.f32.gmra.mrb[24].mxu0 %vm245_vm4, %v212_v29  ;;  %1299 = vmatmul.mubr.msk.f32.gmra.mrb[24].mxu1 %vm245_vm4, %v234_v30 }
  0x45   : > { %1235 = vmatprep.mubr.msk.f32.mxu0 %vm1386_vm3, %v1387_v4  ;;  %1301 = vmatprep.mubr.msk.f32.mxu1 %vm1386_vm3, %v1387_v4 }
  0x48   : > { %1236 = vmatmul.mubr.msk.f32.gmra.mrb[26].mxu0 %vm245_vm4, %v213_v31  ;;  %1302 = vmatmul.mubr.msk.f32.gmra.mrb[26].mxu1 %vm245_vm4, %v235_v32 }
  0x49   : > { %1238 = vmatprep.mubr.msk.f32.mxu0 %vm1386_vm3, %v1387_v4  ;;  %1304 = vmatprep.mubr.msk.f32.mxu1 %vm1386_vm3, %v1387_v4 }
  0x4c   : > { %1239 = vmatmul.mubr.msk.f32.gmra.mrb[28].mxu0 %vm245_vm4, %v214_v33  ;;  %1305 = vmatmul.mubr.msk.f32.gmra.mrb[28].mxu1 %vm245_vm4, %v236_v34 }
  0x4d   : > { %1241 = vmatprep.mubr.msk.f32.mxu0 %vm1386_vm3, %v1387_v4  ;;  %1307 = vmatprep.mubr.msk.f32.mxu1 %vm1386_vm3, %v1387_v4 }
  0x50   : > { %1242 = vmatmul.mubr.msk.f32.gmra.mrb[30].mxu0 %vm245_vm4, %v215_v35  ;;  %1308 = vmatmul.mubr.msk.f32.gmra.mrb[30].mxu1 %vm245_vm4, %v237_v36 }
  0x51   : > { %1244 = vmatprep.mubr.msk.f32.mxu0 %vm1386_vm3, %v1387_v4  ;;  %1310 = vmatprep.mubr.msk.f32.mxu1 %vm1386_vm3, %v1387_v4 }
  0x54   : > { %1245 = vmatmul.mubr.msk.f32.gmra.mrb[32].mxu0 %vm245_vm4, %v216_v37  ;;  %1311 = vmatmul.mubr.msk.f32.gmra.mrb[32].mxu1 %vm245_vm4, %v238_v38 }
  0x55   : > { %1247 = vmatprep.mubr.msk.f32.mxu0 %vm1386_vm3, %v1387_v4  ;;  %1313 = vmatprep.mubr.msk.f32.mxu1 %vm1386_vm3, %v1387_v4 }
  0x58   : > { %1248 = vmatmul.mubr.msk.f32.gmra.mrb[34].mxu0 %vm245_vm4, %v217_v39  ;;  %1314 = vmatmul.mubr.msk.f32.gmra.mrb[34].mxu1 %vm245_vm4, %v239_v40 }
  0x59   : > { %1250 = vmatprep.mubr.msk.f32.mxu0 %vm1386_vm3, %v1387_v4  ;;  %1316 = vmatprep.mubr.msk.f32.mxu1 %vm1386_vm3, %v1387_v4 }
  0x5c   : > { %1251 = vmatmul.mubr.msk.f32.gmra.mrb[36].mxu0 %vm245_vm4, %v218_v41  ;;  %1317 = vmatmul.mubr.msk.f32.gmra.mrb[36].mxu1 %vm245_vm4, %v240_v42 }
  0x5d   : > { %1253 = vmatprep.mubr.msk.f32.mxu0 %vm1386_vm3, %v1387_v4  ;;  %1319 = vmatprep.mubr.msk.f32.mxu1 %vm1386_vm3, %v1387_v4 }
  0x60   : > { %1254 = vmatmul.mubr.msk.f32.gmra.mrb[38].mxu0 %vm245_vm4, %v219_v43  ;;  %1320 = vmatmul.mubr.msk.f32.gmra.mrb[38].mxu1 %vm245_vm4, %v241_v44 }
  0x61   : > { %1256 = vmatprep.mubr.msk.f32.mxu0 %vm1386_vm3, %v1387_v4  ;;  %1322 = vmatprep.mubr.msk.f32.mxu1 %vm1386_vm3, %v1387_v4 }
  0x64   : > { %1257 = vmatmul.mubr.msk.f32.gmra.mrb[40].mxu0 %vm245_vm4, %v220_v45  ;;  %1323 = vmatmul.mubr.msk.f32.gmra.mrb[40].mxu1 %vm245_vm4, %v242_v46 }
  0x65   : > { %1259 = vmatprep.mubr.msk.f32.mxu0 %vm1386_vm3, %v1387_v4 }
  0x68   : > { %1260 = vmatmul.mubr.msk.f32.gmra.mrb[42].mxu0 %vm245_vm4, %v221_v47 }
  0xe7   : > { %v1613_v48 = vpop.f32.mrb[0].mxu0  ;;  %v1615_v49 = vpop.f32.mrb[0].mxu1 }
  0xe8   : > { %v1198_v50 = vpop.f32.mrb[1].mxu0  ;;  %v1264_v51 = vpop.f32.mrb[1].mxu1  ;;  %663 = vst [vmem:[#allocation2] sm:$0xff] (!%p1139_p5), %v1613_v48  ;;  %685 = vst [vmem:[#allocation2 + $0xb0] sm:$0xff] (!%p1139_p5), %v1615_v49 }
  0xeb   : > { %v1617_v52 = vpop.f32.mrb[2].mxu0  ;;  %v1619_v53 = vpop.f32.mrb[2].mxu1 }
  0xec   : > { %v1201_v54 = vpop.f32.mrb[3].mxu0  ;;  %v1267_v55 = vpop.f32.mrb[3].mxu1  ;;  %664 = vst [vmem:[#allocation2 + $0x8] sm:$0xff] (!%p1139_p5), %v1617_v52  ;;  %686 = vst [vmem:[#allocation2 + $0xb8] sm:$0xff] (!%p1139_p5), %v1619_v53 }
  0xef   : > { %v1621_v56 = vpop.f32.mrb[4].mxu0  ;;  %v1623_v57 = vpop.f32.mrb[4].mxu1 }
  0xf0   : > { %v1204_v58 = vpop.f32.mrb[5].mxu0  ;;  %v1270_v59 = vpop.f32.mrb[5].mxu1  ;;  %665 = vst [vmem:[#allocation2 + $0x10] sm:$0xff] (!%p1139_p5), %v1621_v56  ;;  %687 = vst [vmem:[#allocation2 + $0xc0] sm:$0xff] (!%p1139_p5), %v1623_v57 }
  0xf3   : > { %v1625_v60 = vpop.f32.mrb[6].mxu0  ;;  %v1627_v61 = vpop.f32.mrb[6].mxu1 }
  0xf4   : > { %v1207_v62 = vpop.f32.mrb[7].mxu0  ;;  %v1273_v63 = vpop.f32.mrb[7].mxu1  ;;  %666 = vst [vmem:[#allocation2 + $0x18] sm:$0xff] (!%p1139_p5), %v1625_v60  ;;  %688 = vst [vmem:[#allocation2 + $0xc8] sm:$0xff] (!%p1139_p5), %v1627_v61 }
  0xf7   : > { %v1629_v0 = vpop.f32.mrb[8].mxu0  ;;  %v1631_v1 = vpop.f32.mrb[8].mxu1 }
  0xf8   : > { %v1210_v2 = vpop.f32.mrb[9].mxu0  ;;  %v1276_v3 = vpop.f32.mrb[9].mxu1  ;;  %667 = vst [vmem:[#allocation2 + $0x20] sm:$0xff] (!%p1139_p5), %v1629_v0  ;;  %689 = vst [vmem:[#allocation2 + $0xd0] sm:$0xff] (!%p1139_p5), %v1631_v1 }
  0xfb   : > { %v1633_v4 = vpop.f32.mrb[10].mxu0  ;;  %v1635_v5 = vpop.f32.mrb[10].mxu1 }
  0xfc   : > { %v1213_v6 = vpop.f32.mrb[11].mxu0  ;;  %v1279_v7 = vpop.f32.mrb[11].mxu1  ;;  %668 = vst [vmem:[#allocation2 + $0x28] sm:$0xff] (!%p1139_p5), %v1633_v4  ;;  %690 = vst [vmem:[#allocation2 + $0xd8] sm:$0xff] (!%p1139_p5), %v1635_v5 }
  0xff   : > { %v1637_v8 = vpop.f32.mrb[12].mxu0  ;;  %v1639_v9 = vpop.f32.mrb[12].mxu1 }
 0x100   : > { %v1216_v10 = vpop.f32.mrb[13].mxu0  ;;  %v1282_v11 = vpop.f32.mrb[13].mxu1  ;;  %669 = vst [vmem:[#allocation2 + $0x30] sm:$0xff] (!%p1139_p5), %v1637_v8  ;;  %691 = vst [vmem:[#allocation2 + $0xe0] sm:$0xff] (!%p1139_p5), %v1639_v9 }
 0x103   : > { %v1641_v12 = vpop.f32.mrb[14].mxu0  ;;  %v1643_v13 = vpop.f32.mrb[14].mxu1 }
 0x104   : > { %v1219_v14 = vpop.f32.mrb[15].mxu0  ;;  %v1285_v15 = vpop.f32.mrb[15].mxu1  ;;  %670 = vst [vmem:[#allocation2 + $0x38] sm:$0xff] (!%p1139_p5), %v1641_v12  ;;  %692 = vst [vmem:[#allocation2 + $0xe8] sm:$0xff] (!%p1139_p5), %v1643_v13 }
 0x107   : > { %v1645_v16 = vpop.f32.mrb[16].mxu0  ;;  %v1647_v17 = vpop.f32.mrb[16].mxu1 }
 0x108   : > { %v1222_v18 = vpop.f32.mrb[17].mxu0  ;;  %v1288_v19 = vpop.f32.mrb[17].mxu1  ;;  %671 = vst [vmem:[#allocation2 + $0x40] sm:$0xff] (!%p1139_p5), %v1645_v16  ;;  %693 = vst [vmem:[#allocation2 + $0xf0] sm:$0xff] (!%p1139_p5), %v1647_v17 }
 0x10b   : > { %v1649_v20 = vpop.f32.mrb[18].mxu0  ;;  %v1651_v21 = vpop.f32.mrb[18].mxu1 }
 0x10c   : > { %v1225_v22 = vpop.f32.mrb[19].mxu0  ;;  %v1291_v23 = vpop.f32.mrb[19].mxu1  ;;  %672 = vst [vmem:[#allocation2 + $0x48] sm:$0xff] (!%p1139_p5), %v1649_v20  ;;  %694 = vst [vmem:[#allocation2 + $0xf8] sm:$0xff] (!%p1139_p5), %v1651_v21 }
 0x10f   : > { %v1653_v24 = vpop.f32.mrb[20].mxu0  ;;  %v1655_v25 = vpop.f32.mrb[20].mxu1 }
 0x110   : > { %v1228_v26 = vpop.f32.mrb[21].mxu0  ;;  %v1294_v27 = vpop.f32.mrb[21].mxu1  ;;  %673 = vst [vmem:[#allocation2 + $0x50] sm:$0xff] (!%p1139_p5), %v1653_v24  ;;  %695 = vst [vmem:[#allocation2 + $0x100] sm:$0xff] (!%p1139_p5), %v1655_v25 }
 0x113   : > { %v1657_v28 = vpop.f32.mrb[22].mxu0  ;;  %v1659_v29 = vpop.f32.mrb[22].mxu1 }
 0x114   : > { %v1231_v30 = vpop.f32.mrb[23].mxu0  ;;  %v1297_v31 = vpop.f32.mrb[23].mxu1  ;;  %674 = vst [vmem:[#allocation2 + $0x58] sm:$0xff] (!%p1139_p5), %v1657_v28  ;;  %696 = vst [vmem:[#allocation2 + $0x108] sm:$0xff] (!%p1139_p5), %v1659_v29 }
 0x117   : > { %v1661_v32 = vpop.f32.mrb[24].mxu0  ;;  %v1663_v33 = vpop.f32.mrb[24].mxu1 }
 0x118   : > { %v1234_v34 = vpop.f32.mrb[25].mxu0  ;;  %v1300_v35 = vpop.f32.mrb[25].mxu1  ;;  %675 = vst [vmem:[#allocation2 + $0x60] sm:$0xff] (!%p1139_p5), %v1661_v32  ;;  %697 = vst [vmem:[#allocation2 + $0x110] sm:$0xff] (!%p1139_p5), %v1663_v33 }
 0x11b   : > { %v1665_v36 = vpop.f32.mrb[26].mxu0  ;;  %v1667_v37 = vpop.f32.mrb[26].mxu1 }
 0x11c   : > { %v1237_v38 = vpop.f32.mrb[27].mxu0  ;;  %v1303_v39 = vpop.f32.mrb[27].mxu1  ;;  %676 = vst [vmem:[#allocation2 + $0x68] sm:$0xff] (!%p1139_p5), %v1665_v36  ;;  %698 = vst [vmem:[#allocation2 + $0x118] sm:$0xff] (!%p1139_p5), %v1667_v37 }
 0x11f   : > { %v1669_v40 = vpop.f32.mrb[28].mxu0  ;;  %v1671_v41 = vpop.f32.mrb[28].mxu1 }
 0x120   : > { %v1240_v42 = vpop.f32.mrb[29].mxu0  ;;  %v1306_v43 = vpop.f32.mrb[29].mxu1  ;;  %677 = vst [vmem:[#allocation2 + $0x70] sm:$0xff] (!%p1139_p5), %v1669_v40  ;;  %699 = vst [vmem:[#allocation2 + $0x120] sm:$0xff] (!%p1139_p5), %v1671_v41 }
 0x123   : > { %v1673_v44 = vpop.f32.mrb[30].mxu0  ;;  %v1675_v45 = vpop.f32.mrb[30].mxu1 }
 0x124   : > { %v1243_v46 = vpop.f32.mrb[31].mxu0  ;;  %v1309_v47 = vpop.f32.mrb[31].mxu1  ;;  %678 = vst [vmem:[#allocation2 + $0x78] sm:$0xff] (!%p1139_p5), %v1673_v44  ;;  %700 = vst [vmem:[#allocation2 + $0x128] sm:$0xff] (!%p1139_p5), %v1675_v45 }
 0x127   : > { %v1677_v50 = vpop.f32.mrb[32].mxu0  ;;  %v1679_v51 = vpop.f32.mrb[32].mxu1 }
 0x128   : > { %v1246_v54 = vpop.f32.mrb[33].mxu0  ;;  %v1312_v55 = vpop.f32.mrb[33].mxu1  ;;  %679 = vst [vmem:[#allocation2 + $0x80] sm:$0xff] (!%p1139_p5), %v1677_v50  ;;  %701 = vst [vmem:[#allocation2 + $0x130] sm:$0xff] (!%p1139_p5), %v1679_v51 }
 0x12b   : > { %v1681_v58 = vpop.f32.mrb[34].mxu0  ;;  %v1683_v59 = vpop.f32.mrb[34].mxu1 }
 0x12c   : > { %v1249_v62 = vpop.f32.mrb[35].mxu0  ;;  %v1315_v63 = vpop.f32.mrb[35].mxu1  ;;  %680 = vst [vmem:[#allocation2 + $0x88] sm:$0xff] (!%p1139_p5), %v1681_v58  ;;  %702 = vst [vmem:[#allocation2 + $0x138] sm:$0xff] (!%p1139_p5), %v1683_v59 }
 0x12f   : > { %v1685_v2 = vpop.f32.mrb[36].mxu0  ;;  %v1687_v3 = vpop.f32.mrb[36].mxu1 }
 0x130   : > { %v1252_v6 = vpop.f32.mrb[37].mxu0  ;;  %v1318_v7 = vpop.f32.mrb[37].mxu1  ;;  %681 = vst [vmem:[#allocation2 + $0x90] sm:$0xff] (!%p1139_p5), %v1685_v2  ;;  %703 = vst [vmem:[#allocation2 + $0x140] sm:$0xff] (!%p1139_p5), %v1687_v3 }
 0x133   : > { %v1689_v10 = vpop.f32.mrb[38].mxu0  ;;  %v1691_v11 = vpop.f32.mrb[38].mxu1 }
 0x134   : > { %v1255_v14 = vpop.f32.mrb[39].mxu0  ;;  %v1321_v15 = vpop.f32.mrb[39].mxu1  ;;  %682 = vst [vmem:[#allocation2 + $0x98] sm:$0xff] (!%p1139_p5), %v1689_v10  ;;  %704 = vst [vmem:[#allocation2 + $0x148] sm:$0xff] (!%p1139_p5), %v1691_v11 }
 0x136   : > { %662 = sbr.rel (%p1139_p5) target bundleno = 317 (0x13d), region = 36 }
 0x137   : > { %v1693_v18 = vpop.f32.mrb[40].mxu0  ;;  %v1695_v19 = vpop.f32.mrb[40].mxu1 }
 0x138   : > { %v1258_v22 = vpop.f32.mrb[41].mxu0  ;;  %v1324_v23 = vpop.f32.mrb[41].mxu1  ;;  %683 = vst [vmem:[#allocation2 + $0xa0] sm:$0xff] (!%p1139_p5), %v1693_v18  ;;  %705 = vst [vmem:[#allocation2 + $0x150] sm:$0xff] (!%p1139_p5), %v1695_v19 }
 0x13b   : > { %v1697_v26 = vpop.f32.mrb[42].mxu0 }
 0x13c   : > { %v1261_v27 = vpop.f32.mrb[43].mxu0  ;;  %684 = vst [vmem:[#allocation2 + $0xa8] sm:$0xff] (!%p1139_p5), %v1697_v26 }
 0x13d PF: > { %p1140_p6 = scmp.le.s32.totalorder %s1374_s12, 0 }
 0x13e   : > { %v710_v30 = vld [vmem:[#allocation2] sm:$0xff] (!%p1140_p6)  ;;  %v711_v31 = vld [vmem:[#allocation2 + $0x8] sm:$0xff] (!%p1140_p6)  ;;  %v712_v34 = vld [vmem:[#allocation2 + $0x10] sm:$0xff] (!%p1140_p6) }
 0x13f   : > { %709 = sbr.rel (%p1140_p6) target bundleno = 343 (0x157), region = 40  ;;  %v753_v35 = vmax.f32 (!%p1140_p6), %v710_v30, %v1613_v48  ;;  %v754_v38 = vmax.f32 (!%p1140_p6), %v711_v31, %v1617_v52  ;;  %v755_v39 = vmax.f32 (!%p1140_p6), %v712_v34, %v1621_v56  ;;  %v713_v42 = vld [vmem:[#allocation2 + $0x18] sm:$0xff] (!%p1140_p6)  ;;  %v714_v43 = vld [vmem:[#allocation2 + $0x20] sm:$0xff] (!%p1140_p6)  ;;  %v715_v46 = vld [vmem:[#allocation2 + $0x28] sm:$0xff] (!%p1140_p6) }
 0x140   : > { %v756_v47 = vmax.f32 (!%p1140_p6), %v713_v42, %v1625_v60  ;;  %v757_v54 = vmax.f32 (!%p1140_p6), %v714_v43, %v1629_v0  ;;  %v758_v55 = vmax.f32 (!%p1140_p6), %v715_v46, %v1633_v4  ;;  %v716_v62 = vld [vmem:[#allocation2 + $0x30] sm:$0xff] (!%p1140_p6)  ;;  %v717_v63 = vld [vmem:[#allocation2 + $0x38] sm:$0xff] (!%p1140_p6)  ;;  %v718_v6 = vld [vmem:[#allocation2 + $0x40] sm:$0xff] (!%p1140_p6) }
 0x141   : > { %796 = vst [vmem:[#allocation2] sm:$0xff] (!%p1140_p6), %v753_v35  ;;  %797 = vst [vmem:[#allocation2 + $0x8] sm:$0xff] (!%p1140_p6), %v754_v38  ;;  %v759_v48 = vmax.f32 (!%p1140_p6), %v716_v62, %v1637_v8  ;;  %v760_v52 = vmax.f32 (!%p1140_p6), %v717_v63, %v1641_v12  ;;  %v761_v56 = vmax.f32 (!%p1140_p6), %v718_v6, %v1645_v16  ;;  %v719_v7 = vld [vmem:[#allocation2 + $0x48] sm:$0xff] (!%p1140_p6)  ;;  %v720_v14 = vld [vmem:[#allocation2 + $0x50] sm:$0xff] (!%p1140_p6) }
 0x142   : > { %798 = vst [vmem:[#allocation2 + $0x10] sm:$0xff] (!%p1140_p6), %v755_v39  ;;  %v721_v15 = vld [vmem:[#allocation2 + $0x58] sm:$0xff] (!%p1140_p6)  ;;  %799 = vst [vmem:[#allocation2 + $0x18] sm:$0xff] (!%p1140_p6), %v756_v47  ;;  %v762_v60 = vmax.f32 (!%p1140_p6), %v719_v7, %v1649_v20  ;;  %v763_v0 = vmax.f32 (!%p1140_p6), %v720_v14, %v1653_v24  ;;  %v722_v22 = vld [vmem:[#allocation2 + $0x60] sm:$0xff] (!%p1140_p6) }
 0x143   : > { %800 = vst [vmem:[#allocation2 + $0x20] sm:$0xff] (!%p1140_p6), %v757_v54  ;;  %801 = vst [vmem:[#allocation2 + $0x28] sm:$0xff] (!%p1140_p6), %v758_v55  ;;  %v764_v4 = vmax.f32 (!%p1140_p6), %v721_v15, %v1657_v28  ;;  %v723_v23 = vld [vmem:[#allocation2 + $0x68] sm:$0xff] (!%p1140_p6)  ;;  %v724_v27 = vld [vmem:[#allocation2 + $0x70] sm:$0xff] (!%p1140_p6)  ;;  %v765_v8 = vmax.f32 (!%p1140_p6), %v722_v22, %v1661_v32 }
 0x144   : > { %802 = vst [vmem:[#allocation2 + $0x30] sm:$0xff] (!%p1140_p6), %v759_v48  ;;  %803 = vst [vmem:[#allocation2 + $0x38] sm:$0xff] (!%p1140_p6), %v760_v52  ;;  %v766_v12 = vmax.f32 (!%p1140_p6), %v723_v23, %v1665_v36  ;;  %v767_v16 = vmax.f32 (!%p1140_p6), %v724_v27, %v1669_v40  ;;  %v725_v30 = vld [vmem:[#allocation2 + $0x78] sm:$0xff] (!%p1140_p6)  ;;  %v726_v31 = vld [vmem:[#allocation2 + $0x80] sm:$0xff] (!%p1140_p6) }
 0x145   : > { %804 = vst [vmem:[#allocation2 + $0x40] sm:$0xff] (!%p1140_p6), %v761_v56  ;;  %v727_v34 = vld [vmem:[#allocation2 + $0x88] sm:$0xff] (!%p1140_p6)  ;;  %805 = vst [vmem:[#allocation2 + $0x48] sm:$0xff] (!%p1140_p6), %v762_v60  ;;  %v768_v20 = vmax.f32 (!%p1140_p6), %v725_v30, %v1673_v44  ;;  %v769_v24 = vmax.f32 (!%p1140_p6), %v726_v31, %v1677_v50  ;;  %v728_v35 = vld [vmem:[#allocation2 + $0x90] sm:$0xff] (!%p1140_p6) }
 0x146   : > { %806 = vst [vmem:[#allocation2 + $0x50] sm:$0xff] %v763_v0  ;;  %807 = vst [vmem:[#allocation2 + $0x58] sm:$0xff] %v764_v4  ;;  %v770_v28 = vmax.f32 %v727_v34, %v1681_v58  ;;  %v729_v38 = vld [vmem:[#allocation2 + $0x98] sm:$0xff]  ;;  %v730_v39 = vld [vmem:[#allocation2 + $0xa0] sm:$0xff]  ;;  %v771_v32 = vmax.f32 %v728_v35, %v1685_v2 }
 0x147   : > { %808 = vst [vmem:[#allocation2 + $0x60] sm:$0xff] %v765_v8  ;;  %809 = vst [vmem:[#allocation2 + $0x68] sm:$0xff] %v766_v12  ;;  %v772_v36 = vmax.f32 %v729_v38, %v1689_v10  ;;  %v773_v40 = vmax.f32 %v730_v39, %v1693_v18  ;;  %v731_v42 = vld [vmem:[#allocation2 + $0xa8] sm:$0xff]  ;;  %v732_v43 = vld [vmem:[#allocation2 + $0xb0] sm:$0xff] }
 0x148   : > { %810 = vst [vmem:[#allocation2 + $0x70] sm:$0xff] %v767_v16  ;;  %v733_v46 = vld [vmem:[#allocation2 + $0xb8] sm:$0xff]  ;;  %811 = vst [vmem:[#allocation2 + $0x78] sm:$0xff] %v768_v20  ;;  %v774_v44 = vmax.f32 %v731_v42, %v1697_v26  ;;  %v775_v50 = vmax.f32 %v732_v43, %v1615_v49  ;;  %v734_v47 = vld [vmem:[#allocation2 + $0xc0] sm:$0xff] }
 0x149   : > { %812 = vst [vmem:[#allocation2 + $0x80] sm:$0xff] %v769_v24  ;;  %813 = vst [vmem:[#allocation2 + $0x88] sm:$0xff] %v770_v28  ;;  %v776_v58 = vmax.f32 %v733_v46, %v1619_v53  ;;  %v735_v54 = vld [vmem:[#allocation2 + $0xc8] sm:$0xff]  ;;  %v736_v55 = vld [vmem:[#allocation2 + $0xd0] sm:$0xff]  ;;  %v777_v2 = vmax.f32 %v734_v47, %v1623_v57 }
 0x14a   : > { %814 = vst [vmem:[#allocation2 + $0x90] sm:$0xff] %v771_v32  ;;  %815 = vst [vmem:[#allocation2 + $0x98] sm:$0xff] %v772_v36  ;;  %v778_v10 = vmax.f32 %v735_v54, %v1627_v61  ;;  %v779_v18 = vmax.f32 %v736_v55, %v1631_v1  ;;  %v737_v62 = vld [vmem:[#allocation2 + $0xd8] sm:$0xff]  ;;  %v738_v63 = vld [vmem:[#allocation2 + $0xe0] sm:$0xff] }
 0x14b   : > { %816 = vst [vmem:[#allocation2 + $0xa0] sm:$0xff] %v773_v40  ;;  %v739_v6 = vld [vmem:[#allocation2 + $0xe8] sm:$0xff]  ;;  %817 = vst [vmem:[#allocation2 + $0xa8] sm:$0xff] %v774_v44  ;;  %v780_v49 = vmax.f32 %v737_v62, %v1635_v5  ;;  %v781_v53 = vmax.f32 %v738_v63, %v1639_v9  ;;  %v740_v48 = vld [vmem:[#allocation2 + $0xf0] sm:$0xff] }
 0x14c   : > { %818 = vst [vmem:[#allocation2 + $0xb0] sm:$0xff] %v775_v50  ;;  %819 = vst [vmem:[#allocation2 + $0xb8] sm:$0xff] %v776_v58  ;;  %v782_v26 = vmax.f32 %v739_v6, %v1643_v13  ;;  %v741_v52 = vld [vmem:[#allocation2 + $0xf8] sm:$0xff]  ;;  %v742_v56 = vld [vmem:[#allocation2 + $0x100] sm:$0xff]  ;;  %v783_v57 = vmax.f32 %v740_v48, %v1647_v17 }
 0x14d   : > { %820 = vst [vmem:[#allocation2 + $0xc0] sm:$0xff] %v777_v2  ;;  %821 = vst [vmem:[#allocation2 + $0xc8] sm:$0xff] %v778_v10  ;;  %v784_v61 = vmax.f32 %v741_v52, %v1651_v21  ;;  %v785_v1 = vmax.f32 %v742_v56, %v1655_v25  ;;  %v743_v7 = vld [vmem:[#allocation2 + $0x108] sm:$0xff]  ;;  %v744_v14 = vld [vmem:[#allocation2 + $0x110] sm:$0xff] }
 0x14e   : > { %822 = vst [vmem:[#allocation2 + $0xd0] sm:$0xff] %v779_v18  ;;  %v745_v15 = vld [vmem:[#allocation2 + $0x118] sm:$0xff]  ;;  %823 = vst [vmem:[#allocation2 + $0xd8] sm:$0xff] %v780_v49  ;;  %v786_v5 = vmax.f32 %v743_v7, %v1659_v29  ;;  %v787_v9 = vmax.f32 %v744_v14, %v1663_v33  ;;  %v746_v60 = vld [vmem:[#allocation2 + $0x120] sm:$0xff] }
 0x14f   : > { %824 = vst [vmem:[#allocation2 + $0xe0] sm:$0xff] %v781_v53  ;;  %825 = vst [vmem:[#allocation2 + $0xe8] sm:$0xff] %v782_v26  ;;  %v788_v13 = vmax.f32 %v745_v15, %v1667_v37  ;;  %v747_v0 = vld [vmem:[#allocation2 + $0x128] sm:$0xff]  ;;  %v748_v4 = vld [vmem:[#allocation2 + $0x130] sm:$0xff]  ;;  %v789_v17 = vmax.f32 %v746_v60, %v1671_v41 }
 0x150   : > { %826 = vst [vmem:[#allocation2 + $0xf0] sm:$0xff] %v783_v57  ;;  %827 = vst [vmem:[#allocation2 + $0xf8] sm:$0xff] %v784_v61  ;;  %v790_v21 = vmax.f32 %v747_v0, %v1675_v45  ;;  %v791_v25 = vmax.f32 %v748_v4, %v1679_v51  ;;  %v749_v22 = vld [vmem:[#allocation2 + $0x138] sm:$0xff]  ;;  %v750_v23 = vld [vmem:[#allocation2 + $0x140] sm:$0xff] }
 0x151   : > { %828 = vst [vmem:[#allocation2 + $0x100] sm:$0xff] %v785_v1  ;;  %v751_v27 = vld [vmem:[#allocation2 + $0x148] sm:$0xff]  ;;  %829 = vst [vmem:[#allocation2 + $0x108] sm:$0xff] %v786_v5  ;;  %v792_v29 = vmax.f32 %v749_v22, %v1683_v59  ;;  %v793_v33 = vmax.f32 %v750_v23, %v1687_v3  ;;  %v752_v8 = vld [vmem:[#allocation2 + $0x150] sm:$0xff] }
 0x152   : > { %830 = vst [vmem:[#allocation2 + $0x110] sm:$0xff] %v787_v9  ;;  %831 = vst [vmem:[#allocation2 + $0x118] sm:$0xff] %v788_v13  ;;  %v794_v37 = vmax.f32 %v751_v27, %v1691_v11  ;;  %v795_v41 = vmax.f32 %v752_v8, %v1695_v19 }
 0x153   : > { %832 = vst [vmem:[#allocation2 + $0x120] sm:$0xff] %v789_v17  ;;  %833 = vst [vmem:[#allocation2 + $0x128] sm:$0xff] %v790_v21 }
 0x154   : > { %834 = vst [vmem:[#allocation2 + $0x130] sm:$0xff] %v791_v25  ;;  %835 = vst [vmem:[#allocation2 + $0x138] sm:$0xff] %v792_v29 }
 0x155   : > { %836 = vst [vmem:[#allocation2 + $0x140] sm:$0xff] %v793_v33  ;;  %837 = vst [vmem:[#allocation2 + $0x148] sm:$0xff] %v794_v37 }
 0x156   : > { %838 = vst [vmem:[#allocation2 + $0x150] sm:$0xff] %v795_v41 }
 0x157 PF: > { %p1141_p7 = scmp.ne.s32.totalorder %s1374_s12, 3 }
 0x158   : > { %v1791_v51 = vld [vmem:[%s1976_s2] ss:$0 sm:$0xff] (!%p1141_p7)  ;;  %v856_v54 = vld [vmem:[#allocation2 + $0x68] sm:$0xff] (!%p1141_p7)  ;;  %v857_v62 = vld [vmem:[#allocation2 + $0x70] sm:$0xff] (!%p1141_p7) }
 0x159   : > { %842 = sbr.rel (%p1141_p7) target bundleno = 371 (0x173), region = 44  ;;  %v843_v45 = vld [vmem:[#allocation2] sm:$0xff] (!%p1141_p7)  ;;  %v844_v59 = vld [vmem:[#allocation2 + $0x8] sm:$0xff] (!%p1141_p7)  ;;  %v858_v63 = vld [vmem:[#allocation2 + $0x78] sm:$0xff] (!%p1141_p7)  ;;  %v906_v61 = vadd.f32 (!%p1141_p7), %v1791_v51, %v856_v54  ;;  %v907_v1 = vadd.f32 (!%p1141_p7), %v1791_v51, %v857_v62 }
 0x15a   : > { %v893_v3 = vadd.f32 (!%p1141_p7), %v1791_v51, %v843_v45  ;;  %v894_v11 = vadd.f32 (!%p1141_p7), %v1791_v51, %v844_v59  ;;  %v845_v19 = vld [vmem:[#allocation2 + $0x10] sm:$0xff] (!%p1141_p7)  ;;  %v846_v12 = vld [vmem:[#allocation2 + $0x18] sm:$0xff] (!%p1141_p7)  ;;  %v855_v47 = vld [vmem:[#allocation2 + $0x60] sm:$0xff] (!%p1141_p7)  ;;  %v908_v60 = vadd.f32 (!%p1141_p7), %v1791_v51, %v858_v63 }
 0x15b   : > { %v847_v16 = vld [vmem:[#allocation2 + $0x20] sm:$0xff] (!%p1141_p7)  ;;  %v895_v30 = vadd.f32 (!%p1141_p7), %v1791_v51, %v845_v19  ;;  %v896_v31 = vadd.f32 (!%p1141_p7), %v1791_v51, %v846_v12  ;;  %v848_v20 = vld [vmem:[#allocation2 + $0x28] sm:$0xff] (!%p1141_p7)  ;;  %v905_v26 = vadd.f32 (!%p1141_p7), %v1791_v51, %v855_v47  ;;  %v861_v7 = vld [vmem:[#allocation2 + $0x90] sm:$0xff] (!%p1141_p7)  ;;  %v949_v17 = vmax.f32 (!%p1141_p7), %v906_v61, 0.0 }
 0x15c   : > { %v897_v34 = vadd.f32 (!%p1141_p7), %v1791_v51, %v847_v16  ;;  %v849_v24 = vld [vmem:[#allocation2 + $0x30] sm:$0xff] (!%p1141_p7)  ;;  %v850_v28 = vld [vmem:[#allocation2 + $0x38] sm:$0xff] (!%p1141_p7)  ;;  %v936_v35 = vmax.f32 (!%p1141_p7), %v893_v3, 0.0  ;;  %v937_v38 = vmax.f32 (!%p1141_p7), %v894_v11, 0.0  ;;  %v898_v39 = vadd.f32 (!%p1141_p7), %v1791_v51, %v848_v20  ;;  %v859_v48 = vld [vmem:[#allocation2 + $0x80] sm:$0xff] (!%p1141_p7) }
 0x15d   : > { %v899_v32 = vadd.f32 (!%p1141_p7), %v1791_v51, %v849_v24  ;;  %v851_v36 = vld [vmem:[#allocation2 + $0x40] sm:$0xff] (!%p1141_p7)  ;;  %v852_v40 = vld [vmem:[#allocation2 + $0x48] sm:$0xff] (!%p1141_p7)  ;;  %v938_v43 = vmax.f32 (!%p1141_p7), %v895_v30, 0.0  ;;  %v939_v46 = vmax.f32 (!%p1141_p7), %v896_v31, 0.0  ;;  %v900_v50 = vadd.f32 (!%p1141_p7), %v1791_v51, %v850_v28  ;;  %v862_v14 = vld [vmem:[#allocation2 + $0x98] sm:$0xff] (!%p1141_p7)  ;;  %992 = vst [vmem:[%s1977_s3 + $0x68] sm:$0xff] (!%p1141_p7), %v949_v17 }
 0x15e   : > { %v853_v42 = vld [vmem:[#allocation2 + $0x50] sm:$0xff] (!%p1141_p7)  ;;  %v940_v44 = vmax.f32 (!%p1141_p7), %v897_v34, 0.0  ;;  %v854_v58 = vld [vmem:[#allocation2 + $0x58] sm:$0xff] (!%p1141_p7)  ;;  %979 = vst [vmem:[%s1977_s3] sm:$0xff] (!%p1141_p7), %v936_v35  ;;  %980 = vst [vmem:[%s1977_s3 + $0x8] sm:$0xff] (!%p1141_p7), %v937_v38  ;;  %v941_v55 = vmax.f32 (!%p1141_p7), %v898_v39, 0.0  ;;  %v901_v10 = vadd.f32 (!%p1141_p7), %v1791_v51, %v851_v36  ;;  %v902_v18 = vadd.f32 (!%p1141_p7), %v1791_v51, %v852_v40 }
 0x15f   : > { %v942_v2 = vmax.f32 (!%p1141_p7), %v899_v32, 0.0  ;;  %981 = vst [vmem:[%s1977_s3 + $0x10] sm:$0xff] (!%p1141_p7), %v938_v43  ;;  %982 = vst [vmem:[%s1977_s3 + $0x18] sm:$0xff] (!%p1141_p7), %v939_v46  ;;  %v943_v6 = vmax.f32 (!%p1141_p7), %v900_v50, 0.0  ;;  %v903_v49 = vadd.f32 (!%p1141_p7), %v1791_v51, %v853_v42  ;;  %v904_v53 = vadd.f32 (!%p1141_p7), %v1791_v51, %v854_v58  ;;  %v860_v52 = vld [vmem:[#allocation2 + $0x88] sm:$0xff] (!%p1141_p7)  ;;  %v863_v15 = vld [vmem:[#allocation2 + $0xa0] sm:$0xff] (!%p1141_p7) }
 0x160   : > { %983 = vst [vmem:[%s1977_s3 + $0x20] sm:$0xff] %v940_v44  ;;  %984 = vst [vmem:[%s1977_s3 + $0x28] sm:$0xff] %v941_v55  ;;  %v944_v56 = vmax.f32 %v901_v10, 0.0  ;;  %v945_v57 = vmax.f32 %v902_v18, 0.0  ;;  %v948_v13 = vmax.f32 %v905_v26, 0.0  ;;  %v864_v0 = vld [vmem:[#allocation2 + $0xa8] sm:$0xff]  ;;  %v909_v25 = vadd.f32 %v1791_v51, %v859_v48 }
 0x161   : > { %985 = vst [vmem:[%s1977_s3 + $0x30] sm:$0xff] %v942_v2  ;;  %986 = vst [vmem:[%s1977_s3 + $0x38] sm:$0xff] %v943_v6  ;;  %v946_v5 = vmax.f32 %v903_v49, 0.0  ;;  %v947_v9 = vmax.f32 %v904_v53, 0.0  ;;  %v865_v4 = vld [vmem:[#allocation2 + $0xb0] sm:$0xff]  ;;  %v950_v21 = vmax.f32 %v907_v1, 0.0  ;;  %v910_v22 = vadd.f32 %v1791_v51, %v860_v52 }
 0x162   : > { %987 = vst [vmem:[%s1977_s3 + $0x40] sm:$0xff] %v944_v56  ;;  %988 = vst [vmem:[%s1977_s3 + $0x48] sm:$0xff] %v945_v57  ;;  %v866_v23 = vld [vmem:[#allocation2 + $0xb8] sm:$0xff]  ;;  %v951_v27 = vmax.f32 %v908_v60, 0.0  ;;  %v911_v29 = vadd.f32 %v1791_v51, %v861_v7  ;;  %v912_v33 = vadd.f32 %v1791_v51, %v862_v14  ;;  %v913_v37 = vadd.f32 %v1791_v51, %v863_v15  ;;  %v867_v8 = vld [vmem:[#allocation2 + $0xc0] sm:$0xff] }
 0x163   : > { %989 = vst [vmem:[%s1977_s3 + $0x50] sm:$0xff] %v946_v5  ;;  %990 = vst [vmem:[%s1977_s3 + $0x58] sm:$0xff] %v947_v9  ;;  %v868_v41 = vld [vmem:[#allocation2 + $0xc8] sm:$0xff]  ;;  %v952_v45 = vmax.f32 %v909_v25, 0.0  ;;  %v953_v59 = vmax.f32 %v910_v22, 0.0  ;;  %v914_v3 = vadd.f32 %v1791_v51, %v864_v0  ;;  %v915_v11 = vadd.f32 %v1791_v51, %v865_v4  ;;  %v869_v19 = vld [vmem:[#allocation2 + $0xd0] sm:$0xff] }
 0x164   : > { %991 = vst [vmem:[%s1977_s3 + $0x60] sm:$0xff] %v948_v13  ;;  %993 = vst [vmem:[%s1977_s3 + $0x70] sm:$0xff] %v950_v21  ;;  %v870_v12 = vld [vmem:[#allocation2 + $0xd8] sm:$0xff]  ;;  %v871_v16 = vld [vmem:[#allocation2 + $0xe0] sm:$0xff]  ;;  %v954_v30 = vmax.f32 %v911_v29, 0.0  ;;  %v955_v31 = vmax.f32 %v912_v33, 0.0  ;;  %v916_v20 = vadd.f32 %v1791_v51, %v866_v23  ;;  %v917_v39 = vadd.f32 %v1791_v51, %v867_v8 }
 0x165   : > { %994 = vst [vmem:[%s1977_s3 + $0x78] sm:$0xff] %v951_v27  ;;  %v956_v34 = vmax.f32 %v913_v37, 0.0  ;;  %v872_v24 = vld [vmem:[#allocation2 + $0xe8] sm:$0xff]  ;;  %v873_v28 = vld [vmem:[#allocation2 + $0xf0] sm:$0xff]  ;;  %995 = vst [vmem:[%s1977_s3 + $0x80] sm:$0xff] %v952_v45  ;;  %v957_v35 = vmax.f32 %v914_v3, 0.0  ;;  %v918_v32 = vadd.f32 %v1791_v51, %v868_v41  ;;  %v919_v42 = vadd.f32 %v1791_v51, %v869_v19 }
 0x166   : > { %996 = vst [vmem:[%s1977_s3 + $0x88] sm:$0xff] %v953_v59  ;;  %v958_v38 = vmax.f32 %v915_v11, 0.0  ;;  %v874_v36 = vld [vmem:[#allocation2 + $0xf8] sm:$0xff]  ;;  %997 = vst [vmem:[%s1977_s3 + $0x90] sm:$0xff] %v954_v30  ;;  %v959_v40 = vmax.f32 %v916_v20, 0.0  ;;  %v920_v43 = vadd.f32 %v1791_v51, %v870_v12  ;;  %v921_v46 = vadd.f32 %v1791_v51, %v871_v16  ;;  %v875_v44 = vld [vmem:[#allocation2 + $0x100] sm:$0xff] }
 0x167   : > { %998 = vst [vmem:[%s1977_s3 + $0x98] sm:$0xff] %v955_v31  ;;  %999 = vst [vmem:[%s1977_s3 + $0xa0] sm:$0xff] %v956_v34  ;;  %v876_v50 = vld [vmem:[#allocation2 + $0x108] sm:$0xff]  ;;  %v960_v58 = vmax.f32 %v917_v39, 0.0  ;;  %v961_v47 = vmax.f32 %v918_v32, 0.0  ;;  %v922_v54 = vadd.f32 %v1791_v51, %v872_v24  ;;  %v923_v55 = vadd.f32 %v1791_v51, %v873_v28  ;;  %v877_v2 = vld [vmem:[#allocation2 + $0x110] sm:$0xff] }
 0x168   : > { %1000 = vst [vmem:[%s1977_s3 + $0xa8] sm:$0xff] %v957_v35  ;;  %1001 = vst [vmem:[%s1977_s3 + $0xb0] sm:$0xff] %v958_v38  ;;  %v878_v10 = vld [vmem:[#allocation2 + $0x118] sm:$0xff]  ;;  %v879_v18 = vld [vmem:[#allocation2 + $0x120] sm:$0xff]  ;;  %v962_v62 = vmax.f32 %v919_v42, 0.0  ;;  %v963_v63 = vmax.f32 %v920_v43, 0.0  ;;  %v924_v49 = vadd.f32 %v1791_v51, %v874_v36  ;;  %v925_v56 = vadd.f32 %v1791_v51, %v875_v44 }
 0x169   : > { %1002 = vst [vmem:[%s1977_s3 + $0xb8] sm:$0xff] %v959_v40  ;;  %v964_v6 = vmax.f32 %v921_v46, 0.0  ;;  %v880_v53 = vld [vmem:[#allocation2 + $0x128] sm:$0xff]  ;;  %v881_v26 = vld [vmem:[#allocation2 + $0x130] sm:$0xff]  ;;  %1003 = vst [vmem:[%s1977_s3 + $0xc0] sm:$0xff] %v960_v58  ;;  %v965_v48 = vmax.f32 %v922_v54, 0.0  ;;  %v926_v57 = vadd.f32 %v1791_v51, %v876_v50  ;;  %v927_v7 = vadd.f32 %v1791_v51, %v877_v2 }
 0x16a   : > { %1004 = vst [vmem:[%s1977_s3 + $0xc8] sm:$0xff] %v961_v47  ;;  %v966_v52 = vmax.f32 %v923_v55, 0.0  ;;  %v882_v61 = vld [vmem:[#allocation2 + $0x138] sm:$0xff]  ;;  %1005 = vst [vmem:[%s1977_s3 + $0xd0] sm:$0xff] %v962_v62  ;;  %v967_v1 = vmax.f32 %v924_v49, 0.0  ;;  %v928_v14 = vadd.f32 %v1791_v51, %v878_v10  ;;  %v929_v15 = vadd.f32 %v1791_v51, %v879_v18  ;;  %v883_v5 = vld [vmem:[#allocation2 + $0x140] sm:$0xff] }
 0x16b   : > { %1006 = vst [vmem:[%s1977_s3 + $0xd8] sm:$0xff] %v963_v63  ;;  %1007 = vst [vmem:[%s1977_s3 + $0xe0] sm:$0xff] %v964_v6  ;;  %v884_v9 = vld [vmem:[#allocation2 + $0x148] sm:$0xff]  ;;  %v968_v13 = vmax.f32 %v925_v56, 0.0  ;;  %v969_v60 = vmax.f32 %v926_v57, 0.0  ;;  %v930_v0 = vadd.f32 %v1791_v51, %v880_v53  ;;  %v931_v4 = vadd.f32 %v1791_v51, %v881_v26  ;;  %v885_v17 = vld [vmem:[#allocation2 + $0x150] sm:$0xff] }
 0x16c   : > { %1008 = vst [vmem:[%s1977_s3 + $0xe8] sm:$0xff] %v965_v48  ;;  %1009 = vst [vmem:[%s1977_s3 + $0xf0] sm:$0xff] %v966_v52  ;;  %v970_v21 = vmax.f32 %v927_v7, 0.0  ;;  %v971_v25 = vmax.f32 %v928_v14, 0.0  ;;  %v972_v22 = vmax.f32 %v929_v15, 0.0  ;;  %v932_v23 = vadd.f32 %v1791_v51, %v882_v61 }
 0x16d   : > { %1010 = vst [vmem:[%s1977_s3 + $0xf8] sm:$0xff] %v967_v1  ;;  %1011 = vst [vmem:[%s1977_s3 + $0x100] sm:$0xff] %v968_v13  ;;  %v973_v27 = vmax.f32 %v930_v0, 0.0  ;;  %v974_v29 = vmax.f32 %v931_v4, 0.0  ;;  %v933_v33 = vadd.f32 %v1791_v51, %v883_v5  ;;  %v934_v37 = vadd.f32 %v1791_v51, %v884_v9 }
 0x16e   : > { %1012 = vst [vmem:[%s1977_s3 + $0x108] sm:$0xff] %v969_v60  ;;  %1013 = vst [vmem:[%s1977_s3 + $0x110] sm:$0xff] %v970_v21  ;;  %v975_v8 = vmax.f32 %v932_v23, 0.0  ;;  %v935_v41 = vadd.f32 %v1791_v51, %v885_v17 }
 0x16f   : > { %1014 = vst [vmem:[%s1977_s3 + $0x118] sm:$0xff] %v971_v25  ;;  %1015 = vst [vmem:[%s1977_s3 + $0x120] sm:$0xff] %v972_v22  ;;  %v976_v45 = vmax.f32 %v933_v33, 0.0  ;;  %v977_v59 = vmax.f32 %v934_v37, 0.0 }
 0x170   : > { %1016 = vst [vmem:[%s1977_s3 + $0x128] sm:$0xff] %v973_v27  ;;  %1017 = vst [vmem:[%s1977_s3 + $0x130] sm:$0xff] %v974_v29  ;;  %v978_v3 = vmax.f32 %v935_v41, 0.0 }
 0x171   : > { %1018 = vst [vmem:[%s1977_s3 + $0x138] sm:$0xff] %v975_v8  ;;  %1019 = vst [vmem:[%s1977_s3 + $0x140] sm:$0xff] %v976_v45 }
 0x172   : > { %1020 = vst [vmem:[%s1977_s3 + $0x148] sm:$0xff] %v977_v59  ;;  %1021 = vst [vmem:[%s1977_s3 + $0x150] sm:$0xff] %v978_v3 }
 0x173 PF: > { %s13_s14 = sadd.s32 1, %s1382_s14   ;;  %s1978_s12 = smov %s1378_s13 }
 0x174   : > { %p10_p8 = scmp.ge.s32.totalorder %s13_s14, 6   ;;  %s1979_s13 = smov %s1981_s15 }
 0x176   :  { %12 = sbr.rel (!%p10_p8) target bundleno = 2 (0x2), region = 74 }

// kernel: _lambda_.5
= control target key start
LH: loop header
LB: loop body
LE: loop exit
PB: predicated region body
PF: predicated region fallthrough
CT: control target
= control target key end

     0   :  { %s1743_s12 = smov 0   ;;  %s1745_s13 = smov 0   ;;  %s2783_s0 = inlined_call_operand.vmem [shape: f32[4,56,1152], index: 0, kind: input, shape index: {}]   ;;  %s2784_s1 = inlined_call_operand.vmem [shape: f32[1152,256], index: 1, kind: input, shape index: {}]   ;;  %s2785_s2 = inlined_call_operand.vmem [shape: f32[1,256], index: 2, kind: input, shape index: {}]   ;;  %s2786_s3 = inlined_call_operand.vmem [shape: f32[56,256], index: 3, kind: output, shape index: {}]  }
   0x1   :  { %s1747_s14 = smov 0  }
   0x2 LB: > { %s22_s15 = sadd.s32 1, %s1716_s13  ;;  %p1303_p0 = scmp.ge.s32.totalorder %s1720_s14, 1  ;;  %s1720_s14 = sphi %s1747_s14, %s13_s14   ;;  %s1716_s13 = sphi %s1745_s13, %s2788_s13   ;;  %s1712_s12 = sphi %s1743_s12, %s2787_s12  }
   0x3   : > { %p23_p1 = scmp.ge.s32.totalorder %s22_s15, 4  ;;  %p157_p2 = scmp.lt.s32.totalorder %s1720_s14, 5 }
   0x5   : > { %s2790_s15 = smov (%p23_p1, %s22_s15), 0  ;;  %p158_p3 = pnand %p1303_p0, %p157_p2 }
   0x6   : > { %v269_v0 = vld [vmem:[%s2784_s1 + $0x8] sm:$0xff] (!%p158_p3)  ;;  %v271_v1 = vld [vmem:[%s2784_s1 + $0x18] sm:$0xff] (!%p158_p3)  ;;  %v268_v5 = vld [vmem:[%s2784_s1] sm:$0xff] (!%p158_p3)  ;;  %p188_p4 = scmp.lt.s32.totalorder (!%p158_p3), %s1712_s12, 3  ;;  %p1305_p5 = scmp.ne.s32.totalorder (!%p158_p3), %s1712_s12, 0 }
   0x7   : > { %161 = sbr.rel (%p158_p3) target bundleno = 429 (0x1ad), region = 32  ;;  %v397_v2 = vld [vmem:[%s2784_s1 + $0x408] sm:$0xff] (!%p158_p3)  ;;  %v1312_v3 = vpack.c.bf16 (!%p158_p3), %v271_v1, %v269_v0  ;;  %v399_v4 = vld [vmem:[%s2784_s1 + $0x418] sm:$0xff] (!%p158_p3)  ;;  %v270_v6 = vld [vmem:[%s2784_s1 + $0x10] sm:$0xff] (!%p158_p3) }
   0x8   : > { %v1440_v7 = vpack.c.bf16 (!%p158_p3), %v399_v4, %v397_v2  ;;  %v1314_v8 = vpack.c.bf16 (!%p158_p3), %v270_v6, %v268_v5  ;;  %v396_v9 = vld [vmem:[%s2784_s1 + $0x400] sm:$0xff] (!%p158_p3)  ;;  %v398_v10 = vld [vmem:[%s2784_s1 + $0x410] sm:$0xff] (!%p158_p3)  ;;  %v273_v11 = vld [vmem:[%s2784_s1 + $0x28] sm:$0xff] (!%p158_p3) }
   0x9   : > { %1313 = vmatprep.subr.bf16.mxu1 (!%p158_p3), %v1312_v3  ;;  %v1442_v12 = vpack.c.bf16 (!%p158_p3), %v398_v10, %v396_v9  ;;  %v275_v13 = vld [vmem:[%s2784_s1 + $0x38] sm:$0xff] (!%p158_p3)  ;;  %v401_v14 = vld [vmem:[%s2784_s1 + $0x428] sm:$0xff] (!%p158_p3)  ;;  %v272_v18 = vld [vmem:[%s2784_s1 + $0x20] sm:$0xff] (!%p158_p3) }
   0xa   : > { %v403_v15 = vld [vmem:[%s2784_s1 + $0x438] sm:$0xff] (!%p158_p3)  ;;  %1441 = vmatprep.subr.bf16.mxu0 (!%p158_p3), %v1440_v7  ;;  %1315 = vmatpush1.bf16.msra.mxu1 (!%p158_p3), %v1314_v8  ;;  %v1316_v16 = vpack.c.bf16 (!%p158_p3), %v275_v13, %v273_v11  ;;  %v274_v19 = vld [vmem:[%s2784_s1 + $0x30] sm:$0xff] (!%p158_p3)  ;;  %v400_v20 = vld [vmem:[%s2784_s1 + $0x420] sm:$0xff] (!%p158_p3) }
   0xb   : > { %v1444_v17 = vpack.c.bf16 (!%p158_p3), %v403_v15, %v401_v14  ;;  %1443 = vmatpush1.bf16.msra.mxu0 (!%p158_p3), %v1442_v12  ;;  %v1318_v21 = vpack.c.bf16 (!%p158_p3), %v274_v19, %v272_v18  ;;  %v402_v22 = vld [vmem:[%s2784_s1 + $0x430] sm:$0xff] (!%p158_p3)  ;;  %v277_v23 = vld [vmem:[%s2784_s1 + $0x48] sm:$0xff] (!%p158_p3)  ;;  %v279_v24 = vld [vmem:[%s2784_s1 + $0x58] sm:$0xff] (!%p158_p3) }
   0xc   : > { %1317 = vmatprep.subr.bf16.mxu1 (!%p158_p3), %v1316_v16  ;;  %v1446_v25 = vpack.c.bf16 (!%p158_p3), %v402_v22, %v400_v20  ;;  %v1320_v26 = vpack.c.bf16 (!%p158_p3), %v279_v24, %v277_v23  ;;  %v405_v27 = vld [vmem:[%s2784_s1 + $0x448] sm:$0xff] (!%p158_p3)  ;;  %v407_v28 = vld [vmem:[%s2784_s1 + $0x458] sm:$0xff] (!%p158_p3)  ;;  %v276_v29 = vld [vmem:[%s2784_s1 + $0x40] sm:$0xff] (!%p158_p3) }
   0xd   : > { %1445 = vmatprep.subr.bf16.mxu0 (!%p158_p3), %v1444_v17  ;;  %v1448_v30 = vpack.c.bf16 (!%p158_p3), %v407_v28, %v405_v27  ;;  %v278_v31 = vld [vmem:[%s2784_s1 + $0x50] sm:$0xff] (!%p158_p3)  ;;  %v404_v32 = vld [vmem:[%s2784_s1 + $0x440] sm:$0xff] (!%p158_p3)  ;;  %v281_v35 = vld [vmem:[%s2784_s1 + $0x68] sm:$0xff] (!%p158_p3) }
   0xe   : > { %v406_v33 = vld [vmem:[%s2784_s1 + $0x450] sm:$0xff]  ;;  %1319 = vmatpush1.bf16.msra.mxu1 %v1318_v21  ;;  %v1322_v34 = vpack.c.bf16 %v278_v31, %v276_v29  ;;  %v283_v36 = vld [vmem:[%s2784_s1 + $0x78] sm:$0xff]  ;;  %v409_v37 = vld [vmem:[%s2784_s1 + $0x468] sm:$0xff]  ;;  %s1995_s30 = scalar_select %p188_p4, %s1712_s12, 3 }
   0xf   : > { %1447 = vmatpush1.bf16.msra.mxu0 %v1446_v25  ;;  %1321 = vmatprep.subr.bf16.mxu1 %v1320_v26  ;;  %v1450_v38 = vpack.c.bf16 %v406_v33, %v404_v32  ;;  %v1324_v39 = vpack.c.bf16 %v283_v36, %v281_v35  ;;  %v411_v40 = vld [vmem:[%s2784_s1 + $0x478] sm:$0xff]  ;;  %v280_v41 = vld [vmem:[%s2784_s1 + $0x60] sm:$0xff]  ;;  %v282_v42 = vld [vmem:[%s2784_s1 + $0x70] sm:$0xff] }
  0x10   : > { %1449 = vmatprep.subr.bf16.mxu0 %v1448_v30  ;;  %v1452_v43 = vpack.c.bf16 %v411_v40, %v409_v37  ;;  %v408_v44 = vld [vmem:[%s2784_s1 + $0x460] sm:$0xff]  ;;  %v410_v45 = vld [vmem:[%s2784_s1 + $0x470] sm:$0xff]  ;;  %v285_v46 = vld [vmem:[%s2784_s1 + $0x88] sm:$0xff]  ;;  %v1326_v50 = vpack.c.bf16 %v282_v42, %v280_v41  ;;  %s1672_s24 = smul.u32 504, %s1995_s30 }
  0x11   : > { %v287_v47 = vld [vmem:[%s2784_s1 + $0x98] sm:$0xff]  ;;  %v413_v48 = vld [vmem:[%s2784_s1 + $0x488] sm:$0xff]  ;;  %v1454_v51 = vpack.c.bf16 %v410_v45, %v408_v44  ;;  %v284_v53 = vld [vmem:[%s2784_s1 + $0x80] sm:$0xff] }
  0x12   : > { %v415_v49 = vld [vmem:[%s2784_s1 + $0x498] sm:$0xff]  ;;  %1323 = vmatpush1.bf16.msra.mxu1 %v1322_v34  ;;  %v1328_v52 = vpack.c.bf16 %v287_v47, %v285_v46  ;;  %v286_v54 = vld [vmem:[%s2784_s1 + $0x90] sm:$0xff]  ;;  %v412_v55 = vld [vmem:[%s2784_s1 + $0x480] sm:$0xff]  ;;  %s2049_s20 = scalar_lea.vmem %s2783_s0, %s1672_s24 }
  0x13   : > { %1451 = vmatpush1.bf16.msra.mxu0 %v1450_v38  ;;  %1325 = vmatprep.subr.bf16.mxu1 %v1324_v39  ;;  %v1456_v56 = vpack.c.bf16 %v415_v49, %v413_v48  ;;  %v414_v57 = vld [vmem:[%s2784_s1 + $0x490] sm:$0xff]  ;;  %v289_v58 = vld [vmem:[%s2784_s1 + $0xa8] sm:$0xff]  ;;  %v291_v59 = vld [vmem:[%s2784_s1 + $0xb8] sm:$0xff]  ;;  %v1330_v62 = vpack.c.bf16 %v286_v54, %v284_v53 }
  0x14   : > { %1453 = vmatprep.subr.bf16.mxu0 %v1452_v43  ;;  %v417_v60 = vld [vmem:[%s2784_s1 + $0x4a8] sm:$0xff]  ;;  %v419_v61 = vld [vmem:[%s2784_s1 + $0x4b8] sm:$0xff]  ;;  %v1458_v63 = vpack.c.bf16 %v414_v57, %v412_v55  ;;  %v1332_v0 = vpack.c.bf16 %v291_v59, %v289_v58  ;;  %v288_v1 = vld [vmem:[%s2784_s1 + $0xa0] sm:$0xff] }
  0x15   : > { %v290_v2 = vld [vmem:[%s2784_s1 + $0xb0] sm:$0xff]  ;;  %v416_v3 = vld [vmem:[%s2784_s1 + $0x4a0] sm:$0xff]  ;;  %v1460_v4 = vpack.c.bf16 %v419_v61, %v417_v60  ;;  %v293_v6 = vld [vmem:[%s2784_s1 + $0xc8] sm:$0xff] }
  0x16   : > { %1327 = vmatpush1.bf16.msra.mxu1 %v1326_v50  ;;  %v418_v5 = vld [vmem:[%s2784_s1 + $0x4b0] sm:$0xff]  ;;  %v295_v7 = vld [vmem:[%s2784_s1 + $0xd8] sm:$0xff]  ;;  %v421_v8 = vld [vmem:[%s2784_s1 + $0x4c8] sm:$0xff]  ;;  %v1334_v10 = vpack.c.bf16 %v290_v2, %v288_v1 }
  0x17   : > { %1455 = vmatpush1.bf16.msra.mxu0 %v1454_v51  ;;  %1329 = vmatprep.subr.bf16.mxu1 %v1328_v52  ;;  %v423_v9 = vld [vmem:[%s2784_s1 + $0x4d8] sm:$0xff]  ;;  %v1462_v11 = vpack.c.bf16 %v418_v5, %v416_v3  ;;  %v1336_v12 = vpack.c.bf16 %v295_v7, %v293_v6  ;;  %v292_v13 = vld [vmem:[%s2784_s1 + $0xc0] sm:$0xff]  ;;  %v294_v14 = vld [vmem:[%s2784_s1 + $0xd0] sm:$0xff] }
  0x18   : > { %1457 = vmatprep.subr.bf16.mxu0 %v1456_v56  ;;  %v420_v15 = vld [vmem:[%s2784_s1 + $0x4c0] sm:$0xff]  ;;  %v1464_v16 = vpack.c.bf16 %v423_v9, %v421_v8  ;;  %v422_v17 = vld [vmem:[%s2784_s1 + $0x4d0] sm:$0xff]  ;;  %v297_v18 = vld [vmem:[%s2784_s1 + $0xe8] sm:$0xff]  ;;  %v1338_v22 = vpack.c.bf16 %v294_v14, %v292_v13 }
  0x19   : > { %v299_v19 = vld [vmem:[%s2784_s1 + $0xf8] sm:$0xff]  ;;  %v425_v20 = vld [vmem:[%s2784_s1 + $0x4e8] sm:$0xff]  ;;  %v1466_v23 = vpack.c.bf16 %v422_v17, %v420_v15  ;;  %v296_v25 = vld [vmem:[%s2784_s1 + $0xe0] sm:$0xff] }
  0x1a   : > { %1331 = vmatpush1.bf16.msra.mxu1 %v1330_v62  ;;  %v427_v21 = vld [vmem:[%s2784_s1 + $0x4f8] sm:$0xff]  ;;  %v1340_v24 = vpack.c.bf16 %v299_v19, %v297_v18  ;;  %v298_v26 = vld [vmem:[%s2784_s1 + $0xf0] sm:$0xff]  ;;  %v424_v27 = vld [vmem:[%s2784_s1 + $0x4e0] sm:$0xff] }
  0x1b   : > { %1459 = vmatpush1.bf16.msra.mxu0 %v1458_v63  ;;  %1333 = vmatprep.subr.bf16.mxu1 %v1332_v0  ;;  %v1468_v28 = vpack.c.bf16 %v427_v21, %v425_v20  ;;  %v426_v29 = vld [vmem:[%s2784_s1 + $0x4f0] sm:$0xff]  ;;  %v301_v30 = vld [vmem:[%s2784_s1 + $0x108] sm:$0xff]  ;;  %v303_v31 = vld [vmem:[%s2784_s1 + $0x118] sm:$0xff]  ;;  %v1342_v34 = vpack.c.bf16 %v298_v26, %v296_v25 }
  0x1c   : > { %1461 = vmatprep.subr.bf16.mxu0 %v1460_v4  ;;  %v429_v32 = vld [vmem:[%s2784_s1 + $0x508] sm:$0xff]  ;;  %v431_v33 = vld [vmem:[%s2784_s1 + $0x518] sm:$0xff]  ;;  %v1470_v35 = vpack.c.bf16 %v426_v29, %v424_v27  ;;  %v1344_v36 = vpack.c.bf16 %v303_v31, %v301_v30  ;;  %v300_v37 = vld [vmem:[%s2784_s1 + $0x100] sm:$0xff] }
  0x1d   : > { %v302_v38 = vld [vmem:[%s2784_s1 + $0x110] sm:$0xff]  ;;  %v428_v39 = vld [vmem:[%s2784_s1 + $0x500] sm:$0xff]  ;;  %v1472_v40 = vpack.c.bf16 %v431_v33, %v429_v32  ;;  %v305_v42 = vld [vmem:[%s2784_s1 + $0x128] sm:$0xff] }
  0x1e   : > { %1335 = vmatpush1.bf16.msra.mxu1 %v1334_v10  ;;  %v430_v41 = vld [vmem:[%s2784_s1 + $0x510] sm:$0xff]  ;;  %v307_v43 = vld [vmem:[%s2784_s1 + $0x138] sm:$0xff]  ;;  %v433_v44 = vld [vmem:[%s2784_s1 + $0x528] sm:$0xff]  ;;  %v1346_v46 = vpack.c.bf16 %v302_v38, %v300_v37 }
  0x1f   : > { %1463 = vmatpush1.bf16.msra.mxu0 %v1462_v11  ;;  %1337 = vmatprep.subr.bf16.mxu1 %v1336_v12  ;;  %v435_v45 = vld [vmem:[%s2784_s1 + $0x538] sm:$0xff]  ;;  %v1474_v47 = vpack.c.bf16 %v430_v41, %v428_v39  ;;  %v1348_v48 = vpack.c.bf16 %v307_v43, %v305_v42  ;;  %v304_v49 = vld [vmem:[%s2784_s1 + $0x120] sm:$0xff]  ;;  %v306_v50 = vld [vmem:[%s2784_s1 + $0x130] sm:$0xff] }
  0x20   : > { %1465 = vmatprep.subr.bf16.mxu0 %v1464_v16  ;;  %v432_v51 = vld [vmem:[%s2784_s1 + $0x520] sm:$0xff]  ;;  %v1476_v52 = vpack.c.bf16 %v435_v45, %v433_v44  ;;  %v434_v53 = vld [vmem:[%s2784_s1 + $0x530] sm:$0xff]  ;;  %v309_v54 = vld [vmem:[%s2784_s1 + $0x148] sm:$0xff]  ;;  %v1350_v58 = vpack.c.bf16 %v306_v50, %v304_v49 }
  0x21   : > { %v311_v55 = vld [vmem:[%s2784_s1 + $0x158] sm:$0xff]  ;;  %v437_v56 = vld [vmem:[%s2784_s1 + $0x548] sm:$0xff]  ;;  %v1478_v59 = vpack.c.bf16 %v434_v53, %v432_v51  ;;  %v308_v61 = vld [vmem:[%s2784_s1 + $0x140] sm:$0xff] }
  0x22   : > { %1339 = vmatpush1.bf16.msra.mxu1 %v1338_v22  ;;  %v439_v57 = vld [vmem:[%s2784_s1 + $0x558] sm:$0xff]  ;;  %v1352_v60 = vpack.c.bf16 %v311_v55, %v309_v54  ;;  %v310_v62 = vld [vmem:[%s2784_s1 + $0x150] sm:$0xff]  ;;  %v436_v63 = vld [vmem:[%s2784_s1 + $0x540] sm:$0xff] }
  0x23   : > { %1467 = vmatpush1.bf16.msra.mxu0 %v1466_v23  ;;  %1341 = vmatprep.subr.bf16.mxu1 %v1340_v24  ;;  %v1480_v0 = vpack.c.bf16 %v439_v57, %v437_v56  ;;  %v438_v1 = vld [vmem:[%s2784_s1 + $0x550] sm:$0xff]  ;;  %v313_v2 = vld [vmem:[%s2784_s1 + $0x168] sm:$0xff]  ;;  %v315_v3 = vld [vmem:[%s2784_s1 + $0x178] sm:$0xff]  ;;  %v1354_v6 = vpack.c.bf16 %v310_v62, %v308_v61 }
  0x24   : > { %1469 = vmatprep.subr.bf16.mxu0 %v1468_v28  ;;  %v441_v4 = vld [vmem:[%s2784_s1 + $0x568] sm:$0xff]  ;;  %v443_v5 = vld [vmem:[%s2784_s1 + $0x578] sm:$0xff]  ;;  %v312_v7 = vld [vmem:[%s2784_s1 + $0x160] sm:$0xff]  ;;  %v1482_v8 = vpack.c.bf16 %v438_v1, %v436_v63  ;;  %v1356_v9 = vpack.c.bf16 %v315_v3, %v313_v2 }
  0x25   : > { %v314_v10 = vld [vmem:[%s2784_s1 + $0x170] sm:$0xff]  ;;  %v440_v11 = vld [vmem:[%s2784_s1 + $0x560] sm:$0xff]  ;;  %v1484_v13 = vpack.c.bf16 %v443_v5, %v441_v4  ;;  %v317_v14 = vld [vmem:[%s2784_s1 + $0x188] sm:$0xff] }
  0x26   : > { %1343 = vmatpush1.bf16.msra.mxu1 %v1342_v34  ;;  %v442_v12 = vld [vmem:[%s2784_s1 + $0x570] sm:$0xff]  ;;  %v319_v15 = vld [vmem:[%s2784_s1 + $0x198] sm:$0xff]  ;;  %v206_v16 = vld [vmem:[%s2049_s20 + $0x8] sm:$0xff]  ;;  %v1358_v20 = vpack.c.bf16 %v314_v10, %v312_v7 }
  0x27   : > { %1471 = vmatpush1.bf16.msra.mxu0 %v1470_v35  ;;  %1345 = vmatprep.subr.bf16.mxu1 %v1344_v36  ;;  %v445_v17 = vld [vmem:[%s2784_s1 + $0x588] sm:$0xff]  ;;  %v447_v18 = vld [vmem:[%s2784_s1 + $0x598] sm:$0xff]  ;;  %v1486_v21 = vpack.c.bf16 %v442_v12, %v440_v11  ;;  %v1360_v22 = vpack.c.bf16 %v319_v15, %v317_v14  ;;  %v316_v23 = vld [vmem:[%s2784_s1 + $0x180] sm:$0xff] }
  0x28   : > { %1473 = vmatprep.subr.bf16.mxu0 %v1472_v40  ;;  %620 = vmatprep.mubr.f32.mxu1 %v206_v16  ;;  %v210_v19 = vld [vmem:[%s2049_s20 + $0x28] sm:$0xff]  ;;  %v318_v24 = vld [vmem:[%s2784_s1 + $0x190] sm:$0xff]  ;;  %v444_v25 = vld [vmem:[%s2784_s1 + $0x580] sm:$0xff]  ;;  %v1488_v26 = vpack.c.bf16 %v447_v18, %v445_v17 }
  0x29   : > { %834 = vmatprep.mubr.f32.mxu0 %v210_v19  ;;  %v446_v27 = vld [vmem:[%s2784_s1 + $0x590] sm:$0xff]  ;;  %v321_v28 = vld [vmem:[%s2784_s1 + $0x1a8] sm:$0xff]  ;;  %v323_v29 = vld [vmem:[%s2784_s1 + $0x1b8] sm:$0xff]  ;;  %v1362_v32 = vpack.c.bf16 %v318_v24, %v316_v23 }
  0x2a   : > { %1347 = vmatpush1.bf16.msra.mxu1 %v1346_v46  ;;  %v449_v30 = vld [vmem:[%s2784_s1 + $0x5a8] sm:$0xff]  ;;  %v451_v31 = vld [vmem:[%s2784_s1 + $0x5b8] sm:$0xff]  ;;  %v1490_v33 = vpack.c.bf16 %v446_v27, %v444_v25  ;;  %v1364_v34 = vpack.c.bf16 %v323_v29, %v321_v28  ;;  %v320_v35 = vld [vmem:[%s2784_s1 + $0x1a0] sm:$0xff] }
  0x2b   : > { %1475 = vmatpush1.bf16.msra.mxu0 %v1474_v47  ;;  %1349 = vmatprep.subr.bf16.mxu1 %v1348_v48  ;;  %v322_v36 = vld [vmem:[%s2784_s1 + $0x1b0] sm:$0xff]  ;;  %v448_v37 = vld [vmem:[%s2784_s1 + $0x5a0] sm:$0xff]  ;;  %v1492_v38 = vpack.c.bf16 %v451_v31, %v449_v30  ;;  %v325_v40 = vld [vmem:[%s2784_s1 + $0x1c8] sm:$0xff] }
  0x2c   : > { %1477 = vmatprep.subr.bf16.mxu0 %v1476_v52  ;;  %v450_v39 = vld [vmem:[%s2784_s1 + $0x5b0] sm:$0xff]  ;;  %v327_v41 = vld [vmem:[%s2784_s1 + $0x1d8] sm:$0xff]  ;;  %v453_v42 = vld [vmem:[%s2784_s1 + $0x5c8] sm:$0xff]  ;;  %v1366_v44 = vpack.c.bf16 %v322_v36, %v320_v35 }
  0x2d   : > { %v455_v43 = vld [vmem:[%s2784_s1 + $0x5d8] sm:$0xff]  ;;  %v1494_v45 = vpack.c.bf16 %v450_v39, %v448_v37  ;;  %v1368_v46 = vpack.c.bf16 %v327_v41, %v325_v40  ;;  %v324_v47 = vld [vmem:[%s2784_s1 + $0x1c0] sm:$0xff]  ;;  %v326_v48 = vld [vmem:[%s2784_s1 + $0x1d0] sm:$0xff] }
  0x2e   : > { %1351 = vmatpush1.bf16.msra.mxu1 %v1350_v58  ;;  %v452_v49 = vld [vmem:[%s2784_s1 + $0x5c0] sm:$0xff]  ;;  %v1496_v50 = vpack.c.bf16 %v455_v43, %v453_v42  ;;  %v454_v51 = vld [vmem:[%s2784_s1 + $0x5d0] sm:$0xff]  ;;  %v329_v52 = vld [vmem:[%s2784_s1 + $0x1e8] sm:$0xff]  ;;  %v1370_v56 = vpack.c.bf16 %v326_v48, %v324_v47 }
  0x2f   : > { %1479 = vmatpush1.bf16.msra.mxu0 %v1478_v59  ;;  %1353 = vmatprep.subr.bf16.mxu1 %v1352_v60  ;;  %v331_v53 = vld [vmem:[%s2784_s1 + $0x1f8] sm:$0xff]  ;;  %v457_v54 = vld [vmem:[%s2784_s1 + $0x5e8] sm:$0xff]  ;;  %v1498_v57 = vpack.c.bf16 %v454_v51, %v452_v49  ;;  %v328_v59 = vld [vmem:[%s2784_s1 + $0x1e0] sm:$0xff] }
  0x30   : > { %1481 = vmatprep.subr.bf16.mxu0 %v1480_v0  ;;  %v459_v55 = vld [vmem:[%s2784_s1 + $0x5f8] sm:$0xff]  ;;  %v1372_v58 = vpack.c.bf16 %v331_v53, %v329_v52  ;;  %v330_v60 = vld [vmem:[%s2784_s1 + $0x1f0] sm:$0xff]  ;;  %v456_v61 = vld [vmem:[%s2784_s1 + $0x5e0] sm:$0xff] }
  0x31   : > { %v1500_v62 = vpack.c.bf16 %v459_v55, %v457_v54  ;;  %v458_v63 = vld [vmem:[%s2784_s1 + $0x5f0] sm:$0xff]  ;;  %v333_v0 = vld [vmem:[%s2784_s1 + $0x208] sm:$0xff]  ;;  %v335_v1 = vld [vmem:[%s2784_s1 + $0x218] sm:$0xff]  ;;  %v1374_v4 = vpack.c.bf16 %v330_v60, %v328_v59 }
  0x32   : > { %1355 = vmatpush1.bf16.msra.mxu1 %v1354_v6  ;;  %v461_v2 = vld [vmem:[%s2784_s1 + $0x608] sm:$0xff]  ;;  %v463_v3 = vld [vmem:[%s2784_s1 + $0x618] sm:$0xff]  ;;  %v1502_v5 = vpack.c.bf16 %v458_v63, %v456_v61  ;;  %v1376_v6 = vpack.c.bf16 %v335_v1, %v333_v0  ;;  %v332_v7 = vld [vmem:[%s2784_s1 + $0x200] sm:$0xff] }
  0x33   : > { %1483 = vmatpush1.bf16.msra.mxu0 %v1482_v8  ;;  %1357 = vmatprep.subr.bf16.mxu1 %v1356_v9  ;;  %v334_v8 = vld [vmem:[%s2784_s1 + $0x210] sm:$0xff]  ;;  %v460_v9 = vld [vmem:[%s2784_s1 + $0x600] sm:$0xff]  ;;  %v1504_v10 = vpack.c.bf16 %v463_v3, %v461_v2  ;;  %v337_v12 = vld [vmem:[%s2784_s1 + $0x228] sm:$0xff] }
  0x34   : > { %1485 = vmatprep.subr.bf16.mxu0 %v1484_v13  ;;  %v462_v11 = vld [vmem:[%s2784_s1 + $0x610] sm:$0xff]  ;;  %v339_v13 = vld [vmem:[%s2784_s1 + $0x238] sm:$0xff]  ;;  %v465_v14 = vld [vmem:[%s2784_s1 + $0x628] sm:$0xff]  ;;  %v1378_v17 = vpack.c.bf16 %v334_v8, %v332_v7 }
  0x35   : > { %v467_v15 = vld [vmem:[%s2784_s1 + $0x638] sm:$0xff]  ;;  %v205_v16 = vld [vmem:[%s2049_s20] sm:$0xff]  ;;  %v1506_v19 = vpack.c.bf16 %v462_v11, %v460_v9  ;;  %v466_v25 = vld [vmem:[%s2784_s1 + $0x630] sm:$0xff] }
  0x36   : > { %1359 = vmatpush1.bf16.msra.mxu1 %v1358_v20  ;;  %v209_v18 = vld [vmem:[%s2049_s20 + $0x20] sm:$0xff]  ;;  %v1380_v20 = vpack.c.bf16 %v339_v13, %v337_v12  ;;  %v1508_v24 = vpack.c.bf16 %v467_v15, %v465_v14  ;;  %v343_v27 = vld [vmem:[%s2784_s1 + $0x258] sm:$0xff]  ;;  %v469_v28 = vld [vmem:[%s2784_s1 + $0x648] sm:$0xff] }
  0x37   : > { %1487 = vmatpush1.bf16.msra.mxu0 %v1486_v21  ;;  %1361 = vmatprep.subr.bf16.mxu1 %v1360_v22  ;;  %v336_v21 = vld [vmem:[%s2784_s1 + $0x220] sm:$0xff]  ;;  %v338_v22 = vld [vmem:[%s2784_s1 + $0x230] sm:$0xff]  ;;  %v471_v29 = vld [vmem:[%s2784_s1 + $0x658] sm:$0xff] }
  0x38   : > { %1489 = vmatprep.subr.bf16.mxu0 %v1488_v26  ;;  %v464_v23 = vld [vmem:[%s2784_s1 + $0x620] sm:$0xff]  ;;  %v341_v26 = vld [vmem:[%s2784_s1 + $0x248] sm:$0xff]  ;;  %v1382_v30 = vpack.c.bf16 %v338_v22, %v336_v21  ;;  %v470_v36 = vld [vmem:[%s2784_s1 + $0x650] sm:$0xff] }
  0x39   : > { %v340_v31 = vld [vmem:[%s2784_s1 + $0x240] sm:$0xff]  ;;  %v345_v37 = vld [vmem:[%s2784_s1 + $0x268] sm:$0xff]  ;;  %v347_v39 = vld [vmem:[%s2784_s1 + $0x278] sm:$0xff] }
  0x3a   : > { %1363 = vmatpush1.bf16.msra.mxu1 %v1362_v32  ;;  %v342_v32 = vld [vmem:[%s2784_s1 + $0x250] sm:$0xff]  ;;  %v468_v35 = vld [vmem:[%s2784_s1 + $0x640] sm:$0xff]  ;;  %v473_v40 = vld [vmem:[%s2784_s1 + $0x668] sm:$0xff] }
  0x3b   : > { %1491 = vmatpush1.bf16.msra.mxu0 %v1490_v33  ;;  %1365 = vmatprep.subr.bf16.mxu1 %v1364_v34  ;;  %v1510_v33 = vpack.c.bf16 %v466_v25, %v464_v23  ;;  %v1384_v34 = vpack.c.bf16 %v343_v27, %v341_v26  ;;  %v215_v41 = vld [vmem:[%s2049_s20 + $0x50] sm:$0xff]  ;;  %v475_v42 = vld [vmem:[%s2784_s1 + $0x678] sm:$0xff]  ;;  %v218_v48 = vld [vmem:[%s2049_s20 + $0x68] sm:$0xff]  ;;  %v1514_v49 = vpack.c.bf16 %v470_v36, %v468_v35 }
  0x3c   : > { %1493 = vmatprep.subr.bf16.mxu0 %v1492_v38  ;;  %v1512_v38 = vpack.c.bf16 %v471_v29, %v469_v28  ;;  %v219_v43 = vld [vmem:[%s2049_s20 + $0x70] sm:$0xff]  ;;  %v472_v51 = vld [vmem:[%s2784_s1 + $0x660] sm:$0xff]  ;;  %v349_v53 = vld [vmem:[%s2784_s1 + $0x288] sm:$0xff]  ;;  %v1516_v54 = vpack.c.bf16 %v475_v42, %v473_v40 }
  0x3d   : > { %v346_v47 = vld [vmem:[%s2784_s1 + $0x270] sm:$0xff]  ;;  %v351_v55 = vld [vmem:[%s2784_s1 + $0x298] sm:$0xff]  ;;  %v476_v3 = vld [vmem:[%s2784_s1 + $0x680] sm:$0xff] }
  0x3e   : > { %1367 = vmatpush1.bf16.msra.mxu1 %v1366_v44  ;;  %v214_v44 = vld [vmem:[%s2049_s20 + $0x48] sm:$0xff]  ;;  %v474_v52 = vld [vmem:[%s2784_s1 + $0x670] sm:$0xff]  ;;  %v228_v59 = vld [vmem:[%s2049_s20 + $0xb8] sm:$0xff]  ;;  %v1392_v2 = vpack.c.bf16 %v351_v55, %v349_v53 }
  0x3f   : > { %1495 = vmatpush1.bf16.msra.mxu0 %v1494_v45  ;;  %1369 = vmatprep.subr.bf16.mxu1 %v1368_v46  ;;  %v1386_v45 = vpack.c.bf16 %v342_v32, %v340_v31  ;;  %v344_v46 = vld [vmem:[%s2784_s1 + $0x260] sm:$0xff]  ;;  %v223_v60 = vld [vmem:[%s2049_s20 + $0x90] sm:$0xff]  ;;  %v1518_v1 = vpack.c.bf16 %v474_v52, %v472_v51  ;;  %v355_v7 = vld [vmem:[%s2784_s1 + $0x2b8] sm:$0xff] }
  0x40   : > { %1497 = vmatprep.subr.bf16.mxu0 %v1496_v50  ;;  %v1388_v50 = vpack.c.bf16 %v347_v39, %v345_v37  ;;  %v1390_v61 = vpack.c.bf16 %v346_v47, %v344_v46  ;;  %v350_v63 = vld [vmem:[%s2784_s1 + $0x290] sm:$0xff]  ;;  %v481_v8 = vld [vmem:[%s2784_s1 + $0x6a8] sm:$0xff]  ;;  %v233_v9 = vld [vmem:[%s2049_s20 + $0xe0] sm:$0xff] }
  0x41   : > { %v227_v0 = vld [vmem:[%s2049_s20 + $0xb0] sm:$0xff]  ;;  %v237_v11 = vld [vmem:[%s2049_s20 + $0x100] sm:$0xff]  ;;  %v232_v12 = vld [vmem:[%s2049_s20 + $0xd8] sm:$0xff] }
  0x42   : > { %1371 = vmatpush1.bf16.msra.mxu1 %v1370_v56  ;;  %v477_v56 = vld [vmem:[%s2784_s1 + $0x688] sm:$0xff]  ;;  %v352_v14 = vld [vmem:[%s2784_s1 + $0x2a0] sm:$0xff]  ;;  %v354_v15 = vld [vmem:[%s2784_s1 + $0x2b0] sm:$0xff] }
  0x43   : > { %1499 = vmatpush1.bf16.msra.mxu0 %v1498_v57  ;;  %1373 = vmatprep.subr.bf16.mxu1 %v1372_v58  ;;  %v224_v57 = vld [vmem:[%s2049_s20 + $0x98] sm:$0xff]  ;;  %v357_v21 = vld [vmem:[%s2784_s1 + $0x2c8] sm:$0xff]  ;;  %v241_v28 = vld [vmem:[%s2049_s20 + $0x120] sm:$0xff]  ;;  %v1398_v29 = vpack.c.bf16 %v354_v15, %v352_v14 }
  0x44   : > { %1501 = vmatprep.subr.bf16.mxu0 %v1500_v62  ;;  %v479_v58 = vld [vmem:[%s2784_s1 + $0x698] sm:$0xff]  ;;  %v348_v62 = vld [vmem:[%s2784_s1 + $0x280] sm:$0xff]  ;;  %v242_v25 = vld [vmem:[%s2049_s20 + $0x128] sm:$0xff] }
  0x45   : > { %v1394_v13 = vpack.c.bf16 %v350_v63, %v348_v62  ;;  %v359_v23 = vld [vmem:[%s2784_s1 + $0x2d8] sm:$0xff]  ;;  %v246_v27 = vld [vmem:[%s2049_s20 + $0x148] sm:$0xff]  ;;  %v358_v31 = vld [vmem:[%s2784_s1 + $0x2d0] sm:$0xff] }
  0x46   : > { %1375 = vmatpush1.bf16.msra.mxu1 %v1374_v4  ;;  %v478_v4 = vld [vmem:[%s2784_s1 + $0x690] sm:$0xff]  ;;  %v487_v26 = vld [vmem:[%s2784_s1 + $0x6d8] sm:$0xff]  ;;  %v245_v32 = vld [vmem:[%s2049_s20 + $0x140] sm:$0xff] }
  0x47   : > { %1503 = vmatpush1.bf16.msra.mxu0 %v1502_v5  ;;  %1377 = vmatprep.subr.bf16.mxu1 %v1376_v6  ;;  %v353_v5 = vld [vmem:[%s2784_s1 + $0x2a8] sm:$0xff]  ;;  %v1520_v6 = vpack.c.bf16 %v479_v58, %v477_v56  ;;  %v484_v35 = vld [vmem:[%s2784_s1 + $0x6c0] sm:$0xff]  ;;  %v486_v36 = vld [vmem:[%s2784_s1 + $0x6d0] sm:$0xff] }
  0x48   : > { %1505 = vmatprep.subr.bf16.mxu0 %v1504_v10  ;;  %v483_v10 = vld [vmem:[%s2784_s1 + $0x6b8] sm:$0xff]  ;;  %v361_v37 = vld [vmem:[%s2784_s1 + $0x2e8] sm:$0xff]  ;;  %v360_v46 = vld [vmem:[%s2784_s1 + $0x2e0] sm:$0xff] }
  0x49   : > { %621 = vmatmul.mubr.f32.vlgmr.msra.gmra.mrb[0].mxu1 %v205_v16  ;;  %v236_v16 = vld [vmem:[%s2049_s20 + $0xf8] sm:$0xff]  ;;  %v1524_v22 = vpack.c.bf16 %v483_v10, %v481_v8  ;;  %v489_v40 = vld [vmem:[%s2784_s1 + $0x6e8] sm:$0xff]  ;;  %v362_v47 = vld [vmem:[%s2784_s1 + $0x2f0] sm:$0xff] }
  0x4a   : > { %1379 = vmatpush1.bf16.msra.mxu1 %v1378_v17  ;;  %835 = vmatmul.mubr.f32.vlgmr.msra.gmra.mrb[0].mxu0 %v209_v18  ;;  %v1522_v17 = vpack.c.bf16 %v478_v4, %v476_v3  ;;  %v1396_v18 = vpack.c.bf16 %v355_v7, %v353_v5  ;;  %v363_v39 = vld [vmem:[%s2784_s1 + $0x2f8] sm:$0xff]  ;;  %v488_v51 = vld [vmem:[%s2784_s1 + $0x6e0] sm:$0xff]  ;;  %v490_v52 = vld [vmem:[%s2784_s1 + $0x6f0] sm:$0xff] }
  0x4b   : > { %1507 = vmatpush1.bf16.msra.mxu0 %v1506_v19  ;;  %1381 = vmatprep.subr.bf16.mxu1 %v1380_v20  ;;  %v480_v19 = vld [vmem:[%s2784_s1 + $0x6a0] sm:$0xff]  ;;  %v482_v20 = vld [vmem:[%s2784_s1 + $0x6b0] sm:$0xff]  ;;  %v491_v42 = vld [vmem:[%s2784_s1 + $0x6f8] sm:$0xff] }
  0x4c   : > { %1509 = vmatprep.subr.bf16.mxu0 %v1508_v24  ;;  %626 = vmatprep.mubr.f32.mxu1 %v215_v41  ;;  %v485_v24 = vld [vmem:[%s2784_s1 + $0x6c8] sm:$0xff]  ;;  %v251_v41 = vld [vmem:[%s2049_s20 + $0x170] sm:$0xff]  ;;  %v367_v55 = vld [vmem:[%s2784_s1 + $0x318] sm:$0xff] }
  0x4d   : > { %840 = vmatprep.mubr.f32.mxu0 %v219_v43  ;;  %627 = vmatmul.mubr.f32.gmra.mrb[2].mxu1 %v214_v44  ;;  %v255_v43 = vld [vmem:[%s2049_s20 + $0x190] sm:$0xff]  ;;  %v250_v44 = vld [vmem:[%s2049_s20 + $0x168] sm:$0xff]  ;;  %v495_v58 = vld [vmem:[%s2784_s1 + $0x718] sm:$0xff] }
  0x4e   : > { %1383 = vmatpush1.bf16.msra.mxu1 %v1382_v30  ;;  %841 = vmatmul.mubr.f32.gmra.mrb[2].mxu0 %v218_v48  ;;  %v356_v30 = vld [vmem:[%s2784_s1 + $0x2c0] sm:$0xff]  ;;  %v254_v48 = vld [vmem:[%s2049_s20 + $0x188] sm:$0xff]  ;;  %v263_v63 = vld [vmem:[%s2049_s20 + $0x1d0] sm:$0xff] }
  0x4f   : > { %1511 = vmatpush1.bf16.msra.mxu0 %v1510_v33  ;;  %1385 = vmatprep.subr.bf16.mxu1 %v1384_v34  ;;  %v1526_v33 = vpack.c.bf16 %v482_v20, %v480_v19  ;;  %v1400_v34 = vpack.c.bf16 %v359_v23, %v357_v21  ;;  %v365_v53 = vld [vmem:[%s2784_s1 + $0x308] sm:$0xff]  ;;  %v364_v62 = vld [vmem:[%s2784_s1 + $0x300] sm:$0xff]  ;;  %v494_v4 = vld [vmem:[%s2784_s1 + $0x710] sm:$0xff] }
  0x50   : > { %1513 = vmatprep.subr.bf16.mxu0 %v1512_v38  ;;  %632 = vmatprep.mubr.f32.mxu1 %v224_v57  ;;  %v1528_v38 = vpack.c.bf16 %v487_v26, %v485_v24  ;;  %v493_v56 = vld [vmem:[%s2784_s1 + $0x708] sm:$0xff]  ;;  %v260_v57 = vld [vmem:[%s2049_s20 + $0x1b8] sm:$0xff]  ;;  %v492_v3 = vld [vmem:[%s2784_s1 + $0x700] sm:$0xff] }
  0x51   : > { %846 = vmatprep.mubr.f32.mxu0 %v228_v59  ;;  %633 = vmatmul.mubr.f32.gmra.mrb[4].mxu1 %v223_v60  ;;  %v264_v59 = vld [vmem:[%s2049_s20 + $0x1d8] sm:$0xff]  ;;  %v259_v60 = vld [vmem:[%s2049_s20 + $0x1b0] sm:$0xff]  ;;  %v1536_v5 = vpack.c.bf16 %v495_v58, %v493_v56  ;;  %v368_v15 = vld [vmem:[%s2784_s1 + $0x320] sm:$0xff] }
  0x52   : > { %1387 = vmatpush1.bf16.msra.mxu1 %v1386_v45  ;;  %847 = vmatmul.mubr.f32.gmra.mrb[4].mxu0 %v227_v0  ;;  %v1402_v45 = vpack.c.bf16 %v358_v31, %v356_v30  ;;  %v1534_v0 = vpack.c.bf16 %v490_v52, %v488_v51  ;;  %v371_v7 = vld [vmem:[%s2784_s1 + $0x338] sm:$0xff]  ;;  %v498_v19 = vld [vmem:[%s2784_s1 + $0x730] sm:$0xff]  ;;  %v373_v20 = vld [vmem:[%s2784_s1 + $0x348] sm:$0xff] }
  0x53   : > { %1515 = vmatpush1.bf16.msra.mxu0 %v1514_v49  ;;  %1389 = vmatprep.subr.bf16.mxu1 %v1388_v50  ;;  %v1530_v49 = vpack.c.bf16 %v486_v36, %v484_v35  ;;  %v1404_v50 = vpack.c.bf16 %v363_v39, %v361_v37  ;;  %v208_v8 = vld [vmem:[%s2049_s20 + $0x18] sm:$0xff]  ;;  %v502_v31 = vld [vmem:[%s2784_s1 + $0x750] sm:$0xff]  ;;  %v376_v39 = vld [vmem:[%s2784_s1 + $0x360] sm:$0xff] }
  0x54   : > { %1517 = vmatprep.subr.bf16.mxu0 %v1516_v54  ;;  %638 = vmatprep.mubr.f32.mxu1 %v233_v9  ;;  %v1532_v54 = vpack.c.bf16 %v491_v42, %v489_v40  ;;  %v497_v9 = vld [vmem:[%s2784_s1 + $0x728] sm:$0xff]  ;;  %v499_v10 = vld [vmem:[%s2784_s1 + $0x738] sm:$0xff]  ;;  %v378_v40 = vld [vmem:[%s2784_s1 + $0x370] sm:$0xff] }
  0x55   : > { %852 = vmatprep.mubr.f32.mxu0 %v237_v11  ;;  %639 = vmatmul.mubr.f32.gmra.mrb[6].mxu1 %v232_v12  ;;  %v212_v11 = vld [vmem:[%s2049_s20 + $0x38] sm:$0xff]  ;;  %v380_v51 = vld [vmem:[%s2784_s1 + $0x380] sm:$0xff]  ;;  %v382_v52 = vld [vmem:[%s2784_s1 + $0x390] sm:$0xff] }
  0x56   : > { %1391 = vmatpush1.bf16.msra.mxu1 %v1390_v61  ;;  %853 = vmatmul.mubr.f32.gmra.mrb[6].mxu0 %v236_v16  ;;  %v1406_v61 = vpack.c.bf16 %v362_v47, %v360_v46  ;;  %v370_v16 = vld [vmem:[%s2784_s1 + $0x330] sm:$0xff]  ;;  %v375_v21 = vld [vmem:[%s2784_s1 + $0x358] sm:$0xff]  ;;  %v509_v46 = vld [vmem:[%s2784_s1 + $0x788] sm:$0xff] }
  0x57   : > { %1519 = vmatpush1.bf16.msra.mxu0 %v1518_v1  ;;  %1393 = vmatprep.subr.bf16.mxu1 %v1392_v2  ;;  %v1408_v1 = vpack.c.bf16 %v367_v55, %v365_v53  ;;  %v366_v2 = vld [vmem:[%s2784_s1 + $0x310] sm:$0xff]  ;;  %v503_v23 = vld [vmem:[%s2784_s1 + $0x758] sm:$0xff]  ;;  %v1414_v24 = vpack.c.bf16 %v370_v16, %v368_v15  ;;  %v1416_v26 = vpack.c.bf16 %v375_v21, %v373_v20  ;;  %v508_v53 = vld [vmem:[%s2784_s1 + $0x780] sm:$0xff] }
  0x58   : > { %1521 = vmatprep.subr.bf16.mxu0 %v1520_v6  ;;  %644 = vmatprep.mubr.f32.mxu1 %v242_v25  ;;  %v369_v6 = vld [vmem:[%s2784_s1 + $0x328] sm:$0xff]  ;;  %v1410_v12 = vpack.c.bf16 %v366_v2, %v364_v62  ;;  %v507_v35 = vld [vmem:[%s2784_s1 + $0x778] sm:$0xff]  ;;  %v510_v55 = vld [vmem:[%s2784_s1 + $0x790] sm:$0xff] }
  0x59   : > { %858 = vmatprep.mubr.f32.mxu0 %v246_v27  ;;  %645 = vmatmul.mubr.f32.gmra.mrb[8].mxu1 %v241_v28  ;;  %v1412_v14 = vpack.c.bf16 %v371_v7, %v369_v6  ;;  %v372_v27 = vld [vmem:[%s2784_s1 + $0x340] sm:$0xff]  ;;  %v374_v28 = vld [vmem:[%s2784_s1 + $0x350] sm:$0xff]  ;;  %v511_v47 = vld [vmem:[%s2784_s1 + $0x798] sm:$0xff] }
  0x5a   : > { %1395 = vmatpush1.bf16.msra.mxu1 %v1394_v13  ;;  %859 = vmatmul.mubr.f32.gmra.mrb[8].mxu0 %v245_v32  ;;  %v1538_v13 = vpack.c.bf16 %v494_v4, %v492_v3  ;;  %v377_v32 = vld [vmem:[%s2784_s1 + $0x368] sm:$0xff]  ;;  %v1418_v36 = vpack.c.bf16 %v374_v28, %v372_v27  ;;  %v514_v3 = vld [vmem:[%s2784_s1 + $0x7b0] sm:$0xff]  ;;  %v519_v7 = vld [vmem:[%s2784_s1 + $0x7d8] sm:$0xff] }
  0x5b   : > { %1523 = vmatpush1.bf16.msra.mxu0 %v1522_v17  ;;  %1397 = vmatprep.subr.bf16.mxu1 %v1396_v18  ;;  %v496_v17 = vld [vmem:[%s2784_s1 + $0x720] sm:$0xff]  ;;  %v1540_v18 = vpack.c.bf16 %v499_v10, %v497_v9  ;;  %v385_v56 = vld [vmem:[%s2784_s1 + $0x3a8] sm:$0xff]  ;;  %v518_v15 = vld [vmem:[%s2784_s1 + $0x7d0] sm:$0xff] }
  0x5c   : > { %1525 = vmatprep.subr.bf16.mxu0 %v1524_v22  ;;  %650 = vmatprep.mubr.f32.mxu1 %v251_v41  ;;  %v501_v22 = vld [vmem:[%s2784_s1 + $0x748] sm:$0xff]  ;;  %v1542_v25 = vpack.c.bf16 %v498_v19, %v496_v17  ;;  %v504_v41 = vld [vmem:[%s2784_s1 + $0x760] sm:$0xff]  ;;  %v395_v17 = vld [vmem:[%s2784_s1 + $0x3f8] sm:$0xff] }
  0x5d   : > { %864 = vmatprep.mubr.f32.mxu0 %v255_v43  ;;  %651 = vmatmul.mubr.f32.gmra.mrb[10].mxu1 %v250_v44  ;;  %v1544_v30 = vpack.c.bf16 %v503_v23, %v501_v22  ;;  %v506_v43 = vld [vmem:[%s2784_s1 + $0x770] sm:$0xff]  ;;  %v381_v44 = vld [vmem:[%s2784_s1 + $0x388] sm:$0xff]  ;;  %v523_v19 = vld [vmem:[%s2784_s1 + $0x7f8] sm:$0xff] }
  0x5e   : > { %1399 = vmatpush1.bf16.msra.mxu1 %v1398_v29  ;;  %865 = vmatmul.mubr.f32.gmra.mrb[10].mxu0 %v254_v48  ;;  %v500_v29 = vld [vmem:[%s2784_s1 + $0x740] sm:$0xff]  ;;  %v1422_v48 = vpack.c.bf16 %v378_v40, %v376_v39  ;;  %v513_v58 = vld [vmem:[%s2784_s1 + $0x7a8] sm:$0xff]  ;;  %v522_v27 = vld [vmem:[%s2784_s1 + $0x7f0] sm:$0xff] }
  0x5f   : > { %1527 = vmatpush1.bf16.msra.mxu0 %v1526_v33  ;;  %1401 = vmatprep.subr.bf16.mxu1 %v1400_v34  ;;  %v379_v33 = vld [vmem:[%s2784_s1 + $0x378] sm:$0xff]  ;;  %v505_v34 = vld [vmem:[%s2784_s1 + $0x768] sm:$0xff]  ;;  %v1546_v37 = vpack.c.bf16 %v502_v31, %v500_v29  ;;  %v392_v23 = vld [vmem:[%s2784_s1 + $0x3e0] sm:$0xff] }
  0x60   : > { %1529 = vmatprep.subr.bf16.mxu0 %v1528_v38  ;;  %656 = vmatprep.mubr.f32.mxu1 %v260_v57  ;;  %v1420_v38 = vpack.c.bf16 %v379_v33, %v377_v32  ;;  %v1548_v42 = vpack.c.bf16 %v507_v35, %v505_v34  ;;  %v387_v57 = vld [vmem:[%s2784_s1 + $0x3b8] sm:$0xff]  ;;  %v389_v4 = vld [vmem:[%s2784_s1 + $0x3c8] sm:$0xff]  ;;  %v524_v33 = vld [vmem:[%s2784_s1 + $0x800] sm:$0xff] }
  0x61   : > { %870 = vmatprep.mubr.f32.mxu0 %v264_v59  ;;  %657 = vmatmul.mubr.f32.gmra.mrb[12].mxu1 %v259_v60  ;;  %v515_v59 = vld [vmem:[%s2784_s1 + $0x7b8] sm:$0xff]  ;;  %v1426_v60 = vpack.c.bf16 %v382_v52, %v380_v51  ;;  %v1428_v62 = vpack.c.bf16 %v387_v57, %v385_v56  ;;  %v517_v6 = vld [vmem:[%s2784_s1 + $0x7c8] sm:$0xff]  ;;  %v526_v34 = vld [vmem:[%s2784_s1 + $0x810] sm:$0xff] }
  0x62   : > { %1403 = vmatpush1.bf16.msra.mxu1 %v1402_v45  ;;  %871 = vmatmul.mubr.f32.gmra.mrb[12].mxu0 %v263_v63  ;;  %v383_v45 = vld [vmem:[%s2784_s1 + $0x398] sm:$0xff]  ;;  %v384_v63 = vld [vmem:[%s2784_s1 + $0x3a0] sm:$0xff]  ;;  %v1556_v2 = vpack.c.bf16 %v515_v59, %v513_v58  ;;  %v393_v16 = vld [vmem:[%s2784_s1 + $0x3e8] sm:$0xff] }
  0x63   : > { %1531 = vmatpush1.bf16.msra.mxu0 %v1530_v49  ;;  %1405 = vmatprep.subr.bf16.mxu1 %v1404_v50  ;;  %v1550_v49 = vpack.c.bf16 %v506_v43, %v504_v41  ;;  %v1424_v50 = vpack.c.bf16 %v383_v45, %v381_v44  ;;  %v1436_v22 = vpack.c.bf16 %v395_v17, %v393_v16  ;;  %v525_v28 = vld [vmem:[%s2784_s1 + $0x808] sm:$0xff]  ;;  %v527_v29 = vld [vmem:[%s2784_s1 + $0x818] sm:$0xff]  ;;  %v211_v39 = vld [vmem:[%s2049_s20 + $0x30] sm:$0xff] }
  0x64   : > { %1533 = vmatprep.subr.bf16.mxu0 %v1532_v54  ;;  %727 = vmatprep.mubr.f32.mxu1 %v208_v8  ;;  %v1552_v54 = vpack.c.bf16 %v511_v47, %v509_v46  ;;  %v1568_v32 = vpack.c.bf16 %v527_v29, %v525_v28  ;;  %v529_v35 = vld [vmem:[%s2784_s1 + $0x828] sm:$0xff]  ;;  %v528_v40 = vld [vmem:[%s2784_s1 + $0x820] sm:$0xff]  ;;  %v530_v41 = vld [vmem:[%s2784_s1 + $0x830] sm:$0xff] }
  0x65   : > { %941 = vmatprep.mubr.f32.mxu0 %v212_v11  ;;  %v388_v11 = vld [vmem:[%s2784_s1 + $0x3c0] sm:$0xff]  ;;  %v533_v45 = vld [vmem:[%s2784_s1 + $0x848] sm:$0xff]  ;;  %v535_v46 = vld [vmem:[%s2784_s1 + $0x858] sm:$0xff] }
  0x66   : > { %1407 = vmatpush1.bf16.msra.mxu1 %v1406_v61  ;;  %v1554_v61 = vpack.c.bf16 %v510_v55, %v508_v53  ;;  %v221_v44 = vld [vmem:[%s2049_s20 + $0x80] sm:$0xff]  ;;  %v216_v47 = vld [vmem:[%s2049_s20 + $0x58] sm:$0xff]  ;;  %v534_v51 = vld [vmem:[%s2784_s1 + $0x850] sm:$0xff]  ;;  %v1576_v53 = vpack.c.bf16 %v535_v46, %v533_v45 }
  0x67   : > { %1535 = vmatpush1.bf16.msra.mxu0 %v1534_v0  ;;  %1409 = vmatprep.subr.bf16.mxu1 %v1408_v1  ;;  %v386_v0 = vld [vmem:[%s2784_s1 + $0x3b0] sm:$0xff]  ;;  %v512_v1 = vld [vmem:[%s2784_s1 + $0x7a0] sm:$0xff]  ;;  %v226_v52 = vld [vmem:[%s2049_s20 + $0xa8] sm:$0xff] }
  0x68   : > { %1537 = vmatprep.subr.bf16.mxu0 %v1536_v5  ;;  %v391_v5 = vld [vmem:[%s2784_s1 + $0x3d8] sm:$0xff]  ;;  %v1430_v8 = vpack.c.bf16 %v386_v0, %v384_v63  ;;  %v1558_v9 = vpack.c.bf16 %v514_v3, %v512_v1  ;;  %v537_v55 = vld [vmem:[%s2784_s1 + $0x868] sm:$0xff]  ;;  %v225_v57 = vld [vmem:[%s2049_s20 + $0xa0] sm:$0xff] }
  0x69   : > { %v1432_v10 = vpack.c.bf16 %v391_v5, %v389_v4  ;;  %v539_v56 = vld [vmem:[%s2784_s1 + $0x878] sm:$0xff]  ;;  %v229_v59 = vld [vmem:[%s2049_s20 + $0xc0] sm:$0xff]  ;;  %v239_v0 = vld [vmem:[%s2049_s20 + $0x110] sm:$0xff] }
  0x6a   : > { %1411 = vmatpush1.bf16.msra.mxu1 %v1410_v12  ;;  %v390_v12 = vld [vmem:[%s2784_s1 + $0x3d0] sm:$0xff]  ;;  %v1580_v63 = vpack.c.bf16 %v539_v56, %v537_v55  ;;  %v541_v1 = vld [vmem:[%s2784_s1 + $0x888] sm:$0xff]  ;;  %v544_v16 = vld [vmem:[%s2784_s1 + $0x8a0] sm:$0xff] }
  0x6b   : > { %1539 = vmatpush1.bf16.msra.mxu0 %v1538_v13  ;;  %1413 = vmatprep.subr.bf16.mxu1 %v1412_v14  ;;  %v516_v13 = vld [vmem:[%s2784_s1 + $0x7c0] sm:$0xff]  ;;  %v1560_v14 = vpack.c.bf16 %v519_v7, %v517_v6  ;;  %v1434_v20 = vpack.c.bf16 %v390_v12, %v388_v11  ;;  %v234_v3 = vld [vmem:[%s2049_s20 + $0xe8] sm:$0xff]  ;;  %v542_v7 = vld [vmem:[%s2784_s1 + $0x890] sm:$0xff] }
  0x6c   : > { %1541 = vmatprep.subr.bf16.mxu0 %v1540_v18  ;;  %v521_v18 = vld [vmem:[%s2784_s1 + $0x7e8] sm:$0xff]  ;;  %v1562_v21 = vpack.c.bf16 %v518_v15, %v516_v13  ;;  %v540_v6 = vld [vmem:[%s2784_s1 + $0x880] sm:$0xff]  ;;  %v547_v12 = vld [vmem:[%s2784_s1 + $0x8b8] sm:$0xff] }
  0x6d   : > { %v238_v5 = vld [vmem:[%s2049_s20 + $0x108] sm:$0xff]  ;;  %v243_v13 = vld [vmem:[%s2049_s20 + $0x130] sm:$0xff] }
  0x6e   : > { %1415 = vmatpush1.bf16.msra.mxu1 %v1414_v24  ;;  %v394_v24 = vld [vmem:[%s2784_s1 + $0x3f0] sm:$0xff]  ;;  %v545_v11 = vld [vmem:[%s2784_s1 + $0x8a8] sm:$0xff] }
  0x6f   : > { %1543 = vmatpush1.bf16.msra.mxu0 %v1542_v25  ;;  %1417 = vmatprep.subr.bf16.mxu1 %v1416_v26  ;;  %v520_v25 = vld [vmem:[%s2784_s1 + $0x7e0] sm:$0xff]  ;;  %v1564_v26 = vpack.c.bf16 %v523_v19, %v521_v18  ;;  %v247_v15 = vld [vmem:[%s2049_s20 + $0x150] sm:$0xff]  ;;  %v1588_v19 = vpack.c.bf16 %v547_v12, %v545_v11  ;;  %v262_v28 = vld [vmem:[%s2049_s20 + $0x1c8] sm:$0xff] }
  0x70   : > { %1545 = vmatprep.subr.bf16.mxu0 %v1544_v30  ;;  %v1438_v30 = vpack.c.bf16 %v394_v24, %v392_v23  ;;  %v1566_v31 = vpack.c.bf16 %v522_v27, %v520_v25  ;;  %v546_v17 = vld [vmem:[%s2784_s1 + $0x8b0] sm:$0xff]  ;;  %v253_v18 = vld [vmem:[%s2049_s20 + $0x180] sm:$0xff]  ;;  %v252_v23 = vld [vmem:[%s2049_s20 + $0x178] sm:$0xff] }
  0x71   : > { %v1590_v24 = vpack.c.bf16 %v546_v17, %v544_v16  ;;  %v256_v25 = vld [vmem:[%s2049_s20 + $0x198] sm:$0xff]  ;;  %v550_v27 = vld [vmem:[%s2784_s1 + $0x8d0] sm:$0xff] }
  0x72   : > { %1419 = vmatpush1.bf16.msra.mxu1 %v1418_v36  ;;  %v531_v36 = vld [vmem:[%s2784_s1 + $0x838] sm:$0xff]  ;;  %v267_v45 = vld [vmem:[%s2049_s20 + $0x1f0] sm:$0xff] }
  0x73   : > { %1547 = vmatpush1.bf16.msra.mxu0 %v1546_v37  ;;  %1421 = vmatprep.subr.bf16.mxu1 %v1420_v38  ;;  %v207_v37 = vld [vmem:[%s2049_s20 + $0x10] sm:$0xff]  ;;  %v1570_v38 = vpack.c.bf16 %v526_v34, %v524_v33  ;;  %v1572_v43 = vpack.c.bf16 %v531_v36, %v529_v35  ;;  %v261_v33 = vld [vmem:[%s2049_s20 + $0x1c0] sm:$0xff] }
  0x74   : > { %1549 = vmatprep.subr.bf16.mxu0 %v1548_v42  ;;  %v217_v42 = vld [vmem:[%s2049_s20 + $0x60] sm:$0xff]  ;;  %v231_v46 = vld [vmem:[%s2049_s20 + $0xd0] sm:$0xff] }
  0x75   : > { %v265_v35 = vld [vmem:[%s2049_s20 + $0x1e0] sm:$0xff] }
  0x76   : > { %1423 = vmatpush1.bf16.msra.mxu1 %v1422_v48  ;;  %v1574_v48 = vpack.c.bf16 %v530_v41, %v528_v40  ;;  %v1722_v40 = vmov 0.0   ;;  %v249_v41 = vld [vmem:[%s2049_s20 + $0x160] sm:$0xff] }
  0x77   : > { %1551 = vmatpush1.bf16.msra.mxu0 %v1550_v49  ;;  %1425 = vmatprep.subr.bf16.mxu1 %v1424_v50  ;;  %v220_v49 = vld [vmem:[%s2049_s20 + $0x78] sm:$0xff]  ;;  %v532_v50 = vld [vmem:[%s2784_s1 + $0x840] sm:$0xff] }
  0x78   : > { %1553 = vmatprep.subr.bf16.mxu0 %v1552_v54  ;;  %v230_v54 = vld [vmem:[%s2049_s20 + $0xc8] sm:$0xff]  ;;  %v1578_v58 = vpack.c.bf16 %v534_v51, %v532_v50 }
  0x7a   : > { %1427 = vmatpush1.bf16.msra.mxu1 %v1426_v60  ;;  %v536_v60 = vld [vmem:[%s2784_s1 + $0x860] sm:$0xff] }
  0x7b   : > { %1555 = vmatpush1.bf16.msra.mxu0 %v1554_v61  ;;  %1429 = vmatprep.subr.bf16.mxu1 %v1428_v62  ;;  %v538_v61 = vld [vmem:[%s2784_s1 + $0x870] sm:$0xff] }
  0x7c   : > { %1557 = vmatprep.subr.bf16.mxu0 %v1556_v2  ;;  %v235_v62 = vld [vmem:[%s2049_s20 + $0xf0] sm:$0xff]  ;;  %v543_v2 = vld [vmem:[%s2784_s1 + $0x898] sm:$0xff]  ;;  %v1582_v4 = vpack.c.bf16 %v538_v61, %v536_v60 }
  0x7e   : > { %1431 = vmatpush1.bf16.msra.mxu1 %v1430_v8  ;;  %v244_v8 = vld [vmem:[%s2049_s20 + $0x138] sm:$0xff] }
  0x7f   : > { %1559 = vmatpush1.bf16.msra.mxu0 %v1558_v9  ;;  %1433 = vmatprep.subr.bf16.mxu1 %v1432_v10  ;;  %v1584_v9 = vpack.c.bf16 %v543_v2, %v541_v1  ;;  %v248_v10 = vld [vmem:[%s2049_s20 + $0x158] sm:$0xff] }
  0x80   : > { %1561 = vmatprep.subr.bf16.mxu0 %v1560_v14  ;;  %v1586_v14 = vpack.c.bf16 %v542_v7, %v540_v6 }
  0x82   : > { %1435 = vmatpush1.bf16.msra.mxu1 %v1434_v20  ;;  %v257_v20 = vld [vmem:[%s2049_s20 + $0x1a0] sm:$0xff] }
  0x83   : > { %1563 = vmatpush1.bf16.msra.mxu0 %v1562_v21  ;;  %1437 = vmatprep.subr.bf16.mxu1 %v1436_v22  ;;  %v549_v21 = vld [vmem:[%s2784_s1 + $0x8c8] sm:$0xff]  ;;  %v551_v22 = vld [vmem:[%s2784_s1 + $0x8d8] sm:$0xff] }
  0x84   : > { %1565 = vmatprep.subr.bf16.mxu0 %v1564_v26  ;;  %v548_v26 = vld [vmem:[%s2784_s1 + $0x8c0] sm:$0xff]  ;;  %v1592_v29 = vpack.c.bf16 %v551_v22, %v549_v21 }
  0x85   : > { %v1594_v34 = vpack.c.bf16 %v550_v27, %v548_v26 }
  0x86   : > { %1439 = vmatpush1.bf16.msra.mxu1 %v1438_v30  ;;  %v553_v30 = vld [vmem:[%s2784_s1 + $0x8e8] sm:$0xff] }
  0x87   : > { %1567 = vmatpush1.bf16.msra.mxu0 %v1566_v31  ;;  %1600 = vmatprep.subr.bf16.mxu1 %v1568_v32  ;;  %v555_v31 = vld [vmem:[%s2784_s1 + $0x8f8] sm:$0xff] }
  0x88   : > { %1569 = vmatprep.subr.bf16.mxu0 %v1568_v32  ;;  %v266_v32 = vld [vmem:[%s2049_s20 + $0x1e8] sm:$0xff]  ;;  %v1596_v36 = vpack.c.bf16 %v555_v31, %v553_v30 }
  0x89   : > { %728 = vmatmul.mubr.f32.vlgmr.msra.gmra.mrb[0].mxu1 %v207_v37  ;;  %v552_v37 = vld [vmem:[%s2784_s1 + $0x8e0] sm:$0xff] }
  0x8a   : > { %942 = vmatmul.mubr.f32.vlgmr.msra.gmra.mrb[0].mxu0 %v211_v39  ;;  %1608 = vmatpush1.bf16.msra.mxu1 %v1570_v38 }
  0x8b   : > { %1571 = vmatpush1.bf16.msra.mxu0 %v1570_v38  ;;  %733 = vmatprep.mubr.f32.mxu1 %v217_v42  ;;  %v554_v38 = vld [vmem:[%s2784_s1 + $0x8f0] sm:$0xff]  ;;  %v213_v42 = vld [vmem:[%s2049_s20 + $0x40] sm:$0xff] }
  0x8c   : > { %947 = vmatprep.mubr.f32.mxu0 %v221_v44  ;;  %1573 = vmatprep.subr.bf16.mxu0 %v1572_v43  ;;  %v1598_v39 = vpack.c.bf16 %v554_v38, %v552_v37  ;;  %v222_v44 = vld [vmem:[%s2049_s20 + $0x88] sm:$0xff] }
  0x8d   : > { %734 = vmatmul.mubr.f32.gmra.mrb[2].mxu1 %v216_v47  ;;  %1601 = vmatprep.subr.bf16.mxu1 %v1572_v43  ;;  %v258_v43 = vld [vmem:[%s2049_s20 + $0x1a8] sm:$0xff]  ;;  %v240_v47 = vld [vmem:[%s2049_s20 + $0x118] sm:$0xff] }
  0x8e   : > { %948 = vmatmul.mubr.f32.gmra.mrb[2].mxu0 %v220_v49  ;;  %1609 = vmatpush1.bf16.msra.mxu1 %v1574_v48 }
  0x8f   : > { %1575 = vmatpush1.bf16.msra.mxu0 %v1574_v48  ;;  %739 = vmatprep.mubr.f32.mxu1 %v226_v52 }
  0x90   : > { %953 = vmatprep.mubr.f32.mxu0 %v230_v54  ;;  %1577 = vmatprep.subr.bf16.mxu0 %v1576_v53 }
  0x91   : > { %740 = vmatmul.mubr.f32.gmra.mrb[4].mxu1 %v225_v57  ;;  %1602 = vmatprep.subr.bf16.mxu1 %v1576_v53 }
  0x92   : > { %954 = vmatmul.mubr.f32.gmra.mrb[4].mxu0 %v229_v59  ;;  %1610 = vmatpush1.bf16.msra.mxu1 %v1578_v58 }
  0x93   : > { %1579 = vmatpush1.bf16.msra.mxu0 %v1578_v58  ;;  %745 = vmatprep.mubr.f32.mxu1 %v235_v62 }
  0x94   : > { %959 = vmatprep.mubr.f32.mxu0 %v239_v0  ;;  %1581 = vmatprep.subr.bf16.mxu0 %v1580_v63 }
  0x95   : > { %746 = vmatmul.mubr.f32.gmra.mrb[6].mxu1 %v234_v3  ;;  %1603 = vmatprep.subr.bf16.mxu1 %v1580_v63 }
  0x96   : > { %960 = vmatmul.mubr.f32.gmra.mrb[6].mxu0 %v238_v5  ;;  %1611 = vmatpush1.bf16.msra.mxu1 %v1582_v4 }
  0x97   : > { %1583 = vmatpush1.bf16.msra.mxu0 %v1582_v4  ;;  %751 = vmatprep.mubr.f32.mxu1 %v244_v8 }
  0x98   : > { %965 = vmatprep.mubr.f32.mxu0 %v248_v10  ;;  %1585 = vmatprep.subr.bf16.mxu0 %v1584_v9 }
  0x99   : > { %752 = vmatmul.mubr.f32.gmra.mrb[8].mxu1 %v243_v13  ;;  %1604 = vmatprep.subr.bf16.mxu1 %v1584_v9 }
  0x9a   : > { %966 = vmatmul.mubr.f32.gmra.mrb[8].mxu0 %v247_v15  ;;  %1612 = vmatpush1.bf16.msra.mxu1 %v1586_v14 }
  0x9b   : > { %1587 = vmatpush1.bf16.msra.mxu0 %v1586_v14  ;;  %757 = vmatprep.mubr.f32.mxu1 %v253_v18 }
  0x9c   : > { %971 = vmatprep.mubr.f32.mxu0 %v257_v20  ;;  %1589 = vmatprep.subr.bf16.mxu0 %v1588_v19 }
  0x9d   : > { %758 = vmatmul.mubr.f32.gmra.mrb[10].mxu1 %v252_v23  ;;  %1605 = vmatprep.subr.bf16.mxu1 %v1588_v19 }
  0x9e   : > { %972 = vmatmul.mubr.f32.gmra.mrb[10].mxu0 %v256_v25  ;;  %1613 = vmatpush1.bf16.msra.mxu1 %v1590_v24 }
  0x9f   : > { %1591 = vmatpush1.bf16.msra.mxu0 %v1590_v24  ;;  %763 = vmatprep.mubr.f32.mxu1 %v262_v28 }
  0xa0   : > { %977 = vmatprep.mubr.f32.mxu0 %v266_v32  ;;  %1593 = vmatprep.subr.bf16.mxu0 %v1592_v29 }
  0xa1   : > { %764 = vmatmul.mubr.f32.gmra.mrb[12].mxu1 %v261_v33  ;;  %1606 = vmatprep.subr.bf16.mxu1 %v1592_v29 }
  0xa2   : > { %978 = vmatmul.mubr.f32.gmra.mrb[12].mxu0 %v265_v35  ;;  %1614 = vmatpush1.bf16.msra.mxu1 %v1594_v34 }
  0xa3   : > { %1595 = vmatpush1.bf16.msra.mxu0 %v1594_v34  ;;  %1607 = vmatprep.subr.bf16.mxu1 %v1596_v36 }
  0xa4   : > { %1597 = vmatprep.subr.bf16.mxu0 %v1596_v36  ;;  %1048 = vmatprep.mubr.f32.mxu0 %v1722_v40 }
  0xa5   : > { %1072 = vmatprep.mubr.f32.mxu1 %v1722_v40 }
  0xa6   : > { %1615 = vmatpush1.bf16.msra.mxu1 %v1598_v39 }
  0xa7   : > { %1599 = vmatpush1.bf16.msra.mxu0 %v1598_v39 }
  0xa9   : > { %1073 = vmatmul.mubr.f32.vlgmr.msra.gmra.mrb[14].mxu1 %v249_v41 }
  0xaa   : > { %1049 = vmatmul.mubr.f32.vlgmr.msra.gmra.mrb[0].mxu0 %v213_v42  ;;  %1078 = vmatprep.mubr.f32.mxu1 %v1722_v40 }
  0xab   : > { %1054 = vmatprep.mubr.f32.mxu0 %v1722_v40 }
  0xad   : > { %1079 = vmatmul.mubr.f32.gmra.mrb[16].mxu1 %v258_v43 }
  0xae   : > { %1055 = vmatmul.mubr.f32.gmra.mrb[2].mxu0 %v222_v44  ;;  %1084 = vmatprep.mubr.f32.mxu1 %v1722_v40 }
  0xaf   : > { %1060 = vmatprep.mubr.f32.mxu0 %v1722_v40 }
  0xb1   : > { %1085 = vmatmul.mubr.f32.gmra.mrb[18].mxu1 %v267_v45 }
  0xb2   : > { %1061 = vmatmul.mubr.f32.gmra.mrb[4].mxu0 %v231_v46 }
  0xb3   : > { %1066 = vmatprep.mubr.f32.mxu0 %v1722_v40 }
  0xb6   : > { %1067 = vmatmul.mubr.f32.gmra.mrb[6].mxu0 %v240_v47 }
 0x15c   : > { %v729_v48 = vpop.f32.mrb[0].mxu1 }
 0x15d   : > { %v731_v49 = vpop.f32.mrb[1].mxu1 }
 0x160   : > { %v735_v50 = vpop.f32.mrb[2].mxu1 }
 0x161   : > { %v737_v51 = vpop.f32.mrb[3].mxu1 }
 0x164   : > { %v741_v52 = vpop.f32.mrb[4].mxu1 }
 0x165   : > { %v743_v53 = vpop.f32.mrb[5].mxu1 }
 0x168   : > { %v747_v54 = vpop.f32.mrb[6].mxu1 }
 0x169   : > { %v749_v55 = vpop.f32.mrb[7].mxu1 }
 0x16c   : > { %v753_v56 = vpop.f32.mrb[8].mxu1 }
 0x16d   : > { %v967_v57 = vpop.f32.mrb[8].mxu0  ;;  %v755_v58 = vpop.f32.mrb[9].mxu1 }
 0x16e   : > { %v1624_v59 = vadd.f32 %v967_v57, %v753_v56  ;;  %v969_v60 = vpop.f32.mrb[9].mxu0 }
 0x16f   : > { %v1626_v61 = vadd.f32 %v969_v60, %v755_v58 }
 0x170   : > { %v759_v62 = vpop.f32.mrb[10].mxu1 }
 0x171   : > { %v973_v63 = vpop.f32.mrb[10].mxu0  ;;  %v761_v0 = vpop.f32.mrb[11].mxu1 }
 0x172   : > { %v1628_v1 = vadd.f32 %v973_v63, %v759_v62  ;;  %v975_v2 = vpop.f32.mrb[11].mxu0 }
 0x173   : > { %v1630_v3 = vadd.f32 %v975_v2, %v761_v0 }
 0x174   : > { %v765_v4 = vpop.f32.mrb[12].mxu1 }
 0x175   : > { %v979_v5 = vpop.f32.mrb[12].mxu0  ;;  %v767_v6 = vpop.f32.mrb[13].mxu1 }
 0x176   : > { %v1632_v7 = vadd.f32 %v979_v5, %v765_v4  ;;  %v981_v8 = vpop.f32.mrb[13].mxu0 }
 0x177   : > { %v1634_v9 = vadd.f32 %v981_v8, %v767_v6 }
 0x17c   : > { %v1074_v10 = vpop.f32.mrb[14].mxu1 }
 0x17d   : > { %v1050_v11 = vpop.f32.mrb[0].mxu0  ;;  %v2702_v12 = vadd.f32 %v1624_v59, %v1074_v10  ;;  %v1076_v13 = vpop.f32.mrb[15].mxu1 }
 0x17e   : > { %v1616_v14 = vadd.f32 %v1050_v11, %v729_v48  ;;  %v1052_v15 = vpop.f32.mrb[1].mxu0  ;;  %v2704_v16 = vadd.f32 %v1626_v61, %v1076_v13 }
 0x17f   : > { %v1617_v17 = vadd.f32 %v1052_v15, %v731_v49  ;;  %1103 = vst [vmem:[#allocation2 + $0x40] sm:$0xff] (!%p1305_p5), %v2702_v12 }
 0x180   : > { %v1080_v18 = vpop.f32.mrb[16].mxu1  ;;  %1095 = vst [vmem:[#allocation2] sm:$0xff] (!%p1305_p5), %v1616_v14  ;;  %1104 = vst [vmem:[#allocation2 + $0x48] sm:$0xff] (!%p1305_p5), %v2704_v16 }
 0x181   : > { %v1056_v19 = vpop.f32.mrb[2].mxu0  ;;  %v2706_v20 = vadd.f32 %v1628_v1, %v1080_v18  ;;  %v1082_v21 = vpop.f32.mrb[17].mxu1  ;;  %1096 = vst [vmem:[#allocation2 + $0x8] sm:$0xff] (!%p1305_p5), %v1617_v17 }
 0x182   : > { %v1618_v22 = vadd.f32 %v1056_v19, %v735_v50  ;;  %v1058_v23 = vpop.f32.mrb[3].mxu0  ;;  %v2708_v24 = vadd.f32 %v1630_v3, %v1082_v21 }
 0x183   : > { %v1619_v25 = vadd.f32 %v1058_v23, %v737_v51  ;;  %1105 = vst [vmem:[#allocation2 + $0x50] sm:$0xff] (!%p1305_p5), %v2706_v20 }
 0x184   : > { %v1086_v26 = vpop.f32.mrb[18].mxu1  ;;  %1097 = vst [vmem:[#allocation2 + $0x10] sm:$0xff] (!%p1305_p5), %v1618_v22  ;;  %1106 = vst [vmem:[#allocation2 + $0x58] sm:$0xff] (!%p1305_p5), %v2708_v24 }
 0x185   : > { %v1062_v27 = vpop.f32.mrb[4].mxu0  ;;  %v2710_v28 = vadd.f32 %v1632_v7, %v1086_v26  ;;  %v1088_v29 = vpop.f32.mrb[19].mxu1  ;;  %1094 = sbr.rel (%p1305_p5) target bundleno = 398 (0x18e), region = 36  ;;  %1098 = vst [vmem:[#allocation2 + $0x18] sm:$0xff] (!%p1305_p5), %v1619_v25 }
 0x186   : > { %v1620_v30 = vadd.f32 %v1062_v27, %v741_v52  ;;  %v1064_v31 = vpop.f32.mrb[5].mxu0  ;;  %v2712_v32 = vadd.f32 %v1634_v9, %v1088_v29 }
 0x187   : > { %v1621_v33 = vadd.f32 %v1064_v31, %v743_v53  ;;  %1107 = vst [vmem:[#allocation2 + $0x60] sm:$0xff] (!%p1305_p5), %v2710_v28 }
 0x188   : > { %1099 = vst [vmem:[#allocation2 + $0x20] sm:$0xff] (!%p1305_p5), %v1620_v30  ;;  %1108 = vst [vmem:[#allocation2 + $0x68] sm:$0xff] (!%p1305_p5), %v2712_v32 }
 0x189   : > { %v1068_v34 = vpop.f32.mrb[6].mxu0  ;;  %1100 = vst [vmem:[#allocation2 + $0x28] sm:$0xff] (!%p1305_p5), %v1621_v33 }
 0x18a   : > { %v1622_v35 = vadd.f32 %v1068_v34, %v747_v54  ;;  %v1070_v36 = vpop.f32.mrb[7].mxu0 }
 0x18b   : > { %v1623_v37 = vadd.f32 %v1070_v36, %v749_v55 }
 0x18c   : > { %1101 = vst [vmem:[#allocation2 + $0x30] sm:$0xff] %v1622_v35 }
 0x18d   : > { %1102 = vst [vmem:[#allocation2 + $0x38] sm:$0xff] %v1623_v37 }
 0x18e PF: > { %p1306_p6 = scmp.le.s32.totalorder %s1712_s12, 0 }
 0x18f   : > { %v1113_v38 = vld [vmem:[#allocation2] sm:$0xff] (!%p1306_p6)  ;;  %v1114_v39 = vld [vmem:[#allocation2 + $0x8] sm:$0xff] (!%p1306_p6)  ;;  %v1115_v40 = vld [vmem:[#allocation2 + $0x10] sm:$0xff] (!%p1306_p6) }
 0x190   : > { %1112 = sbr.rel (%p1306_p6) target bundleno = 409 (0x199), region = 40  ;;  %v1127_v41 = vmax.f32 (!%p1306_p6), %v1113_v38, %v1616_v14  ;;  %v1128_v42 = vmax.f32 (!%p1306_p6), %v1114_v39, %v1617_v17  ;;  %v1129_v43 = vmax.f32 (!%p1306_p6), %v1115_v40, %v1618_v22  ;;  %v1116_v44 = vld [vmem:[#allocation2 + $0x18] sm:$0xff] (!%p1306_p6)  ;;  %v1121_v52 = vld [vmem:[#allocation2 + $0x40] sm:$0xff] (!%p1306_p6)  ;;  %v1122_v56 = vld [vmem:[#allocation2 + $0x48] sm:$0xff] (!%p1306_p6) }
 0x191   : > { %v1117_v45 = vld [vmem:[#allocation2 + $0x20] sm:$0xff] (!%p1306_p6)  ;;  %v1130_v47 = vmax.f32 (!%p1306_p6), %v1116_v44, %v1619_v25  ;;  %v1135_v55 = vmax.f32 (!%p1306_p6), %v1121_v52, %v2702_v12  ;;  %v1123_v57 = vld [vmem:[#allocation2 + $0x50] sm:$0xff] (!%p1306_p6)  ;;  %v1124_v58 = vld [vmem:[#allocation2 + $0x58] sm:$0xff] (!%p1306_p6)  ;;  %v1136_v59 = vmax.f32 (!%p1306_p6), %v1122_v56, %v2704_v16 }
 0x192   : > { %v1118_v46 = vld [vmem:[#allocation2 + $0x28] sm:$0xff] (!%p1306_p6)  ;;  %v1131_v48 = vmax.f32 (!%p1306_p6), %v1117_v45, %v1620_v30  ;;  %1141 = vst [vmem:[#allocation2] sm:$0xff] (!%p1306_p6), %v1127_v41  ;;  %1142 = vst [vmem:[#allocation2 + $0x8] sm:$0xff] (!%p1306_p6), %v1128_v42  ;;  %v1137_v60 = vmax.f32 (!%p1306_p6), %v1123_v57, %v2706_v20  ;;  %v1138_v61 = vmax.f32 (!%p1306_p6), %v1124_v58, %v2708_v24  ;;  %v1125_v62 = vld [vmem:[#allocation2 + $0x60] sm:$0xff] (!%p1306_p6) }
 0x193   : > { %v1132_v49 = vmax.f32 (!%p1306_p6), %v1118_v46, %v1621_v33  ;;  %1143 = vst [vmem:[#allocation2 + $0x10] sm:$0xff] (!%p1306_p6), %v1129_v43  ;;  %1144 = vst [vmem:[#allocation2 + $0x18] sm:$0xff] (!%p1306_p6), %v1130_v47  ;;  %v1126_v63 = vld [vmem:[#allocation2 + $0x68] sm:$0xff] (!%p1306_p6)  ;;  %v1139_v0 = vmax.f32 (!%p1306_p6), %v1125_v62, %v2710_v28 }
 0x194   : > { %v1120_v51 = vld [vmem:[#allocation2 + $0x38] sm:$0xff] (!%p1306_p6)  ;;  %1145 = vst [vmem:[#allocation2 + $0x20] sm:$0xff] (!%p1306_p6), %v1131_v48  ;;  %1149 = vst [vmem:[#allocation2 + $0x40] sm:$0xff] (!%p1306_p6), %v1135_v55  ;;  %v1140_v1 = vmax.f32 (!%p1306_p6), %v1126_v63, %v2712_v32 }
 0x195   : > { %v1119_v50 = vld [vmem:[#allocation2 + $0x30] sm:$0xff] (!%p1306_p6)  ;;  %v1134_v54 = vmax.f32 (!%p1306_p6), %v1120_v51, %v1623_v37  ;;  %1146 = vst [vmem:[#allocation2 + $0x28] sm:$0xff] (!%p1306_p6), %v1132_v49  ;;  %1150 = vst [vmem:[#allocation2 + $0x48] sm:$0xff] (!%p1306_p6), %v1136_v59 }
 0x196   : > { %v1133_v53 = vmax.f32 (!%p1306_p6), %v1119_v50, %v1622_v35  ;;  %1151 = vst [vmem:[#allocation2 + $0x50] sm:$0xff] (!%p1306_p6), %v1137_v60  ;;  %1152 = vst [vmem:[#allocation2 + $0x58] sm:$0xff] (!%p1306_p6), %v1138_v61 }
 0x197   : > { %1148 = vst [vmem:[#allocation2 + $0x38] sm:$0xff] %v1134_v54  ;;  %1153 = vst [vmem:[#allocation2 + $0x60] sm:$0xff] %v1139_v0 }
 0x198   : > { %1147 = vst [vmem:[#allocation2 + $0x30] sm:$0xff] %v1133_v53  ;;  %1154 = vst [vmem:[#allocation2 + $0x68] sm:$0xff] %v1140_v1 }
 0x199 PF: > { %p1307_p7 = scmp.ne.s32.totalorder %s1712_s12, 3 }
 0x19a   : > { %v1175_v2 = vlaneseq (!%p1307_p7)  ;;  %v1173_v4 = vld [vmem:[%s2785_s2] sm:$0x3] (!%p1307_p7) }
 0x19b   : > { %1158 = sbr.rel (%p1307_p7) target bundleno = 429 (0x1ad), region = 44  ;;  %v1159_v5 = vld [vmem:[#allocation2] sm:$0xff] (!%p1307_p7)  ;;  %v1160_v7 = vld [vmem:[#allocation2 + $0x8] sm:$0xff] (!%p1307_p7) }
 0x19c   : > { %v1176_v3 = vshrl.u32 (!%p1307_p7), %v1175_v2, 7  ;;  %v1161_v9 = vld [vmem:[#allocation2 + $0x10] sm:$0xff] (!%p1307_p7)  ;;  %v1162_v10 = vld [vmem:[#allocation2 + $0x18] sm:$0xff] (!%p1307_p7) }
 0x19d   : > { %v1163_v11 = vld [vmem:[#allocation2 + $0x20] sm:$0xff] (!%p1307_p7) }
 0x19e   : > { %v1177_v6 = vsub.s32 (!%p1307_p7), 0, %v1176_v3  ;;  %v1181_v8 = vsub.s32 (!%p1307_p7), 1, %v1176_v3  ;;  %v1164_v14 = vld [vmem:[#allocation2 + $0x28] sm:$0xff] (!%p1307_p7)  ;;  %v1167_v21 = vld [vmem:[#allocation2 + $0x40] sm:$0xff] (!%p1307_p7) }
 0x19f   : > { %v1165_v15 = vld [vmem:[#allocation2 + $0x30] sm:$0xff] (!%p1307_p7)  ;;  %v1168_v26 = vld [vmem:[#allocation2 + $0x48] sm:$0xff] (!%p1307_p7)  ;;  %v1170_v28 = vld [vmem:[#allocation2 + $0x58] sm:$0xff] (!%p1307_p7) }
 0x1a0   : > { %v1178_v12 = vrot.slane (!%p1307_p7), %v1173_v4, %v1177_v6  ;;  %v1182_v13 = vrot.slane (!%p1307_p7), %v1173_v4, %v1181_v8  ;;  %v1166_v16 = vld [vmem:[#allocation2 + $0x38] sm:$0xff] (!%p1307_p7)  ;;  %v1169_v27 = vld [vmem:[#allocation2 + $0x50] sm:$0xff] (!%p1307_p7)  ;;  %v1171_v33 = vld [vmem:[#allocation2 + $0x60] sm:$0xff] (!%p1307_p7) }
 0x1a1   : > { %v1172_v34 = vld [vmem:[#allocation2 + $0x68] sm:$0xff] (!%p1307_p7) }
 0x1a2   : > { %v1185_v17 = vadd.f32 %v1178_v12, %v1159_v5  ;;  %v1186_v18 = vadd.f32 %v1182_v13, %v1160_v7  ;;  %v1187_v19 = vadd.f32 %v1178_v12, %v1161_v9  ;;  %v1188_v20 = vadd.f32 %v1182_v13, %v1162_v10 }
 0x1a3   : > { %v1189_v22 = vadd.f32 %v1178_v12, %v1163_v11  ;;  %v1190_v23 = vadd.f32 %v1182_v13, %v1164_v14  ;;  %v1191_v24 = vadd.f32 %v1178_v12, %v1165_v15  ;;  %v1192_v25 = vadd.f32 %v1182_v13, %v1166_v16 }
 0x1a4   : > { %v1199_v29 = vmax.f32 %v1185_v17, 0.0  ;;  %v1200_v30 = vmax.f32 %v1186_v18, 0.0  ;;  %v1201_v31 = vmax.f32 %v1187_v19, 0.0  ;;  %v1202_v32 = vmax.f32 %v1188_v20, 0.0 }
 0x1a5   : > { %v1203_v35 = vmax.f32 %v1189_v22, 0.0  ;;  %v1204_v36 = vmax.f32 %v1190_v23, 0.0  ;;  %v1205_v37 = vmax.f32 %v1191_v24, 0.0  ;;  %v1206_v38 = vmax.f32 %v1192_v25, 0.0 }
 0x1a6   : > { %1213 = vst [vmem:[%s2786_s3] sm:$0xff] %v1199_v29  ;;  %1214 = vst [vmem:[%s2786_s3 + $0x8] sm:$0xff] %v1200_v30  ;;  %v1193_v39 = vadd.f32 %v1178_v12, %v1167_v21  ;;  %v1194_v40 = vadd.f32 %v1182_v13, %v1168_v26  ;;  %v1195_v41 = vadd.f32 %v1178_v12, %v1169_v27 }
 0x1a7   : > { %1215 = vst [vmem:[%s2786_s3 + $0x10] sm:$0xff] %v1201_v31  ;;  %1216 = vst [vmem:[%s2786_s3 + $0x18] sm:$0xff] %v1202_v32  ;;  %v1196_v42 = vadd.f32 %v1182_v13, %v1170_v28  ;;  %v1197_v43 = vadd.f32 %v1178_v12, %v1171_v33  ;;  %v1198_v44 = vadd.f32 %v1182_v13, %v1172_v34 }
 0x1a8   : > { %1217 = vst [vmem:[%s2786_s3 + $0x20] sm:$0xff] %v1203_v35  ;;  %1218 = vst [vmem:[%s2786_s3 + $0x28] sm:$0xff] %v1204_v36  ;;  %v1207_v45 = vmax.f32 %v1193_v39, 0.0  ;;  %v1208_v46 = vmax.f32 %v1194_v40, 0.0  ;;  %v1209_v47 = vmax.f32 %v1195_v41, 0.0 }
 0x1a9   : > { %1219 = vst [vmem:[%s2786_s3 + $0x30] sm:$0xff] %v1205_v37  ;;  %1220 = vst [vmem:[%s2786_s3 + $0x38] sm:$0xff] %v1206_v38  ;;  %v1210_v48 = vmax.f32 %v1196_v42, 0.0  ;;  %v1211_v49 = vmax.f32 %v1197_v43, 0.0  ;;  %v1212_v50 = vmax.f32 %v1198_v44, 0.0 }
 0x1aa   : > { %1221 = vst [vmem:[%s2786_s3 + $0x40] sm:$0xff] %v1207_v45  ;;  %1222 = vst [vmem:[%s2786_s3 + $0x48] sm:$0xff] %v1208_v46 }
 0x1ab   : > { %1223 = vst [vmem:[%s2786_s3 + $0x50] sm:$0xff] %v1209_v47  ;;  %1224 = vst [vmem:[%s2786_s3 + $0x58] sm:$0xff] %v1210_v48 }
 0x1ac   : > { %1225 = vst [vmem:[%s2786_s3 + $0x60] sm:$0xff] %v1211_v49  ;;  %1226 = vst [vmem:[%s2786_s3 + $0x68] sm:$0xff] %v1212_v50 }
 0x1ad PF: > { %s13_s14 = sadd.s32 1, %s1720_s14   ;;  %s2787_s12 = smov %s1716_s13 }
 0x1ae   : > { %p10_p8 = scmp.ge.s32.totalorder %s13_s14, 6   ;;  %s2788_s13 = smov %s2790_s15 }
 0x1b0   :  { %12 = sbr.rel (!%p10_p8) target bundleno = 2 (0x2), region = 74 }

// kernel: _lambda_.7
= control target key start
LH: loop header
LB: loop body
LE: loop exit
PB: predicated region body
PF: predicated region fallthrough
CT: control target
= control target key end

     0   :  { %v370_v0 = vmov 0.0|0.0   ;;  %vm371_vm0 = vmmov 0   ;;  %v372_v4 = vmov 0.0   ;;  %s527_s1 = inlined_call_operand.vmem [shape: f32[128,128], index: 1, kind: input, shape index: {}]   ;;  %s528_s3 = inlined_call_operand.vmem [shape: f32[128,128], index: 3, kind: input, shape index: {}]   ;;  %s529_s0 = inlined_call_operand.vmem [shape: f32[8,128], index: 0, kind: input, shape index: {}]   ;;  %s530_s2 = inlined_call_operand.vmem [shape: f32[1,128], index: 2, kind: input, shape index: {}]   ;;  %s531_s4 = inlined_call_operand.vmem [shape: f32[1,128], index: 4, kind: input, shape index: {}]   ;;  %s532_s5 = inlined_call_operand.vmem [shape: f32[8,128], index: 5, kind: output, shape index: {}]  }
   0x1   :  { %319 = vmatprep.subr.bf16.mxu0 %v370_v0  ;;  %v21_v1 = vld [vmem:[%s527_s1] sm:$0xff]  ;;  %v22_v2 = vld [vmem:[%s527_s1 + $0x8] sm:$0xff]  ;;  %v23_v3 = vld [vmem:[%s527_s1 + $0x10] sm:$0xff]  ;;  %281 = vmatprep.mubr.msk.f32.mxu0 %vm371_vm0, %v372_v4 }
   0x2   :  { %v320_v5 = vpack.c.bf16 %v22_v2, %v21_v1  ;;  %v24_v6 = vld [vmem:[%s527_s1 + $0x18] sm:$0xff]  ;;  %343 = vmatprep.subr.bf16.mxu1 %v370_v0  ;;  %316 = vmatprep.mubr.msk.f32.mxu1 %vm371_vm0, %v372_v4  ;;  %v25_v8 = vld [vmem:[%s527_s1 + $0x20] sm:$0xff]  ;;  %v26_v9 = vld [vmem:[%s527_s1 + $0x28] sm:$0xff] }
   0x3   :  { %v323_v7 = vpack.c.bf16 %v24_v6, %v23_v3  ;;  %v115_v10 = vld [vmem:[%s528_s3] sm:$0xff]  ;;  %v116_v11 = vld [vmem:[%s528_s3 + $0x8] sm:$0xff]  ;;  %v117_v12 = vld [vmem:[%s528_s3 + $0x10] sm:$0xff]  ;;  %v326_v14 = vpack.c.bf16 %v26_v9, %v25_v8 }
   0x4   :  { %321 = vmatpush3.bf16.msra.mxu0 %v320_v5  ;;  %v118_v13 = vld [vmem:[%s528_s3 + $0x18] sm:$0xff]  ;;  %v344_v15 = vpack.c.bf16 %v116_v11, %v115_v10  ;;  %v27_v16 = vld [vmem:[%s527_s1 + $0x30] sm:$0xff]  ;;  %v119_v19 = vld [vmem:[%s528_s3 + $0x20] sm:$0xff] }
   0x5   :  { %322 = vmatprep.subr.bf16.mxu0 %v370_v0  ;;  %v28_v17 = vld [vmem:[%s527_s1 + $0x38] sm:$0xff]  ;;  %v347_v18 = vpack.c.bf16 %v118_v13, %v117_v12  ;;  %v120_v20 = vld [vmem:[%s528_s3 + $0x28] sm:$0xff]  ;;  %v29_v22 = vld [vmem:[%s527_s1 + $0x40] sm:$0xff] }
   0x6   :  { %345 = vmatpush3.bf16.msra.mxu1 %v344_v15  ;;  %v329_v21 = vpack.c.bf16 %v28_v17, %v27_v16  ;;  %v30_v23 = vld [vmem:[%s527_s1 + $0x48] sm:$0xff]  ;;  %v350_v24 = vpack.c.bf16 %v120_v20, %v119_v19  ;;  %v121_v25 = vld [vmem:[%s528_s3 + $0x30] sm:$0xff]  ;;  %v122_v26 = vld [vmem:[%s528_s3 + $0x38] sm:$0xff] }
   0x7   :  { %346 = vmatprep.subr.bf16.mxu1 %v370_v0  ;;  %v332_v27 = vpack.c.bf16 %v30_v23, %v29_v22  ;;  %v31_v28 = vld [vmem:[%s527_s1 + $0x50] sm:$0xff]  ;;  %v32_v29 = vld [vmem:[%s527_s1 + $0x58] sm:$0xff]  ;;  %v353_v30 = vpack.c.bf16 %v122_v26, %v121_v25  ;;  %v123_v31 = vld [vmem:[%s528_s3 + $0x40] sm:$0xff] }
   0x8   :  { %324 = vmatpush3.bf16.msra.mxu0 %v323_v7  ;;  %v124_v32 = vld [vmem:[%s528_s3 + $0x48] sm:$0xff]  ;;  %v335_v33 = vpack.c.bf16 %v32_v29, %v31_v28  ;;  %v33_v34 = vld [vmem:[%s527_s1 + $0x60] sm:$0xff]  ;;  %v125_v37 = vld [vmem:[%s528_s3 + $0x50] sm:$0xff] }
   0x9   :  { %325 = vmatprep.subr.bf16.mxu0 %v370_v0  ;;  %v34_v35 = vld [vmem:[%s527_s1 + $0x68] sm:$0xff]  ;;  %v356_v36 = vpack.c.bf16 %v124_v32, %v123_v31  ;;  %v126_v38 = vld [vmem:[%s528_s3 + $0x58] sm:$0xff]  ;;  %v35_v40 = vld [vmem:[%s527_s1 + $0x70] sm:$0xff] }
   0xa   :  { %348 = vmatpush3.bf16.msra.mxu1 %v347_v18  ;;  %v338_v39 = vpack.c.bf16 %v34_v35, %v33_v34  ;;  %v36_v41 = vld [vmem:[%s527_s1 + $0x78] sm:$0xff]  ;;  %v359_v42 = vpack.c.bf16 %v126_v38, %v125_v37  ;;  %v127_v43 = vld [vmem:[%s528_s3 + $0x60] sm:$0xff]  ;;  %v128_v44 = vld [vmem:[%s528_s3 + $0x68] sm:$0xff] }
   0xb   :  { %349 = vmatprep.subr.bf16.mxu1 %v370_v0  ;;  %v341_v45 = vpack.c.bf16 %v36_v41, %v35_v40  ;;  %v362_v46 = vpack.c.bf16 %v128_v44, %v127_v43  ;;  %v20_v47 = vld [vmem:[%s529_s0] sm:$0xff]  ;;  %v129_v48 = vld [vmem:[%s528_s3 + $0x70] sm:$0xff]  ;;  %v130_v49 = vld [vmem:[%s528_s3 + $0x78] sm:$0xff] }
   0xc   :  { %327 = vmatpush3.bf16.msra.mxu0 %v326_v14  ;;  %v365_v50 = vpack.c.bf16 %v130_v49, %v129_v48  ;;  %v213_v51 = vld [vmem:[%s530_s2] ss:$0 sm:$0xff] }
   0xd   :  { %328 = vmatprep.subr.bf16.mxu0 %v370_v0  ;;  %v214_v56 = vld [vmem:[%s531_s4] ss:$0 sm:$0xff] }
   0xe   :  { %351 = vmatpush3.bf16.msra.mxu1 %v350_v24 }
   0xf   :  { %352 = vmatprep.subr.bf16.mxu1 %v370_v0 }
  0x10   :  { %330 = vmatpush3.bf16.msra.mxu0 %v329_v21 }
  0x11   :  { %331 = vmatprep.subr.bf16.mxu0 %v370_v0 }
  0x12   :  { %354 = vmatpush3.bf16.msra.mxu1 %v353_v30 }
  0x13   :  { %355 = vmatprep.subr.bf16.mxu1 %v370_v0 }
  0x14   :  { %333 = vmatpush3.bf16.msra.mxu0 %v332_v27 }
  0x15   :  { %334 = vmatprep.subr.bf16.mxu0 %v370_v0 }
  0x16   :  { %357 = vmatpush3.bf16.msra.mxu1 %v356_v36 }
  0x17   :  { %358 = vmatprep.subr.bf16.mxu1 %v370_v0 }
  0x18   :  { %336 = vmatpush3.bf16.msra.mxu0 %v335_v33 }
  0x19   :  { %337 = vmatprep.subr.bf16.mxu0 %v370_v0 }
  0x1a   :  { %360 = vmatpush3.bf16.msra.mxu1 %v359_v42 }
  0x1b   :  { %361 = vmatprep.subr.bf16.mxu1 %v370_v0 }
  0x1c   :  { %339 = vmatpush3.bf16.msra.mxu0 %v338_v39 }
  0x1d   :  { %340 = vmatprep.subr.bf16.mxu0 %v370_v0 }
  0x1e   :  { %363 = vmatpush3.bf16.msra.mxu1 %v362_v46 }
  0x1f   :  { %364 = vmatprep.subr.bf16.mxu1 %v370_v0 }
  0x20   :  { %342 = vmatpush3.bf16.msra.mxu0 %v341_v45 }
  0x22   :  { %366 = vmatpush3.bf16.msra.mxu1 %v365_v50 }
  0x23   :  { %282 = vmatmul.mubr.f32.vlgmr.msra.gmra.mrb[0].mxu0 %v20_v47 }
  0xf6   :  { %v110_v52 = vpop.f32.mrb[0].mxu0 }
  0xf7   :  { %v111_v53 = vadd.f32 %v213_v51, %v110_v52  ;;  %v283_v54 = vpop.f32.mrb[1].mxu0 }
  0xf9   :  { %v114_v55 = vmax.f32 %v111_v53, 0.0 }
  0xfb   :  { %317 = vmatmul.mubr.f32.vlgmr.msra.gmra.mrb[0].mxu1 %v114_v55 }
 0x1ce   :  { %v204_v57 = vpop.f32.mrb[0].mxu1 }
 0x1cf   :  { %v205_v58 = vadd.f32 %v214_v56, %v204_v57  ;;  %v318_v59 = vpop.f32.mrb[1].mxu1 }
 0x1d1   :  { %208 = vst [vmem:[%s532_s5] sm:$0xff] %v205_v58 }

// kernel: _lambda_.6
= control target key start
LH: loop header
LB: loop body
LE: loop exit
PB: predicated region body
PF: predicated region fallthrough
CT: control target
= control target key end

     0   :  { %s1910_s12 = smov 0   ;;  %s1912_s13 = smov 0   ;;  %s2842_s0 = inlined_call_operand.vmem [shape: f32[4,8,2304], index: 0, kind: input, shape index: {}]   ;;  %s2843_s1 = inlined_call_operand.vmem [shape: f32[2304,128], index: 1, kind: input, shape index: {}]   ;;  %s2844_s2 = inlined_call_operand.vmem [shape: f32[1,128], index: 2, kind: input, shape index: {}]   ;;  %s2845_s3 = inlined_call_operand.vmem [shape: f32[8,128], index: 3, kind: output, shape index: {}]  }
   0x1   :  { %s1914_s14 = smov 0  }
   0x2 LB: > { %s22_s15 = sadd.s32 1, %s1884_s13  ;;  %p1229_p0 = scmp.ge.s32.totalorder %s1888_s14, 1  ;;  %s1888_s14 = sphi %s1914_s14, %s13_s14   ;;  %s1884_s13 = sphi %s1912_s13, %s2847_s13   ;;  %s1880_s12 = sphi %s1910_s12, %s2846_s12  }
   0x3   : > { %p23_p1 = scmp.ge.s32.totalorder %s22_s15, 4  ;;  %p155_p2 = scmp.lt.s32.totalorder %s1888_s14, 5 }
   0x5   : > { %s2849_s15 = smov (%p23_p1, %s22_s15), 0  ;;  %p156_p3 = pnand %p1229_p0, %p155_p2 }
   0x6   : > { %v229_v0 = vld [vmem:[%s2843_s1 + $0x80] sm:$0xff] (!%p156_p3)  ;;  %v230_v1 = vld [vmem:[%s2843_s1 + $0x88] sm:$0xff] (!%p156_p3)  ;;  %v231_v11 = vld [vmem:[%s2843_s1 + $0x90] sm:$0xff] (!%p156_p3)  ;;  %p182_p4 = scmp.lt.s32.totalorder (!%p156_p3), %s1880_s12, 3  ;;  %p1231_p5 = scmp.ne.s32.totalorder (!%p156_p3), %s1880_s12, 0 }
   0x7   : > { %159 = sbr.rel (%p156_p3) target bundleno = 410 (0x19a), region = 32  ;;  %v261_v2 = vld [vmem:[%s2843_s1 + $0x180] sm:$0xff] (!%p156_p3)  ;;  %v1553_v3 = vpack.c.bf16 (!%p156_p3), %v230_v1, %v229_v0  ;;  %v262_v4 = vld [vmem:[%s2843_s1 + $0x188] sm:$0xff] (!%p156_p3)  ;;  %v232_v13 = vld [vmem:[%s2843_s1 + $0x98] sm:$0xff] (!%p156_p3) }
   0x8   : > { %v213_v5 = vld [vmem:[%s2843_s1] sm:$0xff] (!%p156_p3)  ;;  %v214_v6 = vld [vmem:[%s2843_s1 + $0x8] sm:$0xff] (!%p156_p3)  ;;  %v1585_v7 = vpack.c.bf16 (!%p156_p3), %v262_v4, %v261_v2  ;;  %v263_v14 = vld [vmem:[%s2843_s1 + $0x190] sm:$0xff] (!%p156_p3)  ;;  %v1557_v16 = vpack.c.bf16 (!%p156_p3), %v232_v13, %v231_v11 }
   0x9   : > { %v1555_v8 = vpack.c.bf16 (!%p156_p3), %v214_v6, %v213_v5  ;;  %v245_v9 = vld [vmem:[%s2843_s1 + $0x100] sm:$0xff] (!%p156_p3)  ;;  %v246_v10 = vld [vmem:[%s2843_s1 + $0x108] sm:$0xff] (!%p156_p3)  ;;  %1554 = vmatprep.subr.bf16.mxu0 (!%p156_p3), %v1553_v3  ;;  %v264_v15 = vld [vmem:[%s2843_s1 + $0x198] sm:$0xff] (!%p156_p3) }
   0xa   : > { %v1587_v12 = vpack.c.bf16 (!%p156_p3), %v246_v10, %v245_v9  ;;  %1586 = vmatprep.subr.bf16.mxu1 (!%p156_p3), %v1585_v7  ;;  %v1589_v17 = vpack.c.bf16 (!%p156_p3), %v264_v15, %v263_v14  ;;  %v215_v18 = vld [vmem:[%s2843_s1 + $0x10] sm:$0xff] (!%p156_p3)  ;;  %v216_v19 = vld [vmem:[%s2843_s1 + $0x18] sm:$0xff] (!%p156_p3)  ;;  %v233_v23 = vld [vmem:[%s2843_s1 + $0xa0] sm:$0xff] (!%p156_p3) }
   0xb   : > { %1556 = vmatpush3.bf16.msra.mxu0 (!%p156_p3), %v1555_v8  ;;  %v247_v20 = vld [vmem:[%s2843_s1 + $0x110] sm:$0xff] (!%p156_p3)  ;;  %v1559_v21 = vpack.c.bf16 (!%p156_p3), %v216_v19, %v215_v18  ;;  %v248_v22 = vld [vmem:[%s2843_s1 + $0x118] sm:$0xff] (!%p156_p3)  ;;  %v234_v24 = vld [vmem:[%s2843_s1 + $0xa8] sm:$0xff] (!%p156_p3) }
   0xc   : > { %1588 = vmatpush3.bf16.msra.mxu1 (!%p156_p3), %v1587_v12  ;;  %1558 = vmatprep.subr.bf16.mxu0 (!%p156_p3), %v1557_v16  ;;  %v1591_v25 = vpack.c.bf16 (!%p156_p3), %v248_v22, %v247_v20  ;;  %v1561_v26 = vpack.c.bf16 (!%p156_p3), %v234_v24, %v233_v23  ;;  %v265_v27 = vld [vmem:[%s2843_s1 + $0x1a0] sm:$0xff] (!%p156_p3)  ;;  %v266_v28 = vld [vmem:[%s2843_s1 + $0x1a8] sm:$0xff] (!%p156_p3)  ;;  %v235_v35 = vld [vmem:[%s2843_s1 + $0xb0] sm:$0xff] (!%p156_p3) }
   0xd   : > { %1590 = vmatprep.subr.bf16.mxu1 (!%p156_p3), %v1589_v17  ;;  %v217_v29 = vld [vmem:[%s2843_s1 + $0x20] sm:$0xff] (!%p156_p3)  ;;  %v1593_v30 = vpack.c.bf16 (!%p156_p3), %v266_v28, %v265_v27  ;;  %v218_v31 = vld [vmem:[%s2843_s1 + $0x28] sm:$0xff] (!%p156_p3)  ;;  %v236_v36 = vld [vmem:[%s2843_s1 + $0xb8] sm:$0xff] (!%p156_p3) }
   0xe   : > { %v249_v32 = vld [vmem:[%s2843_s1 + $0x120] sm:$0xff]  ;;  %v250_v33 = vld [vmem:[%s2843_s1 + $0x128] sm:$0xff]  ;;  %v1563_v34 = vpack.c.bf16 %v218_v31, %v217_v29  ;;  %v267_v37 = vld [vmem:[%s2843_s1 + $0x1b0] sm:$0xff]  ;;  %v1565_v39 = vpack.c.bf16 %v236_v36, %v235_v35  ;;  %s2033_s9 = scalar_select %p182_p4, %s1880_s12, 3 }
   0xf   : > { %1560 = vmatpush3.bf16.msra.mxu0 %v1559_v21  ;;  %v1595_v38 = vpack.c.bf16 %v250_v33, %v249_v32  ;;  %v268_v40 = vld [vmem:[%s2843_s1 + $0x1b8] sm:$0xff]  ;;  %v219_v41 = vld [vmem:[%s2843_s1 + $0x30] sm:$0xff]  ;;  %v237_v46 = vld [vmem:[%s2843_s1 + $0xc0] sm:$0xff] }
  0x10   : > { %1592 = vmatpush3.bf16.msra.mxu1 %v1591_v25  ;;  %1562 = vmatprep.subr.bf16.mxu0 %v1561_v26  ;;  %v220_v42 = vld [vmem:[%s2843_s1 + $0x38] sm:$0xff]  ;;  %v1597_v43 = vpack.c.bf16 %v268_v40, %v267_v37  ;;  %v251_v44 = vld [vmem:[%s2843_s1 + $0x130] sm:$0xff]  ;;  %v238_v47 = vld [vmem:[%s2843_s1 + $0xc8] sm:$0xff]  ;;  %s1841_s5 = smul.u32 144, %s2033_s9 }
  0x11   : > { %1594 = vmatprep.subr.bf16.mxu1 %v1593_v30  ;;  %v252_v45 = vld [vmem:[%s2843_s1 + $0x138] sm:$0xff]  ;;  %v269_v48 = vld [vmem:[%s2843_s1 + $0x1c0] sm:$0xff]  ;;  %v270_v49 = vld [vmem:[%s2843_s1 + $0x1c8] sm:$0xff]  ;;  %v1567_v50 = vpack.c.bf16 %v220_v42, %v219_v41  ;;  %v1569_v52 = vpack.c.bf16 %v238_v47, %v237_v46 }
  0x12   : > { %v1599_v51 = vpack.c.bf16 %v252_v45, %v251_v44  ;;  %v221_v53 = vld [vmem:[%s2843_s1 + $0x40] sm:$0xff]  ;;  %v222_v54 = vld [vmem:[%s2843_s1 + $0x48] sm:$0xff]  ;;  %v1601_v56 = vpack.c.bf16 %v270_v49, %v269_v48  ;;  %v239_v58 = vld [vmem:[%s2843_s1 + $0xd0] sm:$0xff]  ;;  %s2090_s28 = scalar_lea.vmem %s2842_s0, %s1841_s5 }
  0x13   : > { %1564 = vmatpush3.bf16.msra.mxu0 %v1563_v34  ;;  %v253_v55 = vld [vmem:[%s2843_s1 + $0x140] sm:$0xff]  ;;  %v254_v57 = vld [vmem:[%s2843_s1 + $0x148] sm:$0xff]  ;;  %v240_v59 = vld [vmem:[%s2843_s1 + $0xd8] sm:$0xff]  ;;  %v1571_v62 = vpack.c.bf16 %v222_v54, %v221_v53 }
  0x14   : > { %1596 = vmatpush3.bf16.msra.mxu1 %v1595_v38  ;;  %1566 = vmatprep.subr.bf16.mxu0 %v1565_v39  ;;  %v271_v60 = vld [vmem:[%s2843_s1 + $0x1d0] sm:$0xff]  ;;  %v272_v61 = vld [vmem:[%s2843_s1 + $0x1d8] sm:$0xff]  ;;  %v1603_v63 = vpack.c.bf16 %v254_v57, %v253_v55  ;;  %v1573_v0 = vpack.c.bf16 %v240_v59, %v239_v58  ;;  %v241_v6 = vld [vmem:[%s2843_s1 + $0xe0] sm:$0xff] }
  0x15   : > { %1598 = vmatprep.subr.bf16.mxu1 %v1597_v43  ;;  %v223_v1 = vld [vmem:[%s2843_s1 + $0x50] sm:$0xff]  ;;  %v224_v2 = vld [vmem:[%s2843_s1 + $0x58] sm:$0xff]  ;;  %v1605_v4 = vpack.c.bf16 %v272_v61, %v271_v60  ;;  %v242_v7 = vld [vmem:[%s2843_s1 + $0xe8] sm:$0xff] }
  0x16   : > { %v255_v3 = vld [vmem:[%s2843_s1 + $0x150] sm:$0xff]  ;;  %v256_v5 = vld [vmem:[%s2843_s1 + $0x158] sm:$0xff]  ;;  %v273_v8 = vld [vmem:[%s2843_s1 + $0x1e0] sm:$0xff]  ;;  %v1575_v10 = vpack.c.bf16 %v224_v2, %v223_v1  ;;  %v1577_v14 = vpack.c.bf16 %v242_v7, %v241_v6 }
  0x17   : > { %1568 = vmatpush3.bf16.msra.mxu0 %v1567_v50  ;;  %v274_v9 = vld [vmem:[%s2843_s1 + $0x1e8] sm:$0xff]  ;;  %v225_v11 = vld [vmem:[%s2843_s1 + $0x60] sm:$0xff]  ;;  %v1607_v13 = vpack.c.bf16 %v256_v5, %v255_v3  ;;  %v198_v17 = vld [vmem:[%s2090_s28 + $0x18] sm:$0xff] }
  0x18   : > { %1600 = vmatpush3.bf16.msra.mxu1 %v1599_v51  ;;  %1570 = vmatprep.subr.bf16.mxu0 %v1569_v52  ;;  %v226_v12 = vld [vmem:[%s2843_s1 + $0x68] sm:$0xff]  ;;  %v257_v15 = vld [vmem:[%s2843_s1 + $0x160] sm:$0xff]  ;;  %v1609_v18 = vpack.c.bf16 %v274_v9, %v273_v8  ;;  %v243_v20 = vld [vmem:[%s2843_s1 + $0xf0] sm:$0xff] }
  0x19   : > { %1602 = vmatprep.subr.bf16.mxu1 %v1601_v56  ;;  %v196_v16 = vld [vmem:[%s2090_s28 + $0x8] sm:$0xff]  ;;  %v244_v21 = vld [vmem:[%s2843_s1 + $0xf8] sm:$0xff]  ;;  %v275_v22 = vld [vmem:[%s2843_s1 + $0x1f0] sm:$0xff]  ;;  %635 = vmatprep.mubr.f32.mxu1 %v198_v17  ;;  %v1579_v24 = vpack.c.bf16 %v226_v12, %v225_v11 }
  0x1a   : > { %v258_v19 = vld [vmem:[%s2843_s1 + $0x168] sm:$0xff]  ;;  %565 = vmatprep.mubr.f32.mxu0 %v196_v16  ;;  %v276_v23 = vld [vmem:[%s2843_s1 + $0x1f8] sm:$0xff]  ;;  %v1581_v26 = vpack.c.bf16 %v244_v21, %v243_v20  ;;  %v227_v27 = vld [vmem:[%s2843_s1 + $0x70] sm:$0xff] }
  0x1b   : > { %1572 = vmatpush3.bf16.msra.mxu0 %v1571_v62  ;;  %v1611_v25 = vpack.c.bf16 %v258_v19, %v257_v15  ;;  %v228_v28 = vld [vmem:[%s2843_s1 + $0x78] sm:$0xff]  ;;  %v259_v29 = vld [vmem:[%s2843_s1 + $0x170] sm:$0xff]  ;;  %v1613_v30 = vpack.c.bf16 %v276_v23, %v275_v22  ;;  %v293_v32 = vld [vmem:[%s2843_s1 + $0x280] sm:$0xff] }
  0x1c   : > { %1604 = vmatpush3.bf16.msra.mxu1 %v1603_v63  ;;  %1574 = vmatprep.subr.bf16.mxu0 %v1573_v0  ;;  %v260_v31 = vld [vmem:[%s2843_s1 + $0x178] sm:$0xff]  ;;  %v294_v33 = vld [vmem:[%s2843_s1 + $0x288] sm:$0xff]  ;;  %v325_v34 = vld [vmem:[%s2843_s1 + $0x380] sm:$0xff]  ;;  %v1583_v36 = vpack.c.bf16 %v228_v28, %v227_v27 }
  0x1d   : > { %1606 = vmatprep.subr.bf16.mxu1 %v1605_v4  ;;  %v326_v35 = vld [vmem:[%s2843_s1 + $0x388] sm:$0xff]  ;;  %v1615_v37 = vpack.c.bf16 %v260_v31, %v259_v29  ;;  %v1617_v38 = vpack.c.bf16 %v294_v33, %v293_v32  ;;  %v277_v39 = vld [vmem:[%s2843_s1 + $0x200] sm:$0xff]  ;;  %v295_v44 = vld [vmem:[%s2843_s1 + $0x290] sm:$0xff] }
  0x1e   : > { %v278_v40 = vld [vmem:[%s2843_s1 + $0x208] sm:$0xff]  ;;  %v309_v41 = vld [vmem:[%s2843_s1 + $0x300] sm:$0xff]  ;;  %v1649_v42 = vpack.c.bf16 %v326_v35, %v325_v34  ;;  %v296_v45 = vld [vmem:[%s2843_s1 + $0x298] sm:$0xff] }
  0x1f   : > { %1576 = vmatpush3.bf16.msra.mxu0 %v1575_v10  ;;  %v310_v43 = vld [vmem:[%s2843_s1 + $0x308] sm:$0xff]  ;;  %v327_v46 = vld [vmem:[%s2843_s1 + $0x390] sm:$0xff]  ;;  %v328_v47 = vld [vmem:[%s2843_s1 + $0x398] sm:$0xff]  ;;  %v1619_v50 = vpack.c.bf16 %v278_v40, %v277_v39  ;;  %v1621_v52 = vpack.c.bf16 %v296_v45, %v295_v44 }
  0x20   : > { %1608 = vmatpush3.bf16.msra.mxu1 %v1607_v13  ;;  %1578 = vmatprep.subr.bf16.mxu0 %v1577_v14  ;;  %v195_v48 = vld [vmem:[%s2090_s28] sm:$0xff]  ;;  %v197_v49 = vld [vmem:[%s2090_s28 + $0x10] sm:$0xff]  ;;  %v1651_v51 = vpack.c.bf16 %v310_v43, %v309_v41  ;;  %v280_v54 = vld [vmem:[%s2843_s1 + $0x218] sm:$0xff]  ;;  %v1653_v56 = vpack.c.bf16 %v328_v47, %v327_v46 }
  0x21   : > { %1610 = vmatprep.subr.bf16.mxu1 %v1609_v18  ;;  %v279_v53 = vld [vmem:[%s2843_s1 + $0x210] sm:$0xff]  ;;  %v312_v57 = vld [vmem:[%s2843_s1 + $0x318] sm:$0xff]  ;;  %v297_v58 = vld [vmem:[%s2843_s1 + $0x2a0] sm:$0xff] }
  0x22   : > { %v311_v55 = vld [vmem:[%s2843_s1 + $0x310] sm:$0xff]  ;;  %v298_v59 = vld [vmem:[%s2843_s1 + $0x2a8] sm:$0xff]  ;;  %v329_v60 = vld [vmem:[%s2843_s1 + $0x3a0] sm:$0xff]  ;;  %v1623_v62 = vpack.c.bf16 %v280_v54, %v279_v53 }
  0x23   : > { %1580 = vmatpush3.bf16.msra.mxu0 %v1579_v24  ;;  %v330_v61 = vld [vmem:[%s2843_s1 + $0x3a8] sm:$0xff]  ;;  %v1655_v63 = vpack.c.bf16 %v312_v57, %v311_v55  ;;  %v1625_v0 = vpack.c.bf16 %v298_v59, %v297_v58  ;;  %v281_v1 = vld [vmem:[%s2843_s1 + $0x220] sm:$0xff]  ;;  %v299_v6 = vld [vmem:[%s2843_s1 + $0x2b0] sm:$0xff] }
  0x24   : > { %1612 = vmatpush3.bf16.msra.mxu1 %v1611_v25  ;;  %1582 = vmatprep.subr.bf16.mxu0 %v1581_v26  ;;  %v282_v2 = vld [vmem:[%s2843_s1 + $0x228] sm:$0xff]  ;;  %v313_v3 = vld [vmem:[%s2843_s1 + $0x320] sm:$0xff]  ;;  %v1657_v4 = vpack.c.bf16 %v330_v61, %v329_v60  ;;  %v300_v7 = vld [vmem:[%s2843_s1 + $0x2b8] sm:$0xff] }
  0x25   : > { %1614 = vmatprep.subr.bf16.mxu1 %v1613_v30  ;;  %v314_v5 = vld [vmem:[%s2843_s1 + $0x328] sm:$0xff]  ;;  %v331_v8 = vld [vmem:[%s2843_s1 + $0x3b0] sm:$0xff]  ;;  %v332_v9 = vld [vmem:[%s2843_s1 + $0x3b8] sm:$0xff]  ;;  %v1627_v10 = vpack.c.bf16 %v282_v2, %v281_v1  ;;  %v1629_v12 = vpack.c.bf16 %v300_v7, %v299_v6 }
  0x26   : > { %v1659_v11 = vpack.c.bf16 %v314_v5, %v313_v3  ;;  %v283_v13 = vld [vmem:[%s2843_s1 + $0x230] sm:$0xff]  ;;  %v284_v14 = vld [vmem:[%s2843_s1 + $0x238] sm:$0xff]  ;;  %v1661_v16 = vpack.c.bf16 %v332_v9, %v331_v8  ;;  %v301_v18 = vld [vmem:[%s2843_s1 + $0x2c0] sm:$0xff] }
  0x27   : > { %1584 = vmatpush3.bf16.msra.mxu0 %v1583_v36  ;;  %v315_v15 = vld [vmem:[%s2843_s1 + $0x330] sm:$0xff]  ;;  %v316_v17 = vld [vmem:[%s2843_s1 + $0x338] sm:$0xff]  ;;  %v302_v19 = vld [vmem:[%s2843_s1 + $0x2c8] sm:$0xff]  ;;  %v1631_v23 = vpack.c.bf16 %v284_v14, %v283_v13 }
  0x28   : > { %1616 = vmatpush3.bf16.msra.mxu1 %v1615_v37  ;;  %1618 = vmatprep.subr.bf16.mxu0 %v1617_v38  ;;  %v333_v20 = vld [vmem:[%s2843_s1 + $0x3c0] sm:$0xff]  ;;  %v334_v21 = vld [vmem:[%s2843_s1 + $0x3c8] sm:$0xff]  ;;  %v1663_v25 = vpack.c.bf16 %v316_v17, %v315_v15  ;;  %v1633_v26 = vpack.c.bf16 %v302_v19, %v301_v18  ;;  %v202_v29 = vld [vmem:[%s2090_s28 + $0x38] sm:$0xff] }
  0x29   : > { %1650 = vmatprep.subr.bf16.mxu1 %v1649_v42  ;;  %v200_v22 = vld [vmem:[%s2090_s28 + $0x28] sm:$0xff]  ;;  %v285_v24 = vld [vmem:[%s2843_s1 + $0x240] sm:$0xff]  ;;  %v1665_v30 = vpack.c.bf16 %v334_v21, %v333_v20  ;;  %v303_v32 = vld [vmem:[%s2843_s1 + $0x2d0] sm:$0xff] }
  0x2a   : > { %566 = vmatmul.mubr.f32.vlgmr.msra.gmra.mrb[0].mxu0 %v195_v48  ;;  %v286_v27 = vld [vmem:[%s2843_s1 + $0x248] sm:$0xff]  ;;  %v317_v28 = vld [vmem:[%s2843_s1 + $0x340] sm:$0xff]  ;;  %v304_v33 = vld [vmem:[%s2843_s1 + $0x2d8] sm:$0xff] }
  0x2b   : > { %636 = vmatmul.mubr.f32.vlgmr.msra.gmra.mrb[0].mxu1 %v197_v49  ;;  %1620 = vmatpush3.bf16.msra.mxu0 %v1619_v50  ;;  %v318_v31 = vld [vmem:[%s2843_s1 + $0x348] sm:$0xff]  ;;  %v335_v34 = vld [vmem:[%s2843_s1 + $0x3d0] sm:$0xff]  ;;  %v336_v35 = vld [vmem:[%s2843_s1 + $0x3d8] sm:$0xff]  ;;  %v1635_v36 = vpack.c.bf16 %v286_v27, %v285_v24  ;;  %v1637_v38 = vpack.c.bf16 %v304_v33, %v303_v32 }
  0x2c   : > { %1652 = vmatpush3.bf16.msra.mxu1 %v1651_v51  ;;  %1622 = vmatprep.subr.bf16.mxu0 %v1621_v52  ;;  %v1667_v37 = vpack.c.bf16 %v318_v31, %v317_v28  ;;  %v287_v39 = vld [vmem:[%s2843_s1 + $0x250] sm:$0xff]  ;;  %v288_v40 = vld [vmem:[%s2843_s1 + $0x258] sm:$0xff]  ;;  %v1669_v42 = vpack.c.bf16 %v336_v35, %v335_v34  ;;  %v305_v44 = vld [vmem:[%s2843_s1 + $0x2e0] sm:$0xff] }
  0x2d   : > { %1654 = vmatprep.subr.bf16.mxu1 %v1653_v56  ;;  %705 = vmatprep.mubr.f32.mxu0 %v200_v22  ;;  %v319_v41 = vld [vmem:[%s2843_s1 + $0x350] sm:$0xff]  ;;  %v320_v43 = vld [vmem:[%s2843_s1 + $0x358] sm:$0xff]  ;;  %v306_v45 = vld [vmem:[%s2843_s1 + $0x2e8] sm:$0xff]  ;;  %v1639_v48 = vpack.c.bf16 %v288_v40, %v287_v39 }
  0x2e   : > { %775 = vmatprep.mubr.f32.mxu1 %v202_v29  ;;  %v337_v46 = vld [vmem:[%s2843_s1 + $0x3e0] sm:$0xff]  ;;  %v338_v47 = vld [vmem:[%s2843_s1 + $0x3e8] sm:$0xff]  ;;  %v1671_v49 = vpack.c.bf16 %v320_v43, %v319_v41  ;;  %v1641_v50 = vpack.c.bf16 %v306_v45, %v305_v44  ;;  %v307_v56 = vld [vmem:[%s2843_s1 + $0x2f0] sm:$0xff] }
  0x2f   : > { %1624 = vmatpush3.bf16.msra.mxu0 %v1623_v62  ;;  %v289_v51 = vld [vmem:[%s2843_s1 + $0x260] sm:$0xff]  ;;  %v290_v52 = vld [vmem:[%s2843_s1 + $0x268] sm:$0xff]  ;;  %v1673_v54 = vpack.c.bf16 %v338_v47, %v337_v46  ;;  %v308_v57 = vld [vmem:[%s2843_s1 + $0x2f8] sm:$0xff] }
  0x30   : > { %1656 = vmatpush3.bf16.msra.mxu1 %v1655_v63  ;;  %1626 = vmatprep.subr.bf16.mxu0 %v1625_v0  ;;  %v321_v53 = vld [vmem:[%s2843_s1 + $0x360] sm:$0xff]  ;;  %v322_v55 = vld [vmem:[%s2843_s1 + $0x368] sm:$0xff]  ;;  %v339_v58 = vld [vmem:[%s2843_s1 + $0x3f0] sm:$0xff]  ;;  %v1643_v60 = vpack.c.bf16 %v290_v52, %v289_v51  ;;  %v1645_v62 = vpack.c.bf16 %v308_v57, %v307_v56 }
  0x31   : > { %1658 = vmatprep.subr.bf16.mxu1 %v1657_v4  ;;  %v340_v59 = vld [vmem:[%s2843_s1 + $0x3f8] sm:$0xff]  ;;  %v1675_v61 = vpack.c.bf16 %v322_v55, %v321_v53  ;;  %v291_v63 = vld [vmem:[%s2843_s1 + $0x270] sm:$0xff]  ;;  %v357_v4 = vld [vmem:[%s2843_s1 + $0x480] sm:$0xff] }
  0x32   : > { %v292_v0 = vld [vmem:[%s2843_s1 + $0x278] sm:$0xff]  ;;  %v323_v1 = vld [vmem:[%s2843_s1 + $0x370] sm:$0xff]  ;;  %v1677_v2 = vpack.c.bf16 %v340_v59, %v339_v58  ;;  %v358_v5 = vld [vmem:[%s2843_s1 + $0x488] sm:$0xff] }
  0x33   : > { %1628 = vmatpush3.bf16.msra.mxu0 %v1627_v10  ;;  %v324_v3 = vld [vmem:[%s2843_s1 + $0x378] sm:$0xff]  ;;  %v389_v6 = vld [vmem:[%s2843_s1 + $0x580] sm:$0xff]  ;;  %v390_v7 = vld [vmem:[%s2843_s1 + $0x588] sm:$0xff]  ;;  %v1647_v8 = vpack.c.bf16 %v292_v0, %v291_v63  ;;  %v1681_v10 = vpack.c.bf16 %v358_v5, %v357_v4 }
  0x34   : > { %1660 = vmatpush3.bf16.msra.mxu1 %v1659_v11  ;;  %1630 = vmatprep.subr.bf16.mxu0 %v1629_v12  ;;  %v1679_v9 = vpack.c.bf16 %v324_v3, %v323_v1  ;;  %v341_v11 = vld [vmem:[%s2843_s1 + $0x400] sm:$0xff]  ;;  %v342_v12 = vld [vmem:[%s2843_s1 + $0x408] sm:$0xff]  ;;  %v1713_v14 = vpack.c.bf16 %v390_v7, %v389_v6  ;;  %v360_v17 = vld [vmem:[%s2843_s1 + $0x498] sm:$0xff] }
  0x35   : > { %1662 = vmatprep.subr.bf16.mxu1 %v1661_v16  ;;  %v373_v13 = vld [vmem:[%s2843_s1 + $0x500] sm:$0xff]  ;;  %v374_v15 = vld [vmem:[%s2843_s1 + $0x508] sm:$0xff]  ;;  %v359_v16 = vld [vmem:[%s2843_s1 + $0x490] sm:$0xff]  ;;  %v1683_v21 = vpack.c.bf16 %v342_v12, %v341_v11 }
  0x36   : > { %v391_v18 = vld [vmem:[%s2843_s1 + $0x590] sm:$0xff]  ;;  %v392_v19 = vld [vmem:[%s2843_s1 + $0x598] sm:$0xff]  ;;  %v199_v20 = vld [vmem:[%s2090_s28 + $0x20] sm:$0xff]  ;;  %v1685_v24 = vpack.c.bf16 %v360_v17, %v359_v16 }
  0x37   : > { %1632 = vmatpush3.bf16.msra.mxu0 %v1631_v23  ;;  %v201_v22 = vld [vmem:[%s2090_s28 + $0x30] sm:$0xff]  ;;  %v1715_v23 = vpack.c.bf16 %v374_v15, %v373_v13  ;;  %v1717_v28 = vpack.c.bf16 %v392_v19, %v391_v18  ;;  %v376_v29 = vld [vmem:[%s2843_s1 + $0x518] sm:$0xff]  ;;  %v362_v31 = vld [vmem:[%s2843_s1 + $0x4a8] sm:$0xff] }
  0x38   : > { %1664 = vmatpush3.bf16.msra.mxu1 %v1663_v25  ;;  %1634 = vmatprep.subr.bf16.mxu0 %v1633_v26  ;;  %v343_v25 = vld [vmem:[%s2843_s1 + $0x410] sm:$0xff]  ;;  %v344_v26 = vld [vmem:[%s2843_s1 + $0x418] sm:$0xff]  ;;  %v393_v32 = vld [vmem:[%s2843_s1 + $0x5a0] sm:$0xff] }
  0x39   : > { %1666 = vmatprep.subr.bf16.mxu1 %v1665_v30  ;;  %v375_v27 = vld [vmem:[%s2843_s1 + $0x510] sm:$0xff]  ;;  %v361_v30 = vld [vmem:[%s2843_s1 + $0x4a0] sm:$0xff]  ;;  %v394_v33 = vld [vmem:[%s2843_s1 + $0x5a8] sm:$0xff]  ;;  %v1687_v35 = vpack.c.bf16 %v344_v26, %v343_v25 }
  0x3a   : > { %v204_v34 = vld [vmem:[%s2090_s28 + $0x48] sm:$0xff]  ;;  %v345_v39 = vld [vmem:[%s2843_s1 + $0x420] sm:$0xff]  ;;  %v363_v44 = vld [vmem:[%s2843_s1 + $0x4b0] sm:$0xff] }
  0x3b   : > { %1636 = vmatpush3.bf16.msra.mxu0 %v1635_v36  ;;  %v206_v36 = vld [vmem:[%s2090_s28 + $0x58] sm:$0xff]  ;;  %v346_v40 = vld [vmem:[%s2843_s1 + $0x428] sm:$0xff]  ;;  %v377_v41 = vld [vmem:[%s2843_s1 + $0x520] sm:$0xff] }
  0x3c   : > { %1668 = vmatpush3.bf16.msra.mxu1 %v1667_v37  ;;  %1638 = vmatprep.subr.bf16.mxu0 %v1637_v38  ;;  %v1719_v37 = vpack.c.bf16 %v376_v29, %v375_v27  ;;  %v1689_v38 = vpack.c.bf16 %v362_v31, %v361_v30  ;;  %v378_v43 = vld [vmem:[%s2843_s1 + $0x528] sm:$0xff]  ;;  %v364_v45 = vld [vmem:[%s2843_s1 + $0x4b8] sm:$0xff]  ;;  %v395_v46 = vld [vmem:[%s2843_s1 + $0x5b0] sm:$0xff] }
  0x3d   : > { %1670 = vmatprep.subr.bf16.mxu1 %v1669_v42  ;;  %v1721_v42 = vpack.c.bf16 %v394_v33, %v393_v32  ;;  %v396_v47 = vld [vmem:[%s2843_s1 + $0x5b8] sm:$0xff]  ;;  %v347_v51 = vld [vmem:[%s2843_s1 + $0x430] sm:$0xff]  ;;  %v365_v56 = vld [vmem:[%s2843_s1 + $0x4c0] sm:$0xff] }
  0x3e   : > { %v348_v52 = vld [vmem:[%s2843_s1 + $0x438] sm:$0xff]  ;;  %v379_v53 = vld [vmem:[%s2843_s1 + $0x530] sm:$0xff]  ;;  %v366_v57 = vld [vmem:[%s2843_s1 + $0x4c8] sm:$0xff] }
  0x3f   : > { %1640 = vmatpush3.bf16.msra.mxu0 %v1639_v48  ;;  %v1691_v48 = vpack.c.bf16 %v346_v40, %v345_v39  ;;  %v380_v55 = vld [vmem:[%s2843_s1 + $0x538] sm:$0xff]  ;;  %v397_v58 = vld [vmem:[%s2843_s1 + $0x5c0] sm:$0xff]  ;;  %v398_v59 = vld [vmem:[%s2843_s1 + $0x5c8] sm:$0xff] }
  0x40   : > { %1672 = vmatpush3.bf16.msra.mxu1 %v1671_v49  ;;  %1642 = vmatprep.subr.bf16.mxu0 %v1641_v50  ;;  %v1723_v49 = vpack.c.bf16 %v378_v43, %v377_v41  ;;  %v1693_v50 = vpack.c.bf16 %v364_v45, %v363_v44  ;;  %v349_v63 = vld [vmem:[%s2843_s1 + $0x440] sm:$0xff]  ;;  %v350_v0 = vld [vmem:[%s2843_s1 + $0x448] sm:$0xff]  ;;  %v367_v4 = vld [vmem:[%s2843_s1 + $0x4d0] sm:$0xff] }
  0x41   : > { %1674 = vmatprep.subr.bf16.mxu1 %v1673_v54  ;;  %v1725_v54 = vpack.c.bf16 %v396_v47, %v395_v46  ;;  %v381_v1 = vld [vmem:[%s2843_s1 + $0x540] sm:$0xff]  ;;  %v382_v3 = vld [vmem:[%s2843_s1 + $0x548] sm:$0xff]  ;;  %v368_v5 = vld [vmem:[%s2843_s1 + $0x4d8] sm:$0xff] }
  0x42   : > { %v399_v6 = vld [vmem:[%s2843_s1 + $0x5d0] sm:$0xff]  ;;  %v400_v7 = vld [vmem:[%s2843_s1 + $0x5d8] sm:$0xff]  ;;  %v369_v16 = vld [vmem:[%s2843_s1 + $0x4e0] sm:$0xff] }
  0x43   : > { %1644 = vmatpush3.bf16.msra.mxu0 %v1643_v60  ;;  %v1695_v60 = vpack.c.bf16 %v348_v52, %v347_v51  ;;  %v351_v11 = vld [vmem:[%s2843_s1 + $0x450] sm:$0xff]  ;;  %v352_v12 = vld [vmem:[%s2843_s1 + $0x458] sm:$0xff]  ;;  %v370_v17 = vld [vmem:[%s2843_s1 + $0x4e8] sm:$0xff] }
  0x44   : > { %1676 = vmatpush3.bf16.msra.mxu1 %v1675_v61  ;;  %1646 = vmatprep.subr.bf16.mxu0 %v1645_v62  ;;  %v1727_v61 = vpack.c.bf16 %v380_v55, %v379_v53  ;;  %v1697_v62 = vpack.c.bf16 %v366_v57, %v365_v56  ;;  %v383_v13 = vld [vmem:[%s2843_s1 + $0x550] sm:$0xff]  ;;  %v384_v15 = vld [vmem:[%s2843_s1 + $0x558] sm:$0xff]  ;;  %v401_v18 = vld [vmem:[%s2843_s1 + $0x5e0] sm:$0xff] }
  0x45   : > { %1678 = vmatprep.subr.bf16.mxu1 %v1677_v2  ;;  %v1729_v2 = vpack.c.bf16 %v398_v59, %v397_v58  ;;  %v402_v19 = vld [vmem:[%s2843_s1 + $0x5e8] sm:$0xff]  ;;  %v385_v25 = vld [vmem:[%s2843_s1 + $0x560] sm:$0xff]  ;;  %v372_v29 = vld [vmem:[%s2843_s1 + $0x4f8] sm:$0xff] }
  0x46   : > { %v1737_v26 = vpack.c.bf16 %v402_v19, %v401_v18  ;;  %v386_v27 = vld [vmem:[%s2843_s1 + $0x568] sm:$0xff]  ;;  %v403_v30 = vld [vmem:[%s2843_s1 + $0x5f0] sm:$0xff]  ;;  %v404_v31 = vld [vmem:[%s2843_s1 + $0x5f8] sm:$0xff] }
  0x47   : > { %1648 = vmatpush3.bf16.msra.mxu0 %v1647_v8  ;;  %v1699_v8 = vpack.c.bf16 %v350_v0, %v349_v63  ;;  %v1739_v33 = vpack.c.bf16 %v386_v27, %v385_v25  ;;  %v388_v39 = vld [vmem:[%s2843_s1 + $0x578] sm:$0xff]  ;;  %v421_v40 = vld [vmem:[%s2843_s1 + $0x680] sm:$0xff]  ;;  %v422_v41 = vld [vmem:[%s2843_s1 + $0x688] sm:$0xff] }
  0x48   : > { %1680 = vmatpush3.bf16.msra.mxu1 %v1679_v9  ;;  %1682 = vmatprep.subr.bf16.mxu0 %v1681_v10  ;;  %v1731_v9 = vpack.c.bf16 %v382_v3, %v381_v1  ;;  %v1701_v10 = vpack.c.bf16 %v368_v5, %v367_v4  ;;  %v454_v43 = vld [vmem:[%s2843_s1 + $0x788] sm:$0xff]  ;;  %v1745_v46 = vpack.c.bf16 %v422_v41, %v421_v40  ;;  %v405_v47 = vld [vmem:[%s2843_s1 + $0x600] sm:$0xff]  ;;  %v423_v52 = vld [vmem:[%s2843_s1 + $0x690] sm:$0xff] }
  0x49   : > { %1714 = vmatprep.subr.bf16.mxu1 %v1713_v14  ;;  %v1733_v14 = vpack.c.bf16 %v400_v7, %v399_v6  ;;  %v438_v51 = vld [vmem:[%s2843_s1 + $0x708] sm:$0xff]  ;;  %v424_v53 = vld [vmem:[%s2843_s1 + $0x698] sm:$0xff]  ;;  %v203_v56 = vld [vmem:[%s2090_s28 + $0x40] sm:$0xff] }
  0x4a   : > { %706 = vmatmul.mubr.f32.vlgmr.msra.gmra.mrb[2].mxu0 %v199_v20  ;;  %v1703_v20 = vpack.c.bf16 %v352_v12, %v351_v11  ;;  %v456_v55 = vld [vmem:[%s2843_s1 + $0x798] sm:$0xff]  ;;  %v205_v58 = vld [vmem:[%s2090_s28 + $0x50] sm:$0xff]  ;;  %v426_v3 = vld [vmem:[%s2843_s1 + $0x6a8] sm:$0xff] }
  0x4b   : > { %1684 = vmatpush3.bf16.msra.mxu0 %v1683_v21  ;;  %776 = vmatmul.mubr.f32.vlgmr.msra.gmra.mrb[2].mxu1 %v201_v22  ;;  %v1735_v21 = vpack.c.bf16 %v384_v15, %v383_v13  ;;  %v1705_v22 = vpack.c.bf16 %v370_v17, %v369_v16  ;;  %v439_v63 = vld [vmem:[%s2843_s1 + $0x710] sm:$0xff]  ;;  %v440_v1 = vld [vmem:[%s2843_s1 + $0x718] sm:$0xff]  ;;  %v457_v4 = vld [vmem:[%s2843_s1 + $0x7a0] sm:$0xff] }
  0x4c   : > { %1716 = vmatpush3.bf16.msra.mxu1 %v1715_v23  ;;  %1686 = vmatprep.subr.bf16.mxu0 %v1685_v24  ;;  %v353_v23 = vld [vmem:[%s2843_s1 + $0x460] sm:$0xff]  ;;  %v354_v24 = vld [vmem:[%s2843_s1 + $0x468] sm:$0xff]  ;;  %v427_v16 = vld [vmem:[%s2843_s1 + $0x6b0] sm:$0xff] }
  0x4d   : > { %1718 = vmatprep.subr.bf16.mxu1 %v1717_v28  ;;  %845 = vmatprep.mubr.f32.mxu0 %v204_v34  ;;  %v371_v28 = vld [vmem:[%s2843_s1 + $0x4f0] sm:$0xff]  ;;  %v1707_v32 = vpack.c.bf16 %v354_v24, %v353_v23  ;;  %v458_v5 = vld [vmem:[%s2843_s1 + $0x7a8] sm:$0xff]  ;;  %v409_v11 = vld [vmem:[%s2843_s1 + $0x620] sm:$0xff] }
  0x4e   : > { %915 = vmatprep.mubr.f32.mxu1 %v206_v36  ;;  %v1709_v34 = vpack.c.bf16 %v372_v29, %v371_v28  ;;  %v356_v36 = vld [vmem:[%s2843_s1 + $0x478] sm:$0xff]  ;;  %v208_v6 = vld [vmem:[%s2090_s28 + $0x68] sm:$0xff]  ;;  %v441_v13 = vld [vmem:[%s2843_s1 + $0x720] sm:$0xff] }
  0x4f   : > { %1688 = vmatpush3.bf16.msra.mxu0 %v1687_v35  ;;  %v355_v35 = vld [vmem:[%s2843_s1 + $0x470] sm:$0xff]  ;;  %v410_v12 = vld [vmem:[%s2843_s1 + $0x628] sm:$0xff]  ;;  %v428_v17 = vld [vmem:[%s2843_s1 + $0x6b8] sm:$0xff] }
  0x50   : > { %1720 = vmatpush3.bf16.msra.mxu1 %v1719_v37  ;;  %1690 = vmatprep.subr.bf16.mxu0 %v1689_v38  ;;  %v387_v37 = vld [vmem:[%s2843_s1 + $0x570] sm:$0xff]  ;;  %v1741_v38 = vpack.c.bf16 %v404_v31, %v403_v30  ;;  %v1711_v44 = vpack.c.bf16 %v356_v36, %v355_v35  ;;  %v442_v15 = vld [vmem:[%s2843_s1 + $0x728] sm:$0xff]  ;;  %v460_v19 = vld [vmem:[%s2843_s1 + $0x7b8] sm:$0xff] }
  0x51   : > { %1722 = vmatprep.subr.bf16.mxu1 %v1721_v42  ;;  %v453_v42 = vld [vmem:[%s2843_s1 + $0x780] sm:$0xff]  ;;  %v1743_v45 = vpack.c.bf16 %v388_v39, %v387_v37  ;;  %v459_v18 = vld [vmem:[%s2843_s1 + $0x7b0] sm:$0xff]  ;;  %v412_v24 = vld [vmem:[%s2843_s1 + $0x638] sm:$0xff] }
  0x52   : > { %v411_v23 = vld [vmem:[%s2843_s1 + $0x630] sm:$0xff]  ;;  %v444_v27 = vld [vmem:[%s2843_s1 + $0x738] sm:$0xff]  ;;  %v429_v28 = vld [vmem:[%s2843_s1 + $0x6c0] sm:$0xff] }
  0x53   : > { %1692 = vmatpush3.bf16.msra.mxu0 %v1691_v48  ;;  %v406_v48 = vld [vmem:[%s2843_s1 + $0x608] sm:$0xff]  ;;  %v443_v25 = vld [vmem:[%s2843_s1 + $0x730] sm:$0xff]  ;;  %v461_v30 = vld [vmem:[%s2843_s1 + $0x7c0] sm:$0xff] }
  0x54   : > { %1724 = vmatpush3.bf16.msra.mxu1 %v1723_v49  ;;  %1694 = vmatprep.subr.bf16.mxu0 %v1693_v50  ;;  %v437_v49 = vld [vmem:[%s2843_s1 + $0x700] sm:$0xff]  ;;  %v1777_v50 = vpack.c.bf16 %v454_v43, %v453_v42  ;;  %v1747_v57 = vpack.c.bf16 %v406_v48, %v405_v47  ;;  %v430_v29 = vld [vmem:[%s2843_s1 + $0x6c8] sm:$0xff]  ;;  %v431_v40 = vld [vmem:[%s2843_s1 + $0x6d0] sm:$0xff] }
  0x55   : > { %1726 = vmatprep.subr.bf16.mxu1 %v1725_v54  ;;  %v455_v54 = vld [vmem:[%s2843_s1 + $0x790] sm:$0xff]  ;;  %v1779_v59 = vpack.c.bf16 %v438_v51, %v437_v49  ;;  %v462_v31 = vld [vmem:[%s2843_s1 + $0x7c8] sm:$0xff]  ;;  %v413_v35 = vld [vmem:[%s2843_s1 + $0x640] sm:$0xff] }
  0x56   : > { %v1781_v0 = vpack.c.bf16 %v456_v55, %v455_v54  ;;  %v414_v36 = vld [vmem:[%s2843_s1 + $0x648] sm:$0xff]  ;;  %v445_v37 = vld [vmem:[%s2843_s1 + $0x740] sm:$0xff]  ;;  %v432_v41 = vld [vmem:[%s2843_s1 + $0x6d8] sm:$0xff] }
  0x57   : > { %1696 = vmatpush3.bf16.msra.mxu0 %v1695_v60  ;;  %v1749_v60 = vpack.c.bf16 %v424_v53, %v423_v52  ;;  %v446_v39 = vld [vmem:[%s2843_s1 + $0x748] sm:$0xff]  ;;  %v463_v42 = vld [vmem:[%s2843_s1 + $0x7d0] sm:$0xff]  ;;  %v464_v43 = vld [vmem:[%s2843_s1 + $0x7d8] sm:$0xff] }
  0x58   : > { %1728 = vmatpush3.bf16.msra.mxu1 %v1727_v61  ;;  %1698 = vmatprep.subr.bf16.mxu0 %v1697_v62  ;;  %v407_v61 = vld [vmem:[%s2843_s1 + $0x610] sm:$0xff]  ;;  %v408_v62 = vld [vmem:[%s2843_s1 + $0x618] sm:$0xff]  ;;  %v433_v52 = vld [vmem:[%s2843_s1 + $0x6e0] sm:$0xff] }
  0x59   : > { %1730 = vmatprep.subr.bf16.mxu1 %v1729_v2  ;;  %v425_v2 = vld [vmem:[%s2843_s1 + $0x6a0] sm:$0xff]  ;;  %v1751_v7 = vpack.c.bf16 %v408_v62, %v407_v61  ;;  %v415_v47 = vld [vmem:[%s2843_s1 + $0x650] sm:$0xff]  ;;  %v416_v48 = vld [vmem:[%s2843_s1 + $0x658] sm:$0xff] }
  0x5a   : > { %v447_v49 = vld [vmem:[%s2843_s1 + $0x750] sm:$0xff]  ;;  %v448_v51 = vld [vmem:[%s2843_s1 + $0x758] sm:$0xff]  ;;  %v434_v53 = vld [vmem:[%s2843_s1 + $0x6e8] sm:$0xff] }
  0x5b   : > { %1700 = vmatpush3.bf16.msra.mxu0 %v1699_v8  ;;  %v210_v8 = vld [vmem:[%s2090_s28 + $0x78] sm:$0xff]  ;;  %v465_v54 = vld [vmem:[%s2843_s1 + $0x7e0] sm:$0xff]  ;;  %v466_v55 = vld [vmem:[%s2843_s1 + $0x7e8] sm:$0xff] }
  0x5c   : > { %1732 = vmatpush3.bf16.msra.mxu1 %v1731_v9  ;;  %1702 = vmatprep.subr.bf16.mxu0 %v1701_v10  ;;  %v1783_v9 = vpack.c.bf16 %v440_v1, %v439_v63  ;;  %v1753_v10 = vpack.c.bf16 %v426_v3, %v425_v2  ;;  %v449_v61 = vld [vmem:[%s2843_s1 + $0x760] sm:$0xff]  ;;  %v1801_v62 = vpack.c.bf16 %v466_v55, %v465_v54  ;;  %v450_v63 = vld [vmem:[%s2843_s1 + $0x768] sm:$0xff]  ;;  %v436_v1 = vld [vmem:[%s2843_s1 + $0x6f8] sm:$0xff] }
  0x5d   : > { %1734 = vmatprep.subr.bf16.mxu1 %v1733_v14  ;;  %v1785_v14 = vpack.c.bf16 %v458_v5, %v457_v4  ;;  %v467_v2 = vld [vmem:[%s2843_s1 + $0x7f0] sm:$0xff]  ;;  %v468_v3 = vld [vmem:[%s2843_s1 + $0x7f8] sm:$0xff]  ;;  %v1803_v5 = vpack.c.bf16 %v450_v63, %v449_v61 }
  0x5e   : > { %v484_v63 = vld [vmem:[%s2843_s1 + $0x878] sm:$0xff] }
  0x5f   : > { %1704 = vmatpush3.bf16.msra.mxu0 %v1703_v20  ;;  %v1755_v20 = vpack.c.bf16 %v410_v12, %v409_v11  ;;  %v452_v11 = vld [vmem:[%s2843_s1 + $0x778] sm:$0xff]  ;;  %v485_v12 = vld [vmem:[%s2843_s1 + $0x880] sm:$0xff] }
  0x60   : > { %1736 = vmatpush3.bf16.msra.mxu1 %v1735_v21  ;;  %1706 = vmatprep.subr.bf16.mxu0 %v1705_v22  ;;  %v1787_v21 = vpack.c.bf16 %v442_v15, %v441_v13  ;;  %v1757_v22 = vpack.c.bf16 %v428_v17, %v427_v16  ;;  %v486_v13 = vld [vmem:[%s2843_s1 + $0x888] sm:$0xff]  ;;  %v469_v17 = vld [vmem:[%s2843_s1 + $0x800] sm:$0xff] }
  0x61   : > { %1738 = vmatprep.subr.bf16.mxu1 %v1737_v26  ;;  %v1789_v26 = vpack.c.bf16 %v460_v19, %v459_v18  ;;  %v1809_v16 = vpack.c.bf16 %v486_v13, %v485_v12  ;;  %v470_v18 = vld [vmem:[%s2843_s1 + $0x808] sm:$0xff]  ;;  %v487_v19 = vld [vmem:[%s2843_s1 + $0x890] sm:$0xff] }
  0x63   : > { %1708 = vmatpush3.bf16.msra.mxu0 %v1707_v32  ;;  %v1759_v32 = vpack.c.bf16 %v412_v24, %v411_v23  ;;  %v209_v23 = vld [vmem:[%s2090_s28 + $0x70] sm:$0xff] }
  0x64   : > { %1740 = vmatpush3.bf16.msra.mxu1 %v1739_v33  ;;  %1710 = vmatprep.subr.bf16.mxu0 %v1709_v34  ;;  %v1791_v33 = vpack.c.bf16 %v444_v27, %v443_v25  ;;  %v1761_v34 = vpack.c.bf16 %v430_v29, %v429_v28  ;;  %v471_v25 = vld [vmem:[%s2843_s1 + $0x810] sm:$0xff]  ;;  %v489_v27 = vld [vmem:[%s2843_s1 + $0x8a0] sm:$0xff]  ;;  %v490_v28 = vld [vmem:[%s2843_s1 + $0x8a8] sm:$0xff] }
  0x65   : > { %1742 = vmatprep.subr.bf16.mxu1 %v1741_v38  ;;  %v1793_v38 = vpack.c.bf16 %v462_v31, %v461_v30  ;;  %v212_v29 = vld [vmem:[%s2090_s28 + $0x88] sm:$0xff]  ;;  %v1817_v31 = vpack.c.bf16 %v490_v28, %v489_v27 }
  0x67   : > { %1712 = vmatpush3.bf16.msra.mxu0 %v1711_v44  ;;  %v1763_v44 = vpack.c.bf16 %v414_v36, %v413_v35  ;;  %v492_v35 = vld [vmem:[%s2843_s1 + $0x8b8] sm:$0xff] }
  0x68   : > { %1744 = vmatpush3.bf16.msra.mxu1 %v1743_v45  ;;  %1746 = vmatprep.subr.bf16.mxu0 %v1745_v46  ;;  %v1795_v45 = vpack.c.bf16 %v446_v39, %v445_v37  ;;  %v1765_v46 = vpack.c.bf16 %v432_v41, %v431_v40  ;;  %v476_v39 = vld [vmem:[%s2843_s1 + $0x838] sm:$0xff]  ;;  %v493_v40 = vld [vmem:[%s2843_s1 + $0x8c0] sm:$0xff]  ;;  %v494_v41 = vld [vmem:[%s2843_s1 + $0x8c8] sm:$0xff] }
  0x69   : > { %1778 = vmatprep.subr.bf16.mxu1 %v1777_v50  ;;  %v1797_v50 = vpack.c.bf16 %v464_v43, %v463_v42  ;;  %v1825_v43 = vpack.c.bf16 %v494_v41, %v493_v40 }
  0x6a   : > { %846 = vmatmul.mubr.f32.vlgmr.msra.gmra.mrb[4].mxu0 %v203_v56  ;;  %v1767_v56 = vpack.c.bf16 %v416_v48, %v415_v47  ;;  %v496_v47 = vld [vmem:[%s2843_s1 + $0x8d8] sm:$0xff] }
  0x6b   : > { %1748 = vmatpush3.bf16.msra.mxu0 %v1747_v57  ;;  %916 = vmatmul.mubr.f32.vlgmr.msra.gmra.mrb[4].mxu1 %v205_v58  ;;  %v1799_v57 = vpack.c.bf16 %v448_v51, %v447_v49  ;;  %v1769_v58 = vpack.c.bf16 %v434_v53, %v433_v52  ;;  %v480_v51 = vld [vmem:[%s2843_s1 + $0x858] sm:$0xff]  ;;  %v497_v52 = vld [vmem:[%s2843_s1 + $0x8e0] sm:$0xff]  ;;  %v498_v53 = vld [vmem:[%s2843_s1 + $0x8e8] sm:$0xff] }
  0x6c   : > { %1780 = vmatpush3.bf16.msra.mxu1 %v1779_v59  ;;  %1750 = vmatprep.subr.bf16.mxu0 %v1749_v60  ;;  %v417_v59 = vld [vmem:[%s2843_s1 + $0x660] sm:$0xff]  ;;  %v418_v60 = vld [vmem:[%s2843_s1 + $0x668] sm:$0xff]  ;;  %v1833_v55 = vpack.c.bf16 %v498_v53, %v497_v52 }
  0x6d   : > { %1782 = vmatprep.subr.bf16.mxu1 %v1781_v0  ;;  %985 = vmatprep.mubr.f32.mxu0 %v208_v6  ;;  %v435_v0 = vld [vmem:[%s2843_s1 + $0x6f0] sm:$0xff]  ;;  %v1771_v4 = vpack.c.bf16 %v418_v60, %v417_v59  ;;  %v500_v59 = vld [vmem:[%s2843_s1 + $0x8f8] sm:$0xff] }
  0x6e   : > { %1055 = vmatprep.mubr.f32.mxu1 %v210_v8  ;;  %v1773_v6 = vpack.c.bf16 %v436_v1, %v435_v0  ;;  %v420_v8 = vld [vmem:[%s2843_s1 + $0x678] sm:$0xff]  ;;  %v211_v1 = vld [vmem:[%s2090_s28 + $0x80] sm:$0xff] }
  0x6f   : > { %1752 = vmatpush3.bf16.msra.mxu0 %v1751_v7  ;;  %v419_v7 = vld [vmem:[%s2843_s1 + $0x670] sm:$0xff] }
  0x70   : > { %1784 = vmatpush3.bf16.msra.mxu1 %v1783_v9  ;;  %1754 = vmatprep.subr.bf16.mxu0 %v1753_v10  ;;  %v451_v9 = vld [vmem:[%s2843_s1 + $0x770] sm:$0xff]  ;;  %v1805_v10 = vpack.c.bf16 %v468_v3, %v467_v2 }
  0x71   : > { %1786 = vmatprep.subr.bf16.mxu1 %v1785_v14  ;;  %v1775_v14 = vpack.c.bf16 %v420_v8, %v419_v7  ;;  %v1807_v15 = vpack.c.bf16 %v452_v11, %v451_v9 }
  0x73   : > { %1756 = vmatpush3.bf16.msra.mxu0 %v1755_v20  ;;  %v488_v20 = vld [vmem:[%s2843_s1 + $0x898] sm:$0xff] }
  0x74   : > { %1788 = vmatpush3.bf16.msra.mxu1 %v1787_v21  ;;  %1758 = vmatprep.subr.bf16.mxu0 %v1757_v22  ;;  %v207_v21 = vld [vmem:[%s2090_s28 + $0x60] sm:$0xff]  ;;  %v1811_v22 = vpack.c.bf16 %v470_v18, %v469_v17  ;;  %v1813_v24 = vpack.c.bf16 %v488_v20, %v487_v19 }
  0x75   : > { %1790 = vmatprep.subr.bf16.mxu1 %v1789_v26  ;;  %v472_v26 = vld [vmem:[%s2843_s1 + $0x818] sm:$0xff] }
  0x76   : > { %v1815_v30 = vpack.c.bf16 %v472_v26, %v471_v25 }
  0x77   : > { %1760 = vmatpush3.bf16.msra.mxu0 %v1759_v32  ;;  %v473_v32 = vld [vmem:[%s2843_s1 + $0x820] sm:$0xff] }
  0x78   : > { %1792 = vmatpush3.bf16.msra.mxu1 %v1791_v33  ;;  %1762 = vmatprep.subr.bf16.mxu0 %v1761_v34  ;;  %v474_v33 = vld [vmem:[%s2843_s1 + $0x828] sm:$0xff]  ;;  %v491_v34 = vld [vmem:[%s2843_s1 + $0x8b0] sm:$0xff] }
  0x79   : > { %1794 = vmatprep.subr.bf16.mxu1 %v1793_v38  ;;  %v1819_v36 = vpack.c.bf16 %v474_v33, %v473_v32  ;;  %v1821_v37 = vpack.c.bf16 %v492_v35, %v491_v34  ;;  %v475_v38 = vld [vmem:[%s2843_s1 + $0x830] sm:$0xff] }
  0x7a   : > { %v1823_v42 = vpack.c.bf16 %v476_v39, %v475_v38 }
  0x7b   : > { %1764 = vmatpush3.bf16.msra.mxu0 %v1763_v44  ;;  %v477_v44 = vld [vmem:[%s2843_s1 + $0x840] sm:$0xff] }
  0x7c   : > { %1796 = vmatpush3.bf16.msra.mxu1 %v1795_v45  ;;  %1766 = vmatprep.subr.bf16.mxu0 %v1765_v46  ;;  %v478_v45 = vld [vmem:[%s2843_s1 + $0x848] sm:$0xff]  ;;  %v495_v46 = vld [vmem:[%s2843_s1 + $0x8d0] sm:$0xff] }
  0x7d   : > { %1798 = vmatprep.subr.bf16.mxu1 %v1797_v50  ;;  %v1827_v48 = vpack.c.bf16 %v478_v45, %v477_v44  ;;  %v1829_v49 = vpack.c.bf16 %v496_v47, %v495_v46  ;;  %v479_v50 = vld [vmem:[%s2843_s1 + $0x850] sm:$0xff] }
  0x7e   : > { %v1831_v54 = vpack.c.bf16 %v480_v51, %v479_v50 }
  0x7f   : > { %1768 = vmatpush3.bf16.msra.mxu0 %v1767_v56  ;;  %v481_v56 = vld [vmem:[%s2843_s1 + $0x860] sm:$0xff] }
  0x80   : > { %1800 = vmatpush3.bf16.msra.mxu1 %v1799_v57  ;;  %1770 = vmatprep.subr.bf16.mxu0 %v1769_v58  ;;  %v482_v57 = vld [vmem:[%s2843_s1 + $0x868] sm:$0xff]  ;;  %v499_v58 = vld [vmem:[%s2843_s1 + $0x8f0] sm:$0xff] }
  0x81   : > { %1802 = vmatprep.subr.bf16.mxu1 %v1801_v62  ;;  %v1835_v60 = vpack.c.bf16 %v482_v57, %v481_v56  ;;  %v1837_v61 = vpack.c.bf16 %v500_v59, %v499_v58  ;;  %v483_v62 = vld [vmem:[%s2843_s1 + $0x870] sm:$0xff] }
  0x82   : > { %v1839_v0 = vpack.c.bf16 %v484_v63, %v483_v62 }
  0x83   : > { %1772 = vmatpush3.bf16.msra.mxu0 %v1771_v4 }
  0x84   : > { %1804 = vmatpush3.bf16.msra.mxu1 %v1803_v5  ;;  %1774 = vmatprep.subr.bf16.mxu0 %v1773_v6 }
  0x85   : > { %1806 = vmatprep.subr.bf16.mxu1 %v1805_v10 }
  0x87   : > { %1776 = vmatpush3.bf16.msra.mxu0 %v1775_v14 }
  0x88   : > { %1808 = vmatpush3.bf16.msra.mxu1 %v1807_v15  ;;  %1810 = vmatprep.subr.bf16.mxu0 %v1809_v16 }
  0x8a   : > { %986 = vmatmul.mubr.f32.vlgmr.msra.gmra.mrb[6].mxu0 %v207_v21 }
  0x8b   : > { %1812 = vmatpush3.bf16.msra.mxu0 %v1811_v22  ;;  %1056 = vmatmul.mubr.f32.vlgmr.msra.gmra.mrb[6].mxu1 %v209_v23 }
  0x8c   : > { %1814 = vmatprep.subr.bf16.mxu0 %v1813_v24  ;;  %1125 = vmatprep.mubr.f32.mxu0 %v212_v29 }
  0x8f   : > { %1816 = vmatpush3.bf16.msra.mxu0 %v1815_v30 }
  0x90   : > { %1818 = vmatprep.subr.bf16.mxu0 %v1817_v31 }
  0x93   : > { %1820 = vmatpush3.bf16.msra.mxu0 %v1819_v36 }
  0x94   : > { %1822 = vmatprep.subr.bf16.mxu0 %v1821_v37 }
  0x97   : > { %1824 = vmatpush3.bf16.msra.mxu0 %v1823_v42 }
  0x98   : > { %1826 = vmatprep.subr.bf16.mxu0 %v1825_v43 }
  0x9b   : > { %1828 = vmatpush3.bf16.msra.mxu0 %v1827_v48 }
  0x9c   : > { %1830 = vmatprep.subr.bf16.mxu0 %v1829_v49 }
  0x9f   : > { %1832 = vmatpush3.bf16.msra.mxu0 %v1831_v54 }
  0xa0   : > { %1834 = vmatprep.subr.bf16.mxu0 %v1833_v55 }
  0xa3   : > { %1836 = vmatpush3.bf16.msra.mxu0 %v1835_v60 }
  0xa4   : > { %1838 = vmatprep.subr.bf16.mxu0 %v1837_v61 }
  0xa7   : > { %1840 = vmatpush3.bf16.msra.mxu0 %v1839_v0 }
  0xaa   : > { %1126 = vmatmul.mubr.f32.vlgmr.msra.gmra.mrb[8].mxu0 %v211_v1 }
  0xfd   : > { %v1270_v2 = vpop.f32.mrb[0].mxu0 }
  0xfe   : > { %v1305_v3 = vpop.f32.mrb[0].mxu1  ;;  %v1271_v4 = vpop.f32.mrb[1].mxu0 }
  0xff   : > { %v1272_v5 = vadd.f32 %v1271_v4, %v1270_v2  ;;  %v1306_v6 = vpop.f32.mrb[1].mxu1 }
 0x100   : > { %v1307_v7 = vadd.f32 %v1306_v6, %v1305_v3 }
 0x102   : > { %v638_v8 = vadd.f32 %v1307_v7, %v1272_v5 }
 0x11d   : > { %v1340_v9 = vpop.f32.mrb[2].mxu0 }
 0x11e   : > { %v1341_v10 = vpop.f32.mrb[3].mxu0  ;;  %v1375_v11 = vpop.f32.mrb[2].mxu1 }
 0x11f   : > { %v1342_v12 = vadd.f32 %v1341_v10, %v1340_v9  ;;  %v1376_v13 = vpop.f32.mrb[3].mxu1 }
 0x120   : > { %v1377_v14 = vadd.f32 %v1376_v13, %v1375_v11 }
 0x121   : > { %v708_v15 = vadd.f32 %v1342_v12, %v638_v8 }
 0x123   : > { %v778_v16 = vadd.f32 %v1377_v14, %v708_v15 }
 0x13d   : > { %v1410_v17 = vpop.f32.mrb[4].mxu0 }
 0x13e   : > { %v1411_v18 = vpop.f32.mrb[5].mxu0  ;;  %v1445_v19 = vpop.f32.mrb[4].mxu1 }
 0x13f   : > { %v1412_v20 = vadd.f32 %v1411_v18, %v1410_v17  ;;  %v1446_v21 = vpop.f32.mrb[5].mxu1 }
 0x140   : > { %v1447_v22 = vadd.f32 %v1446_v21, %v1445_v19 }
 0x141   : > { %v848_v23 = vadd.f32 %v1412_v20, %v778_v16 }
 0x143   : > { %v918_v24 = vadd.f32 %v1447_v22, %v848_v23 }
 0x15d   : > { %v1480_v25 = vpop.f32.mrb[6].mxu0 }
 0x15e   : > { %v1481_v26 = vpop.f32.mrb[7].mxu0  ;;  %v1515_v27 = vpop.f32.mrb[6].mxu1 }
 0x15f   : > { %v1482_v28 = vadd.f32 %v1481_v26, %v1480_v25  ;;  %v1516_v29 = vpop.f32.mrb[7].mxu1 }
 0x160   : > { %v1517_v30 = vadd.f32 %v1516_v29, %v1515_v27 }
 0x161   : > { %v988_v31 = vadd.f32 %v1482_v28, %v918_v24 }
 0x163   : > { %v1058_v32 = vadd.f32 %v1517_v30, %v988_v31 }
 0x17b   : > { %1134 = sbr.rel (%p1231_p5) target bundleno = 388 (0x184), region = 36 }
 0x17d   : > { %v1550_v33 = vpop.f32.mrb[8].mxu0 }
 0x17e   : > { %v1551_v34 = vpop.f32.mrb[9].mxu0 }
 0x17f   : > { %v1552_v35 = vadd.f32 %v1551_v34, %v1550_v33 }
 0x181   : > { %v1128_v36 = vadd.f32 %v1552_v35, %v1058_v32 }
 0x183   : > { %1135 = vst [vmem:[#allocation2] sm:$0xff] %v1128_v36 }
 0x184 PF: > { %p1232_p6 = scmp.le.s32.totalorder %s1880_s12, 0 }
 0x186   : > { %1139 = sbr.rel (%p1232_p6) target bundleno = 398 (0x18e), region = 40 }
 0x18a   : > { %v1140_v37 = vld [vmem:[#allocation2] sm:$0xff] (!%p1232_p6) }
 0x18b   : > { %v1141_v38 = vmax.f32 (!%p1232_p6), %v1140_v37, %v1128_v36 }
 0x18d   : > { %1142 = vst [vmem:[#allocation2] sm:$0xff] %v1141_v38 }
 0x18e PF: > { %p1233_p7 = scmp.ne.s32.totalorder %s1880_s12, 3 }
 0x18f   : > { %v1234_v40 = vld [vmem:[%s2844_s2] ss:$0 sm:$0xff] (!%p1233_p7) }
 0x190   : > { %1146 = sbr.rel (%p1233_p7) target bundleno = 410 (0x19a), region = 44 }
 0x194   : > { %v1147_v39 = vld [vmem:[#allocation2] sm:$0xff] (!%p1233_p7) }
 0x195   : > { %v1155_v41 = vadd.f32 (!%p1233_p7), %v1234_v40, %v1147_v39 }
 0x197   : > { %v1156_v42 = vmax.f32 %v1155_v41, 0.0 }
 0x199   : > { %1157 = vst [vmem:[%s2845_s3] sm:$0xff] %v1156_v42 }
 0x19a PF: > { %s13_s14 = sadd.s32 1, %s1888_s14   ;;  %s2846_s12 = smov %s1884_s13 }
 0x19b   : > { %p10_p8 = scmp.ge.s32.totalorder %s13_s14, 6   ;;  %s2847_s13 = smov %s2849_s15 }
 0x19d   :  { %12 = sbr.rel (!%p10_p8) target bundleno = 2 (0x2), region = 74 }

</bundles_post_ra>
